<compile_context>
chip_gen: v7x
topology: tpu7x:2x2x1
jax: 0.10.0
libtpu: 0.0.40
codegen_flags: <defaults>
</compile_context>

<pallas_src>
import functools

import jax
import jax.numpy as jnp
from jax.experimental import pallas as pl
from jax.experimental.pallas import tpu as pltpu


def _round_up(v, m):
    return ((v + m - 1) // m) * m


def _cheb_layer(lhat_bf, x_bf, w_ref, b_ref, *, K):
    """One ChebConv layer with per-k accumulation (no materialized stack).

    T_0 = x, T_1 = L_hat x, T_k = 2 L_hat T_{k-1} - T_{k-2}
    out = sum_k T_k @ W_k + b
    All MXU matmuls take bf16 operands with f32 accumulation; the recursion
    carries bf16 T's (combine done in f32, then re-rounded).
    """
    acc = jnp.dot(x_bf, w_ref[0], preferred_element_type=jnp.float32)      # T_0 W_0
    if K > 1:
        prev_bf = x_bf                                                      # T_0
        cur_bf = jnp.dot(lhat_bf, x_bf,                                     # T_1
                         preferred_element_type=jnp.float32).astype(jnp.bfloat16)
        acc = acc + jnp.dot(cur_bf, w_ref[1], preferred_element_type=jnp.float32)
        for k in range(2, K):                                               # T_k
            new_f32 = (2.0 * jnp.dot(lhat_bf, cur_bf,
                                     preferred_element_type=jnp.float32)
                       - prev_bf.astype(jnp.float32))
            new_bf = new_f32.astype(jnp.bfloat16)
            acc = acc + jnp.dot(new_bf, w_ref[k],
                                preferred_element_type=jnp.float32)
            prev_bf, cur_bf = cur_bf, new_bf
    return acc + b_ref[...]                                                 # (1,Fout) bcast


def kipfnet_kernel(lhat_ref, x_ref, w1_ref, b1_ref, w2_ref, b2_ref, o_ref, *, K):
    lhat = lhat_ref[...]                                                    # (NP, NP) bf16
    h = _cheb_layer(lhat, x_ref[...], w1_ref, b1_ref, K=K)                  # conv1
    h = jnp.maximum(h, 0.0)                                                 # fused ReLU
    # eval-mode dropout == identity
    out = _cheb_layer(lhat, h.astype(jnp.bfloat16), w2_ref, b2_ref, K=K)    # conv2
    o_ref[...] = out


def kipfnet_pallas(lhat, x, w1, b1, w2, b2):
    N, Fin = x.shape
    K, _, H = w1.shape
    C = w2.shape[2]

    NP = _round_up(N, 128)
    FP = _round_up(Fin, 128)
    HP = _round_up(H, 128)
    CP = _round_up(C, 128)

    # Wrapper-side layout plumbing: zero-pad to 128-multiples directly in bf16
    # (zero rows/cols contribute exactly nothing, also in bf16).
    lhat_p = (jnp.zeros((NP, NP), jnp.bfloat16)
              .at[:N, :N].set(lhat.astype(jnp.bfloat16)))
    x_p = (jnp.zeros((NP, FP), jnp.bfloat16)
           .at[:N, :Fin].set(x.astype(jnp.bfloat16)))
    w1_p = (jnp.zeros((K, FP, HP), jnp.bfloat16)
            .at[:, :Fin, :H].set(w1.astype(jnp.bfloat16)))
    b1_p = jnp.zeros((1, HP), jnp.float32).at[0, :H].set(b1)
    w2_p = (jnp.zeros((K, HP, CP), jnp.bfloat16)
            .at[:, :H, :C].set(w2.astype(jnp.bfloat16)))
    b2_p = jnp.zeros((1, CP), jnp.float32).at[0, :C].set(b2)

    # Honest VMEM budget for the single-program design.
    resident = 2 * (NP * NP + NP * FP + K * FP * HP + K * HP * CP)    # bf16 inputs
    resident += 4 * (8 * HP + 8 * CP) + 4 * NP * CP                   # f32 biases + out
    live_tmp = (4 * NP * HP                                           # L1 f32 accumulator / h
                + 2 * 2 * NP * FP                                     # L1 bf16 prev/cur
                + 2 * NP * HP                                         # h as bf16
                + 4 * NP * CP                                         # L2 f32 accumulator
                + 2 * 2 * NP * HP)                                    # L2 bf16 prev/cur
    vmem_needed = resident + live_tmp

    try:
        vmem_capacity = pltpu.get_tpu_info().vmem_capacity_bytes
    except Exception:
        vmem_capacity = 64 << 20                                      # v7x lower bound

    # 25% + 4 MiB headroom for compiler-internal scratch / spills, but never
    # below the 32 MiB most generations default to and never above physical.
    vmem_request = max(int(vmem_needed * 1.25) + (4 << 20), 32 << 20)
    vmem_request = min(vmem_request, vmem_capacity)
    assert int(vmem_needed * 1.25) + (4 << 20) <= vmem_capacity, (
        f"graph too large for the single-program VMEM-resident kernel "
        f"(need ~{vmem_needed >> 20} MiB of {vmem_capacity >> 20} MiB); "
        "tile lhat into blocks with a grid instead")

    out = pl.pallas_call(
        functools.partial(kipfnet_kernel, K=K),
        out_shape=jax.ShapeDtypeStruct((NP, CP), jnp.float32),
        in_specs=[pl.BlockSpec(memory_space=pltpu.MemorySpace.VMEM)] * 6,
        out_specs=pl.BlockSpec(memory_space=pltpu.MemorySpace.VMEM),
        compiler_params=pltpu.CompilerParams(vmem_limit_bytes=vmem_request),
    )(lhat_p, x_p, w1_p, b1_p, w2_p, b2_p)
    return out[:N, :C]


def build_scaled_laplacian(edge_index, num_nodes):
    """Glue JAX: dense scaled Chebyshev Laplacian (sym norm, lambda_max=2.0)."""
    row, col = edge_index
    a = jnp.zeros((num_nodes, num_nodes), jnp.float32).at[row, col].add(1.0)
    deg = a.sum(axis=1)
    d_inv_sqrt = jnp.where(deg > 0, 1.0 / jnp.sqrt(deg), 0.0)          # inf -> 0
    a_norm = d_inv_sqrt[:, None] * a * d_inv_sqrt[None, :]
    # (2/lambda_max) * (I - A_norm) - I with lambda_max = 2.0  ==  -A_norm
    return -a_norm


def kipfnet_forward(x, edge_index, params):
    lhat = build_scaled_laplacian(edge_index, x.shape[0])
    return kipfnet_pallas(lhat, x, params["w1"], params["b1"],
                          params["w2"], params["b2"])


# ----------------------------- references -----------------------------------
def _cheb_layer_ref_bf16(lhat_bf, x_bf, w, b, K):
    """Precision-matched (bf16 operands, f32 accum, per-k) reference."""
    w_bf = w.astype(jnp.bfloat16)
    acc = jnp.dot(x_bf, w_bf[0], preferred_element_type=jnp.float32)
    prev_bf = x_bf
    cur_bf = jnp.dot(lhat_bf, x_bf,
                     preferred_element_type=jnp.float32).astype(jnp.bfloat16)
    acc = acc + jnp.dot(cur_bf, w_bf[1], preferred_element_type=jnp.float32)
    for k in range(2, K):
        new_bf = (2.0 * jnp.dot(lhat_bf, cur_bf,
                                preferred_element_type=jnp.float32)
                  - prev_bf.astype(jnp.float32)).astype(jnp.bfloat16)
        acc = acc + jnp.dot(new_bf, w_bf[k], preferred_element_type=jnp.float32)
        prev_bf, cur_bf = cur_bf, new_bf
    return acc + b[None, :]


def _kipfnet_ref_bf16(lhat, x, params, K):
    lhat_bf = lhat.astype(jnp.bfloat16)
    h = jnp.maximum(_cheb_layer_ref_bf16(lhat_bf, x.astype(jnp.bfloat16),
                                         params["w1"], params["b1"], K), 0.0)
    return _cheb_layer_ref_bf16(lhat_bf, h.astype(jnp.bfloat16),
                                params["w2"], params["b2"], K)


def _cheb_layer_ref_f32(lhat, x, w, b, K):
    acc = x @ w[0]
    prev, cur = x, lhat @ x
    acc = acc + cur @ w[1]
    for k in range(2, K):
        new = 2.0 * (lhat @ cur) - prev
        acc = acc + new @ w[k]
        prev, cur = cur, new
    return acc + b[None, :]


def _kipfnet_ref_f32(lhat, x, params, K):
    h = jnp.maximum(_cheb_layer_ref_f32(lhat, x, params["w1"], params["b1"], K), 0.0)
    return _cheb_layer_ref_f32(lhat, h, params["w2"], params["b2"], K)


if __name__ == "__main__":
    # Small synthetic graph: N nodes on a bidirectional ring.
    N = 32
    num_features = 16
    nh1 = 64
    num_classes = 8
    K = 8

    key = jax.random.PRNGKey(0)
    k_x, k_w1, k_w2 = jax.random.split(key, 3)

    x = jax.random.normal(k_x, (N, num_features), jnp.float32)
    src = jnp.arange(N, dtype=jnp.int32)
    dst = (src + 1) % N
    edge_index = jnp.stack(
        [jnp.concatenate([src, dst]), jnp.concatenate([dst, src])], axis=0)

    # Deterministic parameter init (glorot-ish scale; zero bias like PyG).
    params = {
        "w1": jax.random.normal(k_w1, (K, num_features, nh1), jnp.float32)
              * (1.0 / jnp.sqrt(float(num_features * K))),
        "b1": jnp.zeros((nh1,), jnp.float32),
        "w2": jax.random.normal(k_w2, (K, nh1, num_classes), jnp.float32)
              * (1.0 / jnp.sqrt(float(nh1 * K))),
        "b2": jnp.zeros((num_classes,), jnp.float32),
    }

    out = jax.block_until_ready(kipfnet_forward(x, edge_index, params))
    assert out.shape == (N, num_classes)

    lhat = build_scaled_laplacian(edge_index, N)
    # Tight check vs precision-matched (bf16/f32) reference.
    out_ref_bf16 = _kipfnet_ref_bf16(lhat, x, params, K)
    assert jnp.allclose(out, out_ref_bf16, atol=2e-2, rtol=2e-2), \
        "mismatch vs precision-matched reference"
    # Loose check vs full-f32 reference (measures bf16 drift vs the PyTorch model).
    out_ref_f32 = _kipfnet_ref_f32(lhat, x, params, K)
    assert jnp.allclose(out, out_ref_f32, atol=1e-1, rtol=1e-1), \
        "bf16 drift vs f32 reference exceeds budget"

    print("KERNEL_OK")
</pallas_src>

<mosaic_0001>
module attributes {stable_mosaic.version = 11 : i64} {
  func.func @kipfnet_kernel(%arg0: memref<128x128xbf16, #tpu.memory_space<vmem>>, %arg1: memref<128x128xbf16, #tpu.memory_space<vmem>>, %arg2: memref<8x128x128xbf16, #tpu.memory_space<vmem>>, %arg3: memref<1x128xf32, #tpu.memory_space<vmem>>, %arg4: memref<8x128x128xbf16, #tpu.memory_space<vmem>>, %arg5: memref<1x128xf32, #tpu.memory_space<vmem>>, %arg6: memref<128x128xf32, #tpu.memory_space<vmem>>) attributes {dimension_semantics = [], scalar_prefetch = 0 : i64, scratch_operands = 0 : i64, tpu.core_type = #tpu.core_type<tc>} {
    %c0 = arith.constant 0 : index
    %c0_0 = arith.constant 0 : index
    %0 = vector.load %arg0[%c0, %c0_0] : memref<128x128xbf16, #tpu.memory_space<vmem>>, vector<128x128xbf16>
    %c0_1 = arith.constant 0 : index
    %c0_2 = arith.constant 0 : index
    %1 = vector.load %arg1[%c0_1, %c0_2] : memref<128x128xbf16, #tpu.memory_space<vmem>>, vector<128x128xbf16>
    %c0_3 = arith.constant 0 : index
    %c0_4 = arith.constant 0 : index
    %c0_5 = arith.constant 0 : index
    %2 = vector.load %arg2[%c0_3, %c0_4, %c0_5] : memref<8x128x128xbf16, #tpu.memory_space<vmem>>, vector<1x128x128xbf16>
    %3 = vector.shape_cast %2 : vector<1x128x128xbf16> to vector<128x128xbf16>
    %cst = arith.constant dense<0.000000e+00> : vector<128x128xf32>
    %4 = tpu.matmul %1, %3, %cst {dimension_numbers = #tpu.dot_dimension_numbers<[1], [0], [0], [1], [0, 0, 1, 1], [], []>} : vector<128x128xbf16>, vector<128x128xbf16>, vector<128x128xf32> -> vector<128x128xf32>
    %cst_6 = arith.constant dense<0.000000e+00> : vector<128x128xf32>
    %5 = tpu.matmul %0, %1, %cst_6 {dimension_numbers = #tpu.dot_dimension_numbers<[1], [0], [0], [1], [0, 0, 1, 1], [], []>} : vector<128x128xbf16>, vector<128x128xbf16>, vector<128x128xf32> -> vector<128x128xf32>
    %6 = arith.truncf %5 : vector<128x128xf32> to vector<128x128xbf16>
    %c1 = arith.constant 1 : index
    %c0_7 = arith.constant 0 : index
    %c0_8 = arith.constant 0 : index
    %7 = vector.load %arg2[%c1, %c0_7, %c0_8] : memref<8x128x128xbf16, #tpu.memory_space<vmem>>, vector<1x128x128xbf16>
    %8 = vector.shape_cast %7 : vector<1x128x128xbf16> to vector<128x128xbf16>
    %cst_9 = arith.constant dense<0.000000e+00> : vector<128x128xf32>
    %9 = tpu.matmul %6, %8, %cst_9 {dimension_numbers = #tpu.dot_dimension_numbers<[1], [0], [0], [1], [0, 0, 1, 1], [], []>} : vector<128x128xbf16>, vector<128x128xbf16>, vector<128x128xf32> -> vector<128x128xf32>
    %10 = arith.addf %4, %9 : vector<128x128xf32>
    %cst_10 = arith.constant dense<0.000000e+00> : vector<128x128xf32>
    %11 = tpu.matmul %0, %6, %cst_10 {dimension_numbers = #tpu.dot_dimension_numbers<[1], [0], [0], [1], [0, 0, 1, 1], [], []>} : vector<128x128xbf16>, vector<128x128xbf16>, vector<128x128xf32> -> vector<128x128xf32>
    %cst_11 = arith.constant 2.000000e+00 : f32
    %12 = vector.broadcast %cst_11 : f32 to vector<128x128xf32>
    %13 = arith.mulf %12, %11 : vector<128x128xf32>
    %14 = arith.extf %1 : vector<128x128xbf16> to vector<128x128xf32>
    %15 = arith.subf %13, %14 : vector<128x128xf32>
    %16 = arith.truncf %15 : vector<128x128xf32> to vector<128x128xbf16>
    %c2 = arith.constant 2 : index
    %c0_12 = arith.constant 0 : index
    %c0_13 = arith.constant 0 : index
    %17 = vector.load %arg2[%c2, %c0_12, %c0_13] : memref<8x128x128xbf16, #tpu.memory_space<vmem>>, vector<1x128x128xbf16>
    %18 = vector.shape_cast %17 : vector<1x128x128xbf16> to vector<128x128xbf16>
    %cst_14 = arith.constant dense<0.000000e+00> : vector<128x128xf32>
    %19 = tpu.matmul %16, %18, %cst_14 {dimension_numbers = #tpu.dot_dimension_numbers<[1], [0], [0], [1], [0, 0, 1, 1], [], []>} : vector<128x128xbf16>, vector<128x128xbf16>, vector<128x128xf32> -> vector<128x128xf32>
    %20 = arith.addf %10, %19 : vector<128x128xf32>
    %cst_15 = arith.constant dense<0.000000e+00> : vector<128x128xf32>
    %21 = tpu.matmul %0, %16, %cst_15 {dimension_numbers = #tpu.dot_dimension_numbers<[1], [0], [0], [1], [0, 0, 1, 1], [], []>} : vector<128x128xbf16>, vector<128x128xbf16>, vector<128x128xf32> -> vector<128x128xf32>
    %cst_16 = arith.constant 2.000000e+00 : f32
    %22 = vector.broadcast %cst_16 : f32 to vector<128x128xf32>
    %23 = arith.mulf %22, %21 : vector<128x128xf32>
    %24 = arith.extf %6 : vector<128x128xbf16> to vector<128x128xf32>
    %25 = arith.subf %23, %24 : vector<128x128xf32>
    %26 = arith.truncf %25 : vector<128x128xf32> to vector<128x128xbf16>
    %c3 = arith.constant 3 : index
    %c0_17 = arith.constant 0 : index
    %c0_18 = arith.constant 0 : index
    %27 = vector.load %arg2[%c3, %c0_17, %c0_18] : memref<8x128x128xbf16, #tpu.memory_space<vmem>>, vector<1x128x128xbf16>
    %28 = vector.shape_cast %27 : vector<1x128x128xbf16> to vector<128x128xbf16>
    %cst_19 = arith.constant dense<0.000000e+00> : vector<128x128xf32>
    %29 = tpu.matmul %26, %28, %cst_19 {dimension_numbers = #tpu.dot_dimension_numbers<[1], [0], [0], [1], [0, 0, 1, 1], [], []>} : vector<128x128xbf16>, vector<128x128xbf16>, vector<128x128xf32> -> vector<128x128xf32>
    %30 = arith.addf %20, %29 : vector<128x128xf32>
    %cst_20 = arith.constant dense<0.000000e+00> : vector<128x128xf32>
    %31 = tpu.matmul %0, %26, %cst_20 {dimension_numbers = #tpu.dot_dimension_numbers<[1], [0], [0], [1], [0, 0, 1, 1], [], []>} : vector<128x128xbf16>, vector<128x128xbf16>, vector<128x128xf32> -> vector<128x128xf32>
    %cst_21 = arith.constant 2.000000e+00 : f32
    %32 = vector.broadcast %cst_21 : f32 to vector<128x128xf32>
    %33 = arith.mulf %32, %31 : vector<128x128xf32>
    %34 = arith.extf %16 : vector<128x128xbf16> to vector<128x128xf32>
    %35 = arith.subf %33, %34 : vector<128x128xf32>
    %36 = arith.truncf %35 : vector<128x128xf32> to vector<128x128xbf16>
    %c4 = arith.constant 4 : index
    %c0_22 = arith.constant 0 : index
    %c0_23 = arith.constant 0 : index
    %37 = vector.load %arg2[%c4, %c0_22, %c0_23] : memref<8x128x128xbf16, #tpu.memory_space<vmem>>, vector<1x128x128xbf16>
    %38 = vector.shape_cast %37 : vector<1x128x128xbf16> to vector<128x128xbf16>
    %cst_24 = arith.constant dense<0.000000e+00> : vector<128x128xf32>
    %39 = tpu.matmul %36, %38, %cst_24 {dimension_numbers = #tpu.dot_dimension_numbers<[1], [0], [0], [1], [0, 0, 1, 1], [], []>} : vector<128x128xbf16>, vector<128x128xbf16>, vector<128x128xf32> -> vector<128x128xf32>
    %40 = arith.addf %30, %39 : vector<128x128xf32>
    %cst_25 = arith.constant dense<0.000000e+00> : vector<128x128xf32>
    %41 = tpu.matmul %0, %36, %cst_25 {dimension_numbers = #tpu.dot_dimension_numbers<[1], [0], [0], [1], [0, 0, 1, 1], [], []>} : vector<128x128xbf16>, vector<128x128xbf16>, vector<128x128xf32> -> vector<128x128xf32>
    %cst_26 = arith.constant 2.000000e+00 : f32
    %42 = vector.broadcast %cst_26 : f32 to vector<128x128xf32>
    %43 = arith.mulf %42, %41 : vector<128x128xf32>
    %44 = arith.extf %26 : vector<128x128xbf16> to vector<128x128xf32>
    %45 = arith.subf %43, %44 : vector<128x128xf32>
    %46 = arith.truncf %45 : vector<128x128xf32> to vector<128x128xbf16>
    %c5 = arith.constant 5 : index
    %c0_27 = arith.constant 0 : index
    %c0_28 = arith.constant 0 : index
    %47 = vector.load %arg2[%c5, %c0_27, %c0_28] : memref<8x128x128xbf16, #tpu.memory_space<vmem>>, vector<1x128x128xbf16>
    %48 = vector.shape_cast %47 : vector<1x128x128xbf16> to vector<128x128xbf16>
    %cst_29 = arith.constant dense<0.000000e+00> : vector<128x128xf32>
    %49 = tpu.matmul %46, %48, %cst_29 {dimension_numbers = #tpu.dot_dimension_numbers<[1], [0], [0], [1], [0, 0, 1, 1], [], []>} : vector<128x128xbf16>, vector<128x128xbf16>, vector<128x128xf32> -> vector<128x128xf32>
    %50 = arith.addf %40, %49 : vector<128x128xf32>
    %cst_30 = arith.constant dense<0.000000e+00> : vector<128x128xf32>
    %51 = tpu.matmul %0, %46, %cst_30 {dimension_numbers = #tpu.dot_dimension_numbers<[1], [0], [0], [1], [0, 0, 1, 1], [], []>} : vector<128x128xbf16>, vector<128x128xbf16>, vector<128x128xf32> -> vector<128x128xf32>
    %cst_31 = arith.constant 2.000000e+00 : f32
    %52 = vector.broadcast %cst_31 : f32 to vector<128x128xf32>
    %53 = arith.mulf %52, %51 : vector<128x128xf32>
    %54 = arith.extf %36 : vector<128x128xbf16> to vector<128x128xf32>
    %55 = arith.subf %53, %54 : vector<128x128xf32>
    %56 = arith.truncf %55 : vector<128x128xf32> to vector<128x128xbf16>
    %c6 = arith.constant 6 : index
    %c0_32 = arith.constant 0 : index
    %c0_33 = arith.constant 0 : index
    %57 = vector.load %arg2[%c6, %c0_32, %c0_33] : memref<8x128x128xbf16, #tpu.memory_space<vmem>>, vector<1x128x128xbf16>
    %58 = vector.shape_cast %57 : vector<1x128x128xbf16> to vector<128x128xbf16>
    %cst_34 = arith.constant dense<0.000000e+00> : vector<128x128xf32>
    %59 = tpu.matmul %56, %58, %cst_34 {dimension_numbers = #tpu.dot_dimension_numbers<[1], [0], [0], [1], [0, 0, 1, 1], [], []>} : vector<128x128xbf16>, vector<128x128xbf16>, vector<128x128xf32> -> vector<128x128xf32>
    %60 = arith.addf %50, %59 : vector<128x128xf32>
    %cst_35 = arith.constant dense<0.000000e+00> : vector<128x128xf32>
    %61 = tpu.matmul %0, %56, %cst_35 {dimension_numbers = #tpu.dot_dimension_numbers<[1], [0], [0], [1], [0, 0, 1, 1], [], []>} : vector<128x128xbf16>, vector<128x128xbf16>, vector<128x128xf32> -> vector<128x128xf32>
    %cst_36 = arith.constant 2.000000e+00 : f32
    %62 = vector.broadcast %cst_36 : f32 to vector<128x128xf32>
    %63 = arith.mulf %62, %61 : vector<128x128xf32>
    %64 = arith.extf %46 : vector<128x128xbf16> to vector<128x128xf32>
    %65 = arith.subf %63, %64 : vector<128x128xf32>
    %66 = arith.truncf %65 : vector<128x128xf32> to vector<128x128xbf16>
    %c7 = arith.constant 7 : index
    %c0_37 = arith.constant 0 : index
    %c0_38 = arith.constant 0 : index
    %67 = vector.load %arg2[%c7, %c0_37, %c0_38] : memref<8x128x128xbf16, #tpu.memory_space<vmem>>, vector<1x128x128xbf16>
    %68 = vector.shape_cast %67 : vector<1x128x128xbf16> to vector<128x128xbf16>
    %cst_39 = arith.constant dense<0.000000e+00> : vector<128x128xf32>
    %69 = tpu.matmul %66, %68, %cst_39 {dimension_numbers = #tpu.dot_dimension_numbers<[1], [0], [0], [1], [0, 0, 1, 1], [], []>} : vector<128x128xbf16>, vector<128x128xbf16>, vector<128x128xf32> -> vector<128x128xf32>
    %70 = arith.addf %60, %69 : vector<128x128xf32>
    %c0_40 = arith.constant 0 : index
    %c0_41 = arith.constant 0 : index
    %71 = vector.load %arg3[%c0_40, %c0_41] : memref<1x128xf32, #tpu.memory_space<vmem>>, vector<1x128xf32>
    %72 = vector.broadcast %71 : vector<1x128xf32> to vector<128x128xf32>
    %73 = arith.addf %70, %72 : vector<128x128xf32>
    %cst_42 = arith.constant 0.000000e+00 : f32
    %74 = vector.broadcast %cst_42 : f32 to vector<128x128xf32>
    %75 = arith.maximumf %73, %74 : vector<128x128xf32>
    %76 = arith.truncf %75 : vector<128x128xf32> to vector<128x128xbf16>
    %c0_43 = arith.constant 0 : index
    %c0_44 = arith.constant 0 : index
    %c0_45 = arith.constant 0 : index
    %77 = vector.load %arg4[%c0_43, %c0_44, %c0_45] : memref<8x128x128xbf16, #tpu.memory_space<vmem>>, vector<1x128x128xbf16>
    %78 = vector.shape_cast %77 : vector<1x128x128xbf16> to vector<128x128xbf16>
    %cst_46 = arith.constant dense<0.000000e+00> : vector<128x128xf32>
    %79 = tpu.matmul %76, %78, %cst_46 {dimension_numbers = #tpu.dot_dimension_numbers<[1], [0], [0], [1], [0, 0, 1, 1], [], []>} : vector<128x128xbf16>, vector<128x128xbf16>, vector<128x128xf32> -> vector<128x128xf32>
    %cst_47 = arith.constant dense<0.000000e+00> : vector<128x128xf32>
    %80 = tpu.matmul %0, %76, %cst_47 {dimension_numbers = #tpu.dot_dimension_numbers<[1], [0], [0], [1], [0, 0, 1, 1], [], []>} : vector<128x128xbf16>, vector<128x128xbf16>, vector<128x128xf32> -> vector<128x128xf32>
    %81 = arith.truncf %80 : vector<128x128xf32> to vector<128x128xbf16>
    %c1_48 = arith.constant 1 : index
    %c0_49 = arith.constant 0 : index
    %c0_50 = arith.constant 0 : index
    %82 = vector.load %arg4[%c1_48, %c0_49, %c0_50] : memref<8x128x128xbf16, #tpu.memory_space<vmem>>, vector<1x128x128xbf16>
    %83 = vector.shape_cast %82 : vector<1x128x128xbf16> to vector<128x128xbf16>
    %cst_51 = arith.constant dense<0.000000e+00> : vector<128x128xf32>
    %84 = tpu.matmul %81, %83, %cst_51 {dimension_numbers = #tpu.dot_dimension_numbers<[1], [0], [0], [1], [0, 0, 1, 1], [], []>} : vector<128x128xbf16>, vector<128x128xbf16>, vector<128x128xf32> -> vector<128x128xf32>
    %85 = arith.addf %79, %84 : vector<128x128xf32>
    %cst_52 = arith.constant dense<0.000000e+00> : vector<128x128xf32>
    %86 = tpu.matmul %0, %81, %cst_52 {dimension_numbers = #tpu.dot_dimension_numbers<[1], [0], [0], [1], [0, 0, 1, 1], [], []>} : vector<128x128xbf16>, vector<128x128xbf16>, vector<128x128xf32> -> vector<128x128xf32>
    %cst_53 = arith.constant 2.000000e+00 : f32
    %87 = vector.broadcast %cst_53 : f32 to vector<128x128xf32>
    %88 = arith.mulf %87, %86 : vector<128x128xf32>
    %89 = arith.extf %76 : vector<128x128xbf16> to vector<128x128xf32>
    %90 = arith.subf %88, %89 : vector<128x128xf32>
    %91 = arith.truncf %90 : vector<128x128xf32> to vector<128x128xbf16>
    %c2_54 = arith.constant 2 : index
    %c0_55 = arith.constant 0 : index
    %c0_56 = arith.constant 0 : index
    %92 = vector.load %arg4[%c2_54, %c0_55, %c0_56] : memref<8x128x128xbf16, #tpu.memory_space<vmem>>, vector<1x128x128xbf16>
    %93 = vector.shape_cast %92 : vector<1x128x128xbf16> to vector<128x128xbf16>
    %cst_57 = arith.constant dense<0.000000e+00> : vector<128x128xf32>
    %94 = tpu.matmul %91, %93, %cst_57 {dimension_numbers = #tpu.dot_dimension_numbers<[1], [0], [0], [1], [0, 0, 1, 1], [], []>} : vector<128x128xbf16>, vector<128x128xbf16>, vector<128x128xf32> -> vector<128x128xf32>
    %95 = arith.addf %85, %94 : vector<128x128xf32>
    %cst_58 = arith.constant dense<0.000000e+00> : vector<128x128xf32>
    %96 = tpu.matmul %0, %91, %cst_58 {dimension_numbers = #tpu.dot_dimension_numbers<[1], [0], [0], [1], [0, 0, 1, 1], [], []>} : vector<128x128xbf16>, vector<128x128xbf16>, vector<128x128xf32> -> vector<128x128xf32>
    %cst_59 = arith.constant 2.000000e+00 : f32
    %97 = vector.broadcast %cst_59 : f32 to vector<128x128xf32>
    %98 = arith.mulf %97, %96 : vector<128x128xf32>
    %99 = arith.extf %81 : vector<128x128xbf16> to vector<128x128xf32>
    %100 = arith.subf %98, %99 : vector<128x128xf32>
    %101 = arith.truncf %100 : vector<128x128xf32> to vector<128x128xbf16>
    %c3_60 = arith.constant 3 : index
    %c0_61 = arith.constant 0 : index
    %c0_62 = arith.constant 0 : index
    %102 = vector.load %arg4[%c3_60, %c0_61, %c0_62] : memref<8x128x128xbf16, #tpu.memory_space<vmem>>, vector<1x128x128xbf16>
    %103 = vector.shape_cast %102 : vector<1x128x128xbf16> to vector<128x128xbf16>
    %cst_63 = arith.constant dense<0.000000e+00> : vector<128x128xf32>
    %104 = tpu.matmul %101, %103, %cst_63 {dimension_numbers = #tpu.dot_dimension_numbers<[1], [0], [0], [1], [0, 0, 1, 1], [], []>} : vector<128x128xbf16>, vector<128x128xbf16>, vector<128x128xf32> -> vector<128x128xf32>
    %105 = arith.addf %95, %104 : vector<128x128xf32>
    %cst_64 = arith.constant dense<0.000000e+00> : vector<128x128xf32>
    %106 = tpu.matmul %0, %101, %cst_64 {dimension_numbers = #tpu.dot_dimension_numbers<[1], [0], [0], [1], [0, 0, 1, 1], [], []>} : vector<128x128xbf16>, vector<128x128xbf16>, vector<128x128xf32> -> vector<128x128xf32>
    %cst_65 = arith.constant 2.000000e+00 : f32
    %107 = vector.broadcast %cst_65 : f32 to vector<128x128xf32>
    %108 = arith.mulf %107, %106 : vector<128x128xf32>
    %109 = arith.extf %91 : vector<128x128xbf16> to vector<128x128xf32>
    %110 = arith.subf %108, %109 : vector<128x128xf32>
    %111 = arith.truncf %110 : vector<128x128xf32> to vector<128x128xbf16>
    %c4_66 = arith.constant 4 : index
    %c0_67 = arith.constant 0 : index
    %c0_68 = arith.constant 0 : index
    %112 = vector.load %arg4[%c4_66, %c0_67, %c0_68] : memref<8x128x128xbf16, #tpu.memory_space<vmem>>, vector<1x128x128xbf16>
    %113 = vector.shape_cast %112 : vector<1x128x128xbf16> to vector<128x128xbf16>
    %cst_69 = arith.constant dense<0.000000e+00> : vector<128x128xf32>
    %114 = tpu.matmul %111, %113, %cst_69 {dimension_numbers = #tpu.dot_dimension_numbers<[1], [0], [0], [1], [0, 0, 1, 1], [], []>} : vector<128x128xbf16>, vector<128x128xbf16>, vector<128x128xf32> -> vector<128x128xf32>
    %115 = arith.addf %105, %114 : vector<128x128xf32>
    %cst_70 = arith.constant dense<0.000000e+00> : vector<128x128xf32>
    %116 = tpu.matmul %0, %111, %cst_70 {dimension_numbers = #tpu.dot_dimension_numbers<[1], [0], [0], [1], [0, 0, 1, 1], [], []>} : vector<128x128xbf16>, vector<128x128xbf16>, vector<128x128xf32> -> vector<128x128xf32>
    %cst_71 = arith.constant 2.000000e+00 : f32
    %117 = vector.broadcast %cst_71 : f32 to vector<128x128xf32>
    %118 = arith.mulf %117, %116 : vector<128x128xf32>
    %119 = arith.extf %101 : vector<128x128xbf16> to vector<128x128xf32>
    %120 = arith.subf %118, %119 : vector<128x128xf32>
    %121 = arith.truncf %120 : vector<128x128xf32> to vector<128x128xbf16>
    %c5_72 = arith.constant 5 : index
    %c0_73 = arith.constant 0 : index
    %c0_74 = arith.constant 0 : index
    %122 = vector.load %arg4[%c5_72, %c0_73, %c0_74] : memref<8x128x128xbf16, #tpu.memory_space<vmem>>, vector<1x128x128xbf16>
    %123 = vector.shape_cast %122 : vector<1x128x128xbf16> to vector<128x128xbf16>
    %cst_75 = arith.constant dense<0.000000e+00> : vector<128x128xf32>
    %124 = tpu.matmul %121, %123, %cst_75 {dimension_numbers = #tpu.dot_dimension_numbers<[1], [0], [0], [1], [0, 0, 1, 1], [], []>} : vector<128x128xbf16>, vector<128x128xbf16>, vector<128x128xf32> -> vector<128x128xf32>
    %125 = arith.addf %115, %124 : vector<128x128xf32>
    %cst_76 = arith.constant dense<0.000000e+00> : vector<128x128xf32>
    %126 = tpu.matmul %0, %121, %cst_76 {dimension_numbers = #tpu.dot_dimension_numbers<[1], [0], [0], [1], [0, 0, 1, 1], [], []>} : vector<128x128xbf16>, vector<128x128xbf16>, vector<128x128xf32> -> vector<128x128xf32>
    %cst_77 = arith.constant 2.000000e+00 : f32
    %127 = vector.broadcast %cst_77 : f32 to vector<128x128xf32>
    %128 = arith.mulf %127, %126 : vector<128x128xf32>
    %129 = arith.extf %111 : vector<128x128xbf16> to vector<128x128xf32>
    %130 = arith.subf %128, %129 : vector<128x128xf32>
    %131 = arith.truncf %130 : vector<128x128xf32> to vector<128x128xbf16>
    %c6_78 = arith.constant 6 : index
    %c0_79 = arith.constant 0 : index
    %c0_80 = arith.constant 0 : index
    %132 = vector.load %arg4[%c6_78, %c0_79, %c0_80] : memref<8x128x128xbf16, #tpu.memory_space<vmem>>, vector<1x128x128xbf16>
    %133 = vector.shape_cast %132 : vector<1x128x128xbf16> to vector<128x128xbf16>
    %cst_81 = arith.constant dense<0.000000e+00> : vector<128x128xf32>
    %134 = tpu.matmul %131, %133, %cst_81 {dimension_numbers = #tpu.dot_dimension_numbers<[1], [0], [0], [1], [0, 0, 1, 1], [], []>} : vector<128x128xbf16>, vector<128x128xbf16>, vector<128x128xf32> -> vector<128x128xf32>
    %135 = arith.addf %125, %134 : vector<128x128xf32>
    %cst_82 = arith.constant dense<0.000000e+00> : vector<128x128xf32>
    %136 = tpu.matmul %0, %131, %cst_82 {dimension_numbers = #tpu.dot_dimension_numbers<[1], [0], [0], [1], [0, 0, 1, 1], [], []>} : vector<128x128xbf16>, vector<128x128xbf16>, vector<128x128xf32> -> vector<128x128xf32>
    %cst_83 = arith.constant 2.000000e+00 : f32
    %137 = vector.broadcast %cst_83 : f32 to vector<128x128xf32>
    %138 = arith.mulf %137, %136 : vector<128x128xf32>
    %139 = arith.extf %121 : vector<128x128xbf16> to vector<128x128xf32>
    %140 = arith.subf %138, %139 : vector<128x128xf32>
    %141 = arith.truncf %140 : vector<128x128xf32> to vector<128x128xbf16>
    %c7_84 = arith.constant 7 : index
    %c0_85 = arith.constant 0 : index
    %c0_86 = arith.constant 0 : index
    %142 = vector.load %arg4[%c7_84, %c0_85, %c0_86] : memref<8x128x128xbf16, #tpu.memory_space<vmem>>, vector<1x128x128xbf16>
    %143 = vector.shape_cast %142 : vector<1x128x128xbf16> to vector<128x128xbf16>
    %cst_87 = arith.constant dense<0.000000e+00> : vector<128x128xf32>
    %144 = tpu.matmul %141, %143, %cst_87 {dimension_numbers = #tpu.dot_dimension_numbers<[1], [0], [0], [1], [0, 0, 1, 1], [], []>} : vector<128x128xbf16>, vector<128x128xbf16>, vector<128x128xf32> -> vector<128x128xf32>
    %145 = arith.addf %135, %144 : vector<128x128xf32>
    %c0_88 = arith.constant 0 : index
    %c0_89 = arith.constant 0 : index
    %146 = vector.load %arg5[%c0_88, %c0_89] : memref<1x128xf32, #tpu.memory_space<vmem>>, vector<1x128xf32>
    %147 = vector.broadcast %146 : vector<1x128xf32> to vector<128x128xf32>
    %148 = arith.addf %145, %147 : vector<128x128xf32>
    %c0_90 = arith.constant 0 : index
    %c0_91 = arith.constant 0 : index
    %149 = vector.load %arg6[%c0_90, %c0_91] : memref<128x128xf32, #tpu.memory_space<vmem>>, vector<128x128xf32>
    tpu.vector_store %arg6[%c0_90, %c0_91], %148 {strides = array<i32>} : memref<128x128xf32, #tpu.memory_space<vmem>>, vector<128x128xf32>,
    return
  }
}

</mosaic_0001>

<bundles_post_ra>
// kernel: tpu_custom_call.1
= control target key start
LH: loop header
LB: loop body
LE: loop exit
PB: predicated region body
PF: predicated region fallthrough
CT: control target
= control target key end

     0   :  { %11 = vsyncpa [#allocation3], 0  ;;  %s8238_s0 = inlined_call_operand.hbm [shape: bf16[128,128], index: 0, kind: input, shape index: {}]   ;;  %s8239_s1 = inlined_call_operand.hbm [shape: bf16[128,128], index: 1, kind: input, shape index: {}]   ;;  %s8240_s2 = inlined_call_operand.hbm [shape: bf16[8,128,128], index: 2, kind: input, shape index: {}]   ;;  %s8241_s3 = inlined_call_operand.vmem [shape: f32[1,128], index: 3, kind: input, shape index: {}]   ;;  %s8242_s4 = inlined_call_operand.hbm [shape: bf16[8,128,128], index: 4, kind: input, shape index: {}]   ;;  %s8243_s5 = inlined_call_operand.vmem [shape: f32[1,128], index: 5, kind: input, shape index: {}]   ;;  %s8244_s6 = inlined_call_operand.hbm [shape: f32[128,128], index: 6, kind: output, shape index: {}]  }
   0x1   :  { %12 = vsyncpa [#allocation6], 0 }
   0x2   :  { %13 = vsyncpa [#allocation9], 0 }
   0x3   :  { %14 = vsyncpa [#allocation4], 0  ;;  %s7254_s21 = smov [#allocation5]   ;;  %s7255_s23 = smov [#allocation2]  }
   0x4   :  { %s32_s22 = sshll.u32 %s7254_s21, 4  ;;  %s20_s24 = sshll.u32 %s7255_s23, 4  ;;  %s33_s22 = int_to_ptr.vmem [resolvable:$true] %s32_s22  ;;  %s7298_s24 = int_to_ptr.vmem [resolvable:$true] %s20_s24 }
   0x5   :  { %s7136_s27 = scalar_lea.hbm %s8239_s1, 1024 }
   0x6   :  { %p7137_p0 = scmp.ne.s32.totalorder %s8239_s1, %s7136_s27  ;;  %p7140_p1 = scmp.lt.u32.totalorder %s7136_s27, %s8239_s1 }
   0x8   :  { %p7142_p2 = pnand %p7140_p1, %p7137_p0 }
   0xa   :  { %7145 = shalt.err (!%p7142_p2)
}
   0xb   :  { %s7146_s8 = scalar_lea.vmem %s33_s22, 1024  ;;  %p7151_p4 = scmp.lt.s32.totalorder %s33_s22, %s33_s22 }
   0xc   :  { %p7147_p3 = scmp.ne.s32.totalorder %s33_s22, %s7146_s8  ;;  %p7152_p5 = scmp.lt.s32.totalorder %s7146_s8, %s7146_s8 }
   0xe   :  { %p7153_p6 = por %p7152_p5, %p7151_p4 }
  0x10   :  { %p7154_p7 = pnand %p7153_p6, %p7147_p3 }
  0x12   :  { %7157 = shalt.err (!%p7154_p7)
}
  0x13   :  { %s7256_s9 = smov 64   ;;  %s7257_s10 = smov 4  }
  0x14   :  { %38 = dma.hbm_to_vmem [thread:$0]  %s8239_s1, 1024, %s33_s22, [#allocation6], %s7256_s9, %s7256_s9, %s7257_s10  }
  0x15   :  { %s7158_s15 = scalar_lea.hbm %s8238_s0, 1024 }
  0x16   :  { %p7159_p8 = scmp.ne.s32.totalorder %s8238_s0, %s7158_s15  ;;  %p7162_p9 = scmp.lt.u32.totalorder %s7158_s15, %s8238_s0 }
  0x18   :  { %p7164_p10 = pnand %p7162_p9, %p7159_p8 }
  0x1a   :  { %7167 = shalt.err (!%p7164_p10)
}
  0x1b   :  { %s7168_s20 = scalar_lea.vmem %s7298_s24, 1024  ;;  %p7173_p12 = scmp.lt.s32.totalorder %s7298_s24, %s7298_s24 }
  0x1c   :  { %p7169_p11 = scmp.ne.s32.totalorder %s7298_s24, %s7168_s20  ;;  %p7174_p13 = scmp.lt.s32.totalorder %s7168_s20, %s7168_s20 }
  0x1e   :  { %p7175_p0 = por %p7174_p13, %p7173_p12 }
  0x20   :  { %p7176_p1 = pnand %p7175_p0, %p7169_p11 }
  0x22   :  { %7179 = shalt.err (!%p7176_p1)
}
  0x23   :  { %26 = dma.hbm_to_vmem [thread:$0]  %s8238_s0, 1024, %s7298_s24, [#allocation3], %s7256_s9, %s7256_s9, %s7257_s10  }
  0x24   :  { %s7258_s22 = smov [#allocation7]   ;;  %s7259_s25 = smov [#allocation8]  }
  0x25   :  { %s44_s23 = sshll.u32 %s7258_s22, 4  ;;  %s58_s26 = sshll.u32 %s7259_s25, 4  ;;  %s45_s23 = int_to_ptr.vmem [resolvable:$true] %s44_s23  ;;  %s7335_s26 = int_to_ptr.vmem [resolvable:$true] %s58_s26 }
  0x26   :  { %s7180_s29 = scalar_lea.hbm %s8240_s2, 8192 }
  0x27   :  { %p7181_p2 = scmp.ne.s32.totalorder %s8240_s2, %s7180_s29  ;;  %p7184_p3 = scmp.lt.u32.totalorder %s7180_s29, %s8240_s2 }
  0x29   :  { %p7186_p4 = pnand %p7184_p3, %p7181_p2 }
  0x2b   :  { %7189 = shalt.err (!%p7186_p4)
}
  0x2c   :  { %s7190_s0 = scalar_lea.vmem %s45_s23, 8192  ;;  %p7195_p6 = scmp.lt.s32.totalorder %s45_s23, %s45_s23 }
  0x2d   :  { %p7191_p5 = scmp.ne.s32.totalorder %s45_s23, %s7190_s0  ;;  %p7196_p7 = scmp.lt.s32.totalorder %s7190_s0, %s7190_s0 }
  0x2f   :  { %p7197_p8 = por %p7196_p7, %p7195_p6 }
  0x31   :  { %p7198_p9 = pnand %p7197_p8, %p7191_p5 }
  0x33   :  { %7201 = shalt.err (!%p7198_p9)
}
  0x34   :  { %50 = dma.hbm_to_vmem [thread:$0]  %s8240_s2, 8192, %s45_s23, [#allocation6], %s7256_s9, %s7256_s9, %s7257_s10  }
  0x35   :  { %s7202_s15 = scalar_lea.hbm %s8242_s4, 8192 }
  0x36   :  { %p7203_p10 = scmp.ne.s32.totalorder %s8242_s4, %s7202_s15  ;;  %p7206_p11 = scmp.lt.u32.totalorder %s7202_s15, %s8242_s4 }
  0x38   :  { %p7208_p12 = pnand %p7206_p11, %p7203_p10 }
  0x3a   :  { %7211 = shalt.err (!%p7208_p12)
}
  0x3b   :  { %s7212_s20 = scalar_lea.vmem %s7335_s26, 8192  ;;  %p7217_p0 = scmp.lt.s32.totalorder %s7335_s26, %s7335_s26 }
  0x3c   :  { %p7213_p13 = scmp.ne.s32.totalorder %s7335_s26, %s7212_s20  ;;  %p7218_p1 = scmp.lt.s32.totalorder %s7212_s20, %s7212_s20 }
  0x3e   :  { %p7219_p2 = por %p7218_p1, %p7217_p0 }
  0x40   :  { %p7220_p3 = pnand %p7219_p2, %p7213_p13 }
  0x42   :  { %7223 = shalt.err (!%p7220_p3)
}
  0x43   :  { %64 = dma.hbm_to_vmem [thread:$0]  %s8242_s4, 8192, %s7335_s26, [#allocation9], %s7256_s9, %s7256_s9, %s7257_s10  }
  0x44   :  { %7246 = dma.done.wait [#allocation3], 1024  }
  0x45   :  { %7247 = vsyncadd [#allocation3], 4294966272 }
  0x46   :  { %7248 = dma.done.wait [#allocation6], 9216  }
  0x47   :  { %7249 = vsyncadd [#allocation6], 4294958080 }
  0x48   :  { %7250 = dma.done.wait [#allocation9], 8192  }
  0x49   :  { %7251 = vsyncadd [#allocation9], 4294959104  ;;  %v7372_v0 = vld [vmem:[#allocation5] sm:$0xff]   ;;  %v7374_v1 = vld [vmem:[#allocation5 + $0x8] sm:$0xff]  }
  0x4a   :  { %v7376_v2 = vld [vmem:[#allocation5 + $0x10] sm:$0xff]   ;;  %5767 = vmatprep.subr.bf16.mxu1 %v7372_v0  ;;  %v7379_v3 = vld [vmem:[#allocation2] sm:$0xff]   ;;  %v7384_v4 = vld [vmem:[#allocation5 + $0x18] sm:$0xff]  }
  0x4b   :  { %5768 = vmatpush3.bf16.msra.mxu1 %v7372_v0  ;;  %5783 = vmatprep.mubr.bf16.mxu1 %v7379_v3  ;;  %v7389_v5 = vld [vmem:[#allocation5 + $0x20] sm:$0xff]   ;;  %v7393_v6 = vld [vmem:[#allocation5 + $0x28] sm:$0xff]   ;;  %v7397_v7 = vld [vmem:[#allocation5 + $0x30] sm:$0xff]  }
  0x4c   :  { %5769 = vmatprep.subr.bf16.mxu1 %v7374_v1  ;;  %5879 = vmatprep.mubr.bf16.mxu0 %v7379_v3  ;;  %v7400_v8 = vld [vmem:[#allocation5 + $0x38] sm:$0xff]   ;;  %v6976_v9 = vld [vmem:[#allocation7 + $0x40] sm:$0xff]   ;;  %v7407_v10 = vld [vmem:[#allocation2 + $0x8] sm:$0xff]  }
  0x4d   :  { %v7409_v11 = vld [vmem:[#allocation2 + $0x10] sm:$0xff]   ;;  %v6977_v12 = vld [vmem:[#allocation7 + $0x48] sm:$0xff]   ;;  %v7414_v14 = vld [vmem:[#allocation2 + $0x18] sm:$0xff]  }
  0x4e   :  { %v6978_v13 = vld [vmem:[#allocation7 + $0x50] sm:$0xff]   ;;  %v7416_v15 = vld [vmem:[#allocation2 + $0x20] sm:$0xff]   ;;  %v6979_v16 = vld [vmem:[#allocation7 + $0x58] sm:$0xff]  }
  0x4f   :  { %5770 = vmatpush3.bf16.msra.mxu1 %v7374_v1  ;;  %v6980_v17 = vld [vmem:[#allocation7 + $0x60] sm:$0xff]   ;;  %v7420_v18 = vld [vmem:[#allocation2 + $0x28] sm:$0xff]   ;;  %v7422_v19 = vld [vmem:[#allocation2 + $0x30] sm:$0xff]  }
  0x50   :  { %5771 = vmatprep.subr.bf16.mxu1 %v7376_v2  ;;  %v6981_v20 = vld [vmem:[#allocation7 + $0x68] sm:$0xff]   ;;  %v6982_v21 = vld [vmem:[#allocation7 + $0x70] sm:$0xff]   ;;  %v7426_v22 = vld [vmem:[#allocation2 + $0x38] sm:$0xff]  }
  0x51   :  { %v6983_v23 = vld [vmem:[#allocation7 + $0x78] sm:$0xff]   ;;  %v6984_v24 = vld [vmem:[#allocation7] sm:$0xff]   ;;  %v6985_v31 = vld [vmem:[#allocation7 + $0x8] sm:$0xff]  }
  0x52   :  { %v6986_v34 = vld [vmem:[#allocation7 + $0x10] sm:$0xff]   ;;  %v6987_v39 = vld [vmem:[#allocation7 + $0x18] sm:$0xff]   ;;  %v6988_v42 = vld [vmem:[#allocation7 + $0x20] sm:$0xff]  }
  0x53   :  { %5772 = vmatpush3.bf16.msra.mxu1 %v7376_v2  ;;  %v6989_v47 = vld [vmem:[#allocation7 + $0x28] sm:$0xff]   ;;  %v6990_v50 = vld [vmem:[#allocation7 + $0x30] sm:$0xff]   ;;  %v6991_v55 = vld [vmem:[#allocation7 + $0x38] sm:$0xff]  }
  0x54   :  { %5773 = vmatprep.subr.bf16.mxu1 %v7384_v4  ;;  %v6992_v56 = vld [vmem:[#allocation7 + $0x80] sm:$0xff]   ;;  %v6993_v57 = vld [vmem:[#allocation7 + $0x88] sm:$0xff]   ;;  %v6994_v58 = vld [vmem:[#allocation7 + $0x90] sm:$0xff]  }
  0x55   :  { %v6995_v59 = vld [vmem:[#allocation7 + $0x98] sm:$0xff]   ;;  %v6996_v60 = vld [vmem:[#allocation7 + $0xa0] sm:$0xff]   ;;  %v6997_v61 = vld [vmem:[#allocation7 + $0xa8] sm:$0xff]  }
  0x56   :  { %v6998_v62 = vld [vmem:[#allocation7 + $0xb0] sm:$0xff]   ;;  %v6999_v63 = vld [vmem:[#allocation7 + $0xb8] sm:$0xff]  }
  0x57   :  { %5774 = vmatpush3.bf16.msra.mxu1 %v7384_v4 }
  0x58   :  { %5775 = vmatprep.subr.bf16.mxu1 %v7389_v5 }
  0x5b   :  { %5776 = vmatpush3.bf16.msra.mxu1 %v7389_v5 }
  0x5c   :  { %5777 = vmatprep.subr.bf16.mxu1 %v7393_v6 }
  0x5f   :  { %5778 = vmatpush3.bf16.msra.mxu1 %v7393_v6 }
  0x60   :  { %5779 = vmatprep.subr.bf16.mxu1 %v7397_v7 }
  0x63   :  { %5780 = vmatpush3.bf16.msra.mxu1 %v7397_v7 }
  0x64   :  { %5781 = vmatprep.subr.bf16.mxu1 %v7400_v8 }
  0x67   :  { %5782 = vmatpush3.bf16.msra.mxu1 %v7400_v8 }
  0x68   :  { %5799 = vmatprep.subr.bf16.mxu1 %v6976_v9 }
  0x6a   :  { %5784 = vmatmul.mubr.bf16.vlgmr.msra.gmra.mrb[0].mxu1 %v7407_v10 }
  0x6b   :  { %5787 = vmatprep.mubr.bf16.mxu1 %v7409_v11  ;;  %5800 = vmatpush3.bf16.msra.mxu1 %v6976_v9  ;;  %v7000_v9 = vld [vmem:[#allocation7 + $0xc0] sm:$0xff]  }
  0x6c   :  { %5801 = vmatprep.subr.bf16.mxu1 %v6977_v12 }
  0x6f   :  { %5802 = vmatpush3.bf16.msra.mxu1 %v6977_v12 }
  0x70   :  { %5803 = vmatprep.subr.bf16.mxu1 %v6978_v13 }
  0x72   :  { %5788 = vmatmul.mubr.bf16.gmra.mrb[4].mxu1 %v7414_v14 }
  0x73   :  { %5791 = vmatprep.mubr.bf16.mxu1 %v7416_v15  ;;  %5804 = vmatpush3.bf16.msra.mxu1 %v6978_v13 }
  0x74   :  { %5805 = vmatprep.subr.bf16.mxu1 %v6979_v16 }
  0x77   :  { %5806 = vmatpush3.bf16.msra.mxu1 %v6979_v16  ;;  %v751_v16 = vunpack.c.l.bf16 %v7374_v1 }
  0x78   :  { %5807 = vmatprep.subr.bf16.mxu1 %v6980_v17 }
  0x7a   :  { %5792 = vmatmul.mubr.bf16.gmra.mrb[8].mxu1 %v7420_v18 }
  0x7b   :  { %5795 = vmatprep.mubr.bf16.mxu1 %v7422_v19  ;;  %5808 = vmatpush3.bf16.msra.mxu1 %v6980_v17 }
  0x7c   :  { %5809 = vmatprep.subr.bf16.mxu1 %v6981_v20 }
  0x7f   :  { %5810 = vmatpush3.bf16.msra.mxu1 %v6981_v20  ;;  %v752_v20 = vunpack.c.h.bf16 %v7374_v1 }
  0x80   :  { %5811 = vmatprep.subr.bf16.mxu1 %v6982_v21 }
  0x82   :  { %5796 = vmatmul.mubr.bf16.gmra.mrb[12].mxu1 %v7426_v22 }
  0x83   :  { %5812 = vmatpush3.bf16.msra.mxu1 %v6982_v21 }
  0x84   :  { %5813 = vmatprep.subr.bf16.mxu1 %v6983_v23 }
  0x87   :  { %5814 = vmatpush3.bf16.msra.mxu1 %v6983_v23  ;;  %v749_v23 = vunpack.c.l.bf16 %v7372_v0 }
  0x88   :  { %5831 = vmatprep.subr.bf16.mxu1 %v6984_v24 }
 0x13d   :  { %v5785_v25 = vpop.f32.mrb[0].mxu1 }
 0x13e   :  { %v258_v26 = vpop.f32.mrb[1].mxu1 }
 0x13f   :  { %v5786_v27 = vpop.f32.mrb[2].mxu1 }
 0x140   :  { %v7429_v28 = vpack.c.bf16 %v5786_v27, %v5785_v25  ;;  %v261_v29 = vpop.f32.mrb[3].mxu1 }
 0x141   :  { %v7431_v30 = vpack.c.bf16 %v261_v29, %v258_v26 }
 0x143   :  { %5815 = vmatprep.mubr.bf16.mxu1 %v7431_v30  ;;  %5863 = vmatprep.subr.bf16.mxu0 %v7431_v30 }
 0x144   :  { %5816 = vmatmul.mubr.bf16.vlgmr.msra.gmra.mrb[16].mxu1 %v7429_v28  ;;  %5864 = vmatpush3.bf16.msra.mxu0 %v7431_v30 }
 0x145   :  { %v5789_v32 = vpop.f32.mrb[4].mxu1  ;;  %5865 = vmatprep.subr.bf16.mxu0 %v7429_v28  ;;  %5832 = vmatpush3.bf16.msra.mxu1 %v6984_v24 }
 0x146   :  { %v274_v33 = vpop.f32.mrb[5].mxu1  ;;  %5833 = vmatprep.subr.bf16.mxu1 %v6985_v31 }
 0x147   :  { %v5790_v35 = vpop.f32.mrb[6].mxu1 }
 0x148   :  { %v7438_v36 = vpack.c.bf16 %v5790_v35, %v5789_v32  ;;  %v277_v37 = vpop.f32.mrb[7].mxu1  ;;  %5866 = vmatpush3.bf16.msra.mxu0 %v7429_v28 }
 0x149   :  { %v7441_v38 = vpack.c.bf16 %v277_v37, %v274_v33  ;;  %5834 = vmatpush3.bf16.msra.mxu1 %v6985_v31 }
 0x14a   :  { %5835 = vmatprep.subr.bf16.mxu1 %v6986_v34 }
 0x14b   :  { %5819 = vmatprep.mubr.bf16.mxu1 %v7441_v38  ;;  %5867 = vmatprep.subr.bf16.mxu0 %v7441_v38 }
 0x14c   :  { %5820 = vmatmul.mubr.bf16.gmra.mrb[20].mxu1 %v7438_v36  ;;  %5868 = vmatpush3.bf16.msra.mxu0 %v7441_v38 }
 0x14d   :  { %v5793_v40 = vpop.f32.mrb[8].mxu1  ;;  %5869 = vmatprep.subr.bf16.mxu0 %v7438_v36  ;;  %5836 = vmatpush3.bf16.msra.mxu1 %v6986_v34 }
 0x14e   :  { %v290_v41 = vpop.f32.mrb[9].mxu1  ;;  %5837 = vmatprep.subr.bf16.mxu1 %v6987_v39 }
 0x14f   :  { %v5794_v43 = vpop.f32.mrb[10].mxu1 }
 0x150   :  { %v7448_v44 = vpack.c.bf16 %v5794_v43, %v5793_v40  ;;  %v293_v45 = vpop.f32.mrb[11].mxu1  ;;  %5870 = vmatpush3.bf16.msra.mxu0 %v7438_v36  ;;  %v753_v43 = vunpack.c.l.bf16 %v7376_v2 }
 0x151   :  { %v7451_v46 = vpack.c.bf16 %v293_v45, %v290_v41  ;;  %5838 = vmatpush3.bf16.msra.mxu1 %v6987_v39  ;;  %v756_v41 = vunpack.c.h.bf16 %v7384_v4 }
 0x152   :  { %5839 = vmatprep.subr.bf16.mxu1 %v6988_v42 }
 0x153   :  { %5823 = vmatprep.mubr.bf16.mxu1 %v7451_v46  ;;  %5871 = vmatprep.subr.bf16.mxu0 %v7451_v46 }
 0x154   :  { %5824 = vmatmul.mubr.bf16.gmra.mrb[24].mxu1 %v7448_v44  ;;  %5872 = vmatpush3.bf16.msra.mxu0 %v7451_v46 }
 0x155   :  { %v5797_v48 = vpop.f32.mrb[12].mxu1  ;;  %5873 = vmatprep.subr.bf16.mxu0 %v7448_v44  ;;  %5840 = vmatpush3.bf16.msra.mxu1 %v6988_v42  ;;  %v7001_v42 = vld [vmem:[#allocation7 + $0xc8] sm:$0xff]  }
 0x156   :  { %v306_v49 = vpop.f32.mrb[13].mxu1  ;;  %5841 = vmatprep.subr.bf16.mxu1 %v6989_v47 }
 0x157   :  { %v5798_v51 = vpop.f32.mrb[14].mxu1 }
 0x158   :  { %v7458_v52 = vpack.c.bf16 %v5798_v51, %v5797_v48  ;;  %v309_v53 = vpop.f32.mrb[15].mxu1  ;;  %5874 = vmatpush3.bf16.msra.mxu0 %v7448_v44 }
 0x159   :  { %v7461_v54 = vpack.c.bf16 %v309_v53, %v306_v49  ;;  %5842 = vmatpush3.bf16.msra.mxu1 %v6989_v47  ;;  %v754_v47 = vunpack.c.h.bf16 %v7376_v2  ;;  %v7002_v53 = vld [vmem:[#allocation7 + $0xd0] sm:$0xff]  }
 0x15a   :  { %5843 = vmatprep.subr.bf16.mxu1 %v6990_v50 }
 0x15b   :  { %5827 = vmatprep.mubr.bf16.mxu1 %v7461_v54  ;;  %5875 = vmatprep.subr.bf16.mxu0 %v7461_v54 }
 0x15c   :  { %5828 = vmatmul.mubr.bf16.gmra.mrb[28].mxu1 %v7458_v52  ;;  %5876 = vmatpush3.bf16.msra.mxu0 %v7461_v54 }
 0x15d   :  { %5877 = vmatprep.subr.bf16.mxu0 %v7458_v52  ;;  %5844 = vmatpush3.bf16.msra.mxu1 %v6990_v50 }
 0x15e   :  { %5845 = vmatprep.subr.bf16.mxu1 %v6991_v55  ;;  %5847 = vmatprep.mubr.bf16.mxu1 %v7372_v0 }
 0x160   :  { %5878 = vmatpush3.bf16.msra.mxu0 %v7458_v52 }
 0x161   :  { %5846 = vmatpush3.bf16.msra.mxu1 %v6991_v55 }
 0x162   :  { %5895 = vmatprep.subr.bf16.mxu1 %v6992_v56 }
 0x163   :  { %5880 = vmatmul.mubr.bf16.vlgmr.msra.gmra.mrb[0].mxu0 %v7407_v10 }
 0x164   :  { %5883 = vmatprep.mubr.bf16.mxu0 %v7409_v11  ;;  %5848 = vmatmul.mubr.bf16.vlgmr.msra.gmra.mrb[16].mxu1 %v7374_v1  ;;  %v755_v1 = vunpack.c.l.bf16 %v7384_v4 }
 0x165   :  { %5896 = vmatpush3.bf16.msra.mxu1 %v6992_v56  ;;  %5851 = vmatprep.mubr.bf16.mxu1 %v7376_v2 }
 0x166   :  { %5897 = vmatprep.subr.bf16.mxu1 %v6993_v57 }
 0x169   :  { %5898 = vmatpush3.bf16.msra.mxu1 %v6993_v57 }
 0x16a   :  { %5899 = vmatprep.subr.bf16.mxu1 %v6994_v58 }
 0x16b   :  { %5884 = vmatmul.mubr.bf16.gmra.mrb[4].mxu0 %v7414_v14 }
 0x16c   :  { %5887 = vmatprep.mubr.bf16.mxu0 %v7416_v15  ;;  %5852 = vmatmul.mubr.bf16.gmra.mrb[20].mxu1 %v7384_v4 }
 0x16d   :  { %5900 = vmatpush3.bf16.msra.mxu1 %v6994_v58  ;;  %5855 = vmatprep.mubr.bf16.mxu1 %v7389_v5 }
 0x16e   :  { %5901 = vmatprep.subr.bf16.mxu1 %v6995_v59 }
 0x171   :  { %5902 = vmatpush3.bf16.msra.mxu1 %v6995_v59 }
 0x172   :  { %5903 = vmatprep.subr.bf16.mxu1 %v6996_v60 }
 0x173   :  { %5888 = vmatmul.mubr.bf16.gmra.mrb[8].mxu0 %v7420_v18 }
 0x174   :  { %5891 = vmatprep.mubr.bf16.mxu0 %v7422_v19  ;;  %5856 = vmatmul.mubr.bf16.gmra.mrb[24].mxu1 %v7393_v6 }
 0x175   :  { %5904 = vmatpush3.bf16.msra.mxu1 %v6996_v60  ;;  %5859 = vmatprep.mubr.bf16.mxu1 %v7397_v7  ;;  %v759_v60 = vunpack.c.l.bf16 %v7393_v6 }
 0x176   :  { %5905 = vmatprep.subr.bf16.mxu1 %v6997_v61 }
 0x179   :  { %5906 = vmatpush3.bf16.msra.mxu1 %v6997_v61 }
 0x17a   :  { %5907 = vmatprep.subr.bf16.mxu1 %v6998_v62 }
 0x17b   :  { %5892 = vmatmul.mubr.bf16.gmra.mrb[12].mxu0 %v7426_v22 }
 0x17c   :  { %5860 = vmatmul.mubr.bf16.gmra.mrb[28].mxu1 %v7400_v8  ;;  %5943 = vmatprep.mubr.bf16.mxu0 %v7379_v3  ;;  %v750_v3 = vunpack.c.h.bf16 %v7372_v0 }
 0x17d   :  { %5908 = vmatpush3.bf16.msra.mxu1 %v6998_v62  ;;  %v760_v62 = vunpack.c.h.bf16 %v7393_v6 }
 0x17e   :  { %5909 = vmatprep.subr.bf16.mxu1 %v6999_v63 }
 0x181   :  { %5910 = vmatpush3.bf16.msra.mxu1 %v6999_v63  ;;  %v7003_v63 = vld [vmem:[#allocation7 + $0xd8] sm:$0xff]  }
 0x182   :  { %5959 = vmatprep.subr.bf16.mxu1 %v7000_v9 }
 0x236   :  { %v5881_v12 = vpop.f32.mrb[0].mxu0 }
 0x237   :  { %v735_v13 = vmul.f32 2.0, %v5881_v12  ;;  %v670_v17 = vpop.f32.mrb[1].mxu0  ;;  %v757_v12 = vunpack.c.l.bf16 %v7389_v5 }
 0x238   :  { %v733_v21 = vmul.f32 2.0, %v670_v17  ;;  %v5882_v24 = vpop.f32.mrb[2].mxu0 }
 0x239   :  { %v736_v25 = vmul.f32 2.0, %v5882_v24  ;;  %v673_v26 = vpop.f32.mrb[3].mxu0  ;;  %v767_v29 = vsub.f32 %v735_v13, %v751_v16  ;;  %v758_v16 = vunpack.c.h.bf16 %v7389_v5  ;;  %v7004_v24 = vld [vmem:[#allocation7 + $0xe0] sm:$0xff]  }
 0x23a   :  { %v734_v27 = vmul.f32 2.0, %v673_v26  ;;  %v765_v32 = vsub.f32 %v733_v21, %v749_v23 }
 0x23b   :  { %v768_v31 = vsub.f32 %v736_v25, %v752_v20 }
 0x23c   :  { %v766_v33 = vsub.f32 %v734_v27, %v750_v3 }
 0x23d   :  { %v7489_v34 = vpack.c.bf16 %v768_v31, %v767_v29  ;;  %v763_v31 = vunpack.c.l.bf16 %v7400_v8 }
 0x23e   :  { %v7491_v35 = vpack.c.bf16 %v766_v33, %v765_v32  ;;  %v5885_v37 = vpop.f32.mrb[4].mxu0  ;;  %v764_v33 = vunpack.c.h.bf16 %v7400_v8 }
 0x23f   :  { %v739_v39 = vmul.f32 2.0, %v5885_v37  ;;  %v686_v40 = vpop.f32.mrb[5].mxu0  ;;  %v7005_v37 = vld [vmem:[#allocation7 + $0xe8] sm:$0xff]  }
 0x240   :  { %v737_v0 = vmul.f32 2.0, %v686_v40  ;;  %v5886_v45 = vpop.f32.mrb[6].mxu0  ;;  %5911 = vmatprep.mubr.bf16.mxu1 %v7491_v35  ;;  %5927 = vmatprep.subr.bf16.mxu0 %v7491_v35 }
 0x241   :  { %v740_v48 = vmul.f32 2.0, %v5886_v45  ;;  %v689_v49 = vpop.f32.mrb[7].mxu0  ;;  %5912 = vmatmul.mubr.bf16.vlgmr.msra.gmra.mrb[16].mxu1 %v7489_v34  ;;  %5928 = vmatpush3.bf16.msra.mxu0 %v7491_v35  ;;  %v771_v4 = vsub.f32 %v739_v39, %v755_v1  ;;  %v761_v1 = vunpack.c.l.bf16 %v7397_v7 }
 0x242   :  { %v738_v50 = vmul.f32 2.0, %v689_v49  ;;  %5929 = vmatprep.subr.bf16.mxu0 %v7489_v34  ;;  %5960 = vmatpush3.bf16.msra.mxu1 %v7000_v9  ;;  %v769_v55 = vsub.f32 %v737_v0, %v753_v43 }
 0x243   :  { %v772_v51 = vsub.f32 %v740_v48, %v756_v41  ;;  %5961 = vmatprep.subr.bf16.mxu1 %v7001_v42  ;;  %v762_v41 = vunpack.c.h.bf16 %v7397_v7 }
 0x244   :  { %v770_v56 = vsub.f32 %v738_v50, %v754_v47  ;;  %v7548_v50 = vld [vmem:[#allocation2] sm:$0xff]  }
 0x245   :  { %v7502_v57 = vpack.c.bf16 %v772_v51, %v771_v4  ;;  %5930 = vmatpush3.bf16.msra.mxu0 %v7489_v34  ;;  %v7006_v4 = vld [vmem:[#allocation7 + $0xf0] sm:$0xff]  }
 0x246   :  { %v7505_v2 = vpack.c.bf16 %v770_v56, %v769_v55  ;;  %v5889_v58 = vpop.f32.mrb[8].mxu0  ;;  %5962 = vmatpush3.bf16.msra.mxu1 %v7001_v42 }
 0x247   :  { %v743_v59 = vmul.f32 2.0, %v5889_v58  ;;  %v702_v61 = vpop.f32.mrb[9].mxu0  ;;  %5963 = vmatprep.subr.bf16.mxu1 %v7002_v53 }
 0x248   :  { %v741_v9 = vmul.f32 2.0, %v702_v61  ;;  %v5890_v13 = vpop.f32.mrb[10].mxu0  ;;  %5915 = vmatprep.mubr.bf16.mxu1 %v7505_v2  ;;  %5931 = vmatprep.subr.bf16.mxu0 %v7505_v2 }
 0x249   :  { %v744_v17 = vmul.f32 2.0, %v5890_v13  ;;  %v705_v20 = vpop.f32.mrb[11].mxu0  ;;  %5916 = vmatmul.mubr.bf16.gmra.mrb[20].mxu1 %v7502_v57  ;;  %5932 = vmatpush3.bf16.msra.mxu0 %v7505_v2  ;;  %v775_v6 = vsub.f32 %v743_v59, %v759_v60  ;;  %v1083_v59 = vunpack.c.h.bf16 %v7429_v28 }
 0x24a   :  { %v742_v21 = vmul.f32 2.0, %v705_v20  ;;  %5933 = vmatprep.subr.bf16.mxu0 %v7502_v57  ;;  %5964 = vmatpush3.bf16.msra.mxu1 %v7002_v53  ;;  %v773_v3 = vsub.f32 %v741_v9, %v757_v12  ;;  %v1080_v53 = vunpack.c.l.bf16 %v7431_v30 }
 0x24b   :  { %v776_v23 = vsub.f32 %v744_v17, %v760_v62  ;;  %5965 = vmatprep.subr.bf16.mxu1 %v7003_v63 }
 0x24c   :  { %v774_v25 = vsub.f32 %v742_v21, %v758_v16  ;;  %v1086_v21 = vunpack.c.l.bf16 %v7438_v36 }
 0x24d   :  { %v7516_v26 = vpack.c.bf16 %v776_v23, %v775_v6  ;;  %5934 = vmatpush3.bf16.msra.mxu0 %v7502_v57  ;;  %v7009_v23 = vld [vmem:[#allocation7 + $0x108] sm:$0xff]  }
 0x24e   :  { %v7519_v5 = vpack.c.bf16 %v774_v25, %v773_v3  ;;  %v5893_v27 = vpop.f32.mrb[12].mxu0  ;;  %5966 = vmatpush3.bf16.msra.mxu1 %v7003_v63  ;;  %v1081_v63 = vunpack.c.h.bf16 %v7431_v30 }
 0x24f   :  { %v747_v29 = vmul.f32 2.0, %v5893_v27  ;;  %v718_v32 = vpop.f32.mrb[13].mxu0  ;;  %5967 = vmatprep.subr.bf16.mxu1 %v7004_v24  ;;  %v1087_v27 = vunpack.c.h.bf16 %v7438_v36 }
 0x250   :  { %v745_v39 = vmul.f32 2.0, %v718_v32  ;;  %v5894_v40 = vpop.f32.mrb[14].mxu0  ;;  %5919 = vmatprep.mubr.bf16.mxu1 %v7519_v5  ;;  %5935 = vmatprep.subr.bf16.mxu0 %v7519_v5 }
 0x251   :  { %v748_v42 = vmul.f32 2.0, %v5894_v40  ;;  %v721_v0 = vpop.f32.mrb[15].mxu0  ;;  %5920 = vmatmul.mubr.bf16.gmra.mrb[24].mxu1 %v7516_v26  ;;  %5936 = vmatpush3.bf16.msra.mxu0 %v7519_v5  ;;  %v779_v8 = vsub.f32 %v747_v29, %v763_v31 }
 0x252   :  { %v746_v43 = vmul.f32 2.0, %v721_v0  ;;  %5937 = vmatprep.subr.bf16.mxu0 %v7516_v26  ;;  %5968 = vmatpush3.bf16.msra.mxu1 %v7004_v24  ;;  %v777_v47 = vsub.f32 %v745_v39, %v761_v1  ;;  %v7010_v39 = vld [vmem:[#allocation7 + $0x110] sm:$0xff]   ;;  %v1090_v0 = vunpack.c.l.bf16 %v7448_v44 }
 0x253   :  { %v780_v45 = vsub.f32 %v748_v42, %v764_v33  ;;  %5969 = vmatprep.subr.bf16.mxu1 %v7005_v37  ;;  %v1085_v33 = vunpack.c.h.bf16 %v7441_v38 }
 0x254   :  { %v778_v48 = vsub.f32 %v746_v43, %v762_v41 }
 0x255   :  { %v7530_v49 = vpack.c.bf16 %v780_v45, %v779_v8  ;;  %5938 = vmatpush3.bf16.msra.mxu0 %v7516_v26  ;;  %v1088_v45 = vunpack.c.l.bf16 %v7451_v46 }
 0x256   :  { %v7533_v7 = vpack.c.bf16 %v778_v48, %v777_v47  ;;  %5970 = vmatpush3.bf16.msra.mxu1 %v7005_v37 }
 0x257   :  { %5971 = vmatprep.subr.bf16.mxu1 %v7006_v4 }
 0x258   :  { %5923 = vmatprep.mubr.bf16.mxu1 %v7533_v7  ;;  %5939 = vmatprep.subr.bf16.mxu0 %v7533_v7 }
 0x259   :  { %5924 = vmatmul.mubr.bf16.gmra.mrb[28].mxu1 %v7530_v49  ;;  %5940 = vmatpush3.bf16.msra.mxu0 %v7533_v7 }
 0x25a   :  { %5941 = vmatprep.subr.bf16.mxu0 %v7530_v49  ;;  %5972 = vmatpush3.bf16.msra.mxu1 %v7006_v4 }
 0x25d   :  { %5942 = vmatpush3.bf16.msra.mxu0 %v7530_v49 }
 0x260   :  { %5944 = vmatmul.mubr.bf16.vlgmr.msra.gmra.mrb[16].mxu0 %v7407_v10  ;;  %v7007_v10 = vld [vmem:[#allocation7 + $0xf8] sm:$0xff]  }
 0x261   :  { %5947 = vmatprep.mubr.bf16.mxu0 %v7409_v11  ;;  %5973 = vmatprep.subr.bf16.mxu1 %v7007_v10  ;;  %v7008_v11 = vld [vmem:[#allocation7 + $0x100] sm:$0xff]  }
 0x262   :  { %5974 = vmatpush3.bf16.msra.mxu1 %v7007_v10  ;;  %v1091_v10 = vunpack.c.h.bf16 %v7448_v44 }
 0x263   :  { %6023 = vmatprep.subr.bf16.mxu1 %v7008_v11 }
 0x268   :  { %5948 = vmatmul.mubr.bf16.gmra.mrb[20].mxu0 %v7414_v14 }
 0x269   :  { %5951 = vmatprep.mubr.bf16.mxu0 %v7416_v15 }
 0x270   :  { %5952 = vmatmul.mubr.bf16.gmra.mrb[24].mxu0 %v7420_v18  ;;  %v1082_v18 = vunpack.c.l.bf16 %v7429_v28  ;;  %v1084_v28 = vunpack.c.l.bf16 %v7441_v38  ;;  %v7011_v38 = vld [vmem:[#allocation7 + $0x118] sm:$0xff]  }
 0x271   :  { %5955 = vmatprep.mubr.bf16.mxu0 %v7422_v19 }
 0x278   :  { %5956 = vmatmul.mubr.bf16.gmra.mrb[28].mxu0 %v7426_v22 }
 0x279   :  { %6007 = vmatprep.mubr.bf16.mxu0 %v7548_v50 }
 0x333   :  { %v5945_v14 = vpop.f32.mrb[16].mxu0 }
 0x334   :  { %v1066_v15 = vmul.f32 2.0, %v5945_v14  ;;  %v1001_v51 = vpop.f32.mrb[17].mxu0 }
 0x335   :  { %v1064_v19 = vmul.f32 2.0, %v1001_v51  ;;  %v5946_v55 = vpop.f32.mrb[18].mxu0 }
 0x336   :  { %v1098_v56 = vsub.f32 %v1066_v15, %v1082_v18  ;;  %v1067_v58 = vmul.f32 2.0, %v5946_v55  ;;  %v1004_v60 = vpop.f32.mrb[19].mxu0  ;;  %v1089_v18 = vunpack.c.h.bf16 %v7451_v46  ;;  %v7013_v46 = vld [vmem:[#allocation7 + $0x128] sm:$0xff]  }
 0x337   :  { %v1096_v61 = vsub.f32 %v1064_v19, %v1080_v53  ;;  %v1065_v62 = vmul.f32 2.0, %v1004_v60  ;;  %v7012_v19 = vld [vmem:[#allocation7 + $0x120] sm:$0xff]  }
 0x338   :  { %v1099_v9 = vsub.f32 %v1067_v58, %v1083_v59  ;;  %v1094_v59 = vunpack.c.l.bf16 %v7458_v52 }
 0x339   :  { %v1097_v12 = vsub.f32 %v1065_v62, %v1081_v63  ;;  %v1092_v62 = vunpack.c.l.bf16 %v7461_v54 }
 0x33a   :  { %v7555_v13 = vpack.c.bf16 %v1099_v9, %v1098_v56 }
 0x33b   :  { %v7557_v16 = vpack.c.bf16 %v1097_v12, %v1096_v61  ;;  %v5949_v17 = vpop.f32.mrb[20].mxu0 }
 0x33c   :  { %v1070_v20 = vmul.f32 2.0, %v5949_v17  ;;  %v1017_v6 = vpop.f32.mrb[21].mxu0  ;;  %v1095_v17 = vunpack.c.h.bf16 %v7458_v52 }
 0x33d   :  { %v1068_v24 = vmul.f32 2.0, %v1017_v6  ;;  %v5950_v3 = vpop.f32.mrb[22].mxu0  ;;  %5975 = vmatprep.mubr.bf16.mxu1 %v7557_v16  ;;  %5991 = vmatprep.subr.bf16.mxu0 %v7557_v16 }
 0x33e   :  { %v1102_v30 = vsub.f32 %v1070_v20, %v1086_v21  ;;  %v1071_v25 = vmul.f32 2.0, %v5950_v3  ;;  %v1020_v29 = vpop.f32.mrb[23].mxu0  ;;  %5976 = vmatmul.mubr.bf16.vlgmr.msra.gmra.mrb[16].mxu1 %v7555_v13  ;;  %5992 = vmatpush3.bf16.msra.mxu0 %v7557_v16 }
 0x33f   :  { %v1100_v31 = vsub.f32 %v1068_v24, %v1084_v28  ;;  %v1069_v32 = vmul.f32 2.0, %v1020_v29  ;;  %5993 = vmatprep.subr.bf16.mxu0 %v7555_v13  ;;  %6024 = vmatpush3.bf16.msra.mxu1 %v7008_v11  ;;  %v7619_v29 = vld [vmem:[#allocation2 + $0x28] sm:$0xff]  }
 0x340   :  { %v1103_v37 = vsub.f32 %v1071_v25, %v1087_v27  ;;  %6025 = vmatprep.subr.bf16.mxu1 %v7009_v23  ;;  %v7613_v25 = vld [vmem:[#allocation2 + $0x18] sm:$0xff]   ;;  %v7616_v27 = vld [vmem:[#allocation2 + $0x20] sm:$0xff]  }
 0x341   :  { %v1101_v1 = vsub.f32 %v1069_v32, %v1085_v33  ;;  %v7014_v32 = vld [vmem:[#allocation7 + $0x130] sm:$0xff]   ;;  %v7015_v33 = vld [vmem:[#allocation7 + $0x138] sm:$0xff]  }
 0x342   :  { %v7568_v40 = vpack.c.bf16 %v1103_v37, %v1102_v30  ;;  %5994 = vmatpush3.bf16.msra.mxu0 %v7555_v13  ;;  %v7610_v30 = vld [vmem:[#allocation2 + $0x10] sm:$0xff]   ;;  %v7016_v37 = vld [vmem:[#allocation7 + $0x140] sm:$0xff]  }
 0x343   :  { %v7571_v36 = vpack.c.bf16 %v1101_v1, %v1100_v31  ;;  %v5953_v41 = vpop.f32.mrb[24].mxu0  ;;  %6026 = vmatpush3.bf16.msra.mxu1 %v7009_v23  ;;  %v1093_v23 = vunpack.c.h.bf16 %v7461_v54  ;;  %v7607_v54 = vld [vmem:[#allocation2 + $0x8] sm:$0xff]   ;;  %v7622_v31 = vld [vmem:[#allocation2 + $0x30] sm:$0xff]  }
 0x344   :  { %v1074_v42 = vmul.f32 2.0, %v5953_v41  ;;  %v1033_v43 = vpop.f32.mrb[25].mxu0  ;;  %6027 = vmatprep.subr.bf16.mxu1 %v7010_v39  ;;  %v1413_v41 = vunpack.c.l.bf16 %v7489_v34 }
 0x345   :  { %v1072_v8 = vmul.f32 2.0, %v1033_v43  ;;  %v5954_v47 = vpop.f32.mrb[26].mxu0  ;;  %5979 = vmatprep.mubr.bf16.mxu1 %v7571_v36  ;;  %5995 = vmatprep.subr.bf16.mxu0 %v7571_v36  ;;  %v1411_v43 = vunpack.c.l.bf16 %v7491_v35 }
 0x346   :  { %v1106_v48 = vsub.f32 %v1074_v42, %v1090_v0  ;;  %v1075_v4 = vmul.f32 2.0, %v5954_v47  ;;  %v1036_v11 = vpop.f32.mrb[27].mxu0  ;;  %5980 = vmatmul.mubr.bf16.gmra.mrb[20].mxu1 %v7568_v40  ;;  %5996 = vmatpush3.bf16.msra.mxu0 %v7571_v36 }
 0x347   :  { %v1104_v14 = vsub.f32 %v1072_v8, %v1088_v45  ;;  %v1073_v15 = vmul.f32 2.0, %v1036_v11  ;;  %5997 = vmatprep.subr.bf16.mxu0 %v7568_v40  ;;  %6028 = vmatpush3.bf16.msra.mxu1 %v7010_v39  ;;  %v1414_v45 = vunpack.c.h.bf16 %v7489_v34  ;;  %v1415_v34 = vunpack.c.l.bf16 %v7505_v2 }
 0x348   :  { %v1107_v51 = vsub.f32 %v1075_v4, %v1091_v10  ;;  %6029 = vmatprep.subr.bf16.mxu1 %v7011_v38  ;;  %v1412_v10 = vunpack.c.h.bf16 %v7491_v35 }
 0x349   :  { %v1105_v53 = vsub.f32 %v1073_v15, %v1089_v18 }
 0x34a   :  { %v7582_v55 = vpack.c.bf16 %v1107_v51, %v1106_v48  ;;  %5998 = vmatpush3.bf16.msra.mxu0 %v7568_v40 }
 0x34b   :  { %v7585_v44 = vpack.c.bf16 %v1105_v53, %v1104_v14  ;;  %v5957_v56 = vpop.f32.mrb[28].mxu0  ;;  %6030 = vmatpush3.bf16.msra.mxu1 %v7011_v38  ;;  %v1417_v53 = vunpack.c.l.bf16 %v7502_v57 }
 0x34c   :  { %v1078_v58 = vmul.f32 2.0, %v5957_v56  ;;  %v1049_v60 = vpop.f32.mrb[29].mxu0  ;;  %6031 = vmatprep.subr.bf16.mxu1 %v7012_v19 }
 0x34d   :  { %v1076_v61 = vmul.f32 2.0, %v1049_v60  ;;  %v5958_v63 = vpop.f32.mrb[30].mxu0  ;;  %5983 = vmatprep.mubr.bf16.mxu1 %v7585_v44  ;;  %5999 = vmatprep.subr.bf16.mxu0 %v7585_v44 }
 0x34e   :  { %v1110_v9 = vsub.f32 %v1078_v58, %v1094_v59  ;;  %v1079_v12 = vmul.f32 2.0, %v5958_v63  ;;  %v1052_v20 = vpop.f32.mrb[31].mxu0  ;;  %5984 = vmatmul.mubr.bf16.gmra.mrb[24].mxu1 %v7582_v55  ;;  %6000 = vmatpush3.bf16.msra.mxu0 %v7585_v44  ;;  %v7017_v58 = vld [vmem:[#allocation7 + $0x148] sm:$0xff]  }
 0x34f   :  { %v1108_v21 = vsub.f32 %v1076_v61, %v1092_v62  ;;  %v1077_v6 = vmul.f32 2.0, %v1052_v20  ;;  %6001 = vmatprep.subr.bf16.mxu0 %v7582_v55  ;;  %6032 = vmatpush3.bf16.msra.mxu1 %v7012_v19  ;;  %v1418_v61 = vunpack.c.h.bf16 %v7502_v57  ;;  %v7018_v20 = vld [vmem:[#allocation7 + $0x150] sm:$0xff]  }
 0x350   :  { %v1111_v24 = vsub.f32 %v1079_v12, %v1095_v17  ;;  %6033 = vmatprep.subr.bf16.mxu1 %v7013_v46  ;;  %v1416_v12 = vunpack.c.h.bf16 %v7505_v2  ;;  %v7019_v2 = vld [vmem:[#allocation7 + $0x158] sm:$0xff]  }
 0x351   :  { %v1109_v28 = vsub.f32 %v1077_v6, %v1093_v23 }
 0x352   :  { %v7596_v3 = vpack.c.bf16 %v1111_v24, %v1110_v9  ;;  %6002 = vmatpush3.bf16.msra.mxu0 %v7582_v55 }
 0x353   :  { %v7599_v52 = vpack.c.bf16 %v1109_v28, %v1108_v21  ;;  %6034 = vmatpush3.bf16.msra.mxu1 %v7013_v46  ;;  %v1421_v28 = vunpack.c.l.bf16 %v7516_v26 }
 0x354   :  { %6035 = vmatprep.subr.bf16.mxu1 %v7014_v32 }
 0x355   :  { %5987 = vmatprep.mubr.bf16.mxu1 %v7599_v52  ;;  %6003 = vmatprep.subr.bf16.mxu0 %v7599_v52 }
 0x356   :  { %5988 = vmatmul.mubr.bf16.gmra.mrb[28].mxu1 %v7596_v3  ;;  %6004 = vmatpush3.bf16.msra.mxu0 %v7599_v52 }
 0x357   :  { %6005 = vmatprep.subr.bf16.mxu0 %v7596_v3  ;;  %6036 = vmatpush3.bf16.msra.mxu1 %v7014_v32 }
 0x358   :  { %6037 = vmatprep.subr.bf16.mxu1 %v7015_v33 }
 0x35a   :  { %6006 = vmatpush3.bf16.msra.mxu0 %v7596_v3 }
 0x35b   :  { %6038 = vmatpush3.bf16.msra.mxu1 %v7015_v33 }
 0x35c   :  { %6087 = vmatprep.subr.bf16.mxu1 %v7016_v37 }
 0x35d   :  { %6008 = vmatmul.mubr.bf16.vlgmr.msra.gmra.mrb[32].mxu0 %v7607_v54 }
 0x35e   :  { %6011 = vmatprep.mubr.bf16.mxu0 %v7610_v30 }
 0x365   :  { %6012 = vmatmul.mubr.bf16.gmra.mrb[36].mxu0 %v7613_v25 }
 0x366   :  { %6015 = vmatprep.mubr.bf16.mxu0 %v7616_v27 }
 0x36d   :  { %6016 = vmatmul.mubr.bf16.gmra.mrb[40].mxu0 %v7619_v29 }
 0x36e   :  { %6019 = vmatprep.mubr.bf16.mxu0 %v7622_v31 }
 0x375   :  { %6020 = vmatmul.mubr.bf16.gmra.mrb[44].mxu0 %v7426_v22 }
 0x376   :  { %6071 = vmatprep.mubr.bf16.mxu0 %v7548_v50 }
 0x430   :  { %v6009_v39 = vpop.f32.mrb[32].mxu0 }
 0x431   :  { %v1397_v1 = vmul.f32 2.0, %v6009_v39  ;;  %v1332_v42 = vpop.f32.mrb[33].mxu0 }
 0x432   :  { %v1395_v0 = vmul.f32 2.0, %v1332_v42  ;;  %v6010_v38 = vpop.f32.mrb[34].mxu0  ;;  %v1422_v42 = vunpack.c.h.bf16 %v7516_v26 }
 0x433   :  { %v1429_v22 = vsub.f32 %v1397_v1, %v1413_v41  ;;  %v1398_v8 = vmul.f32 2.0, %v6010_v38  ;;  %v1335_v47 = vpop.f32.mrb[35].mxu0 }
 0x434   :  { %v1427_v48 = vsub.f32 %v1395_v0, %v1411_v43  ;;  %v1396_v4 = vmul.f32 2.0, %v1335_v47 }
 0x435   :  { %v1430_v11 = vsub.f32 %v1398_v8, %v1414_v45  ;;  %v7020_v45 = vld [vmem:[#allocation7 + $0x160] sm:$0xff]  }
 0x436   :  { %v1428_v14 = vsub.f32 %v1396_v4, %v1412_v10 }
 0x437   :  { %v7631_v15 = vpack.c.bf16 %v1430_v11, %v1429_v22  ;;  %v1420_v22 = vunpack.c.h.bf16 %v7519_v5  ;;  %v1425_v11 = vunpack.c.l.bf16 %v7530_v49 }
 0x438   :  { %v7633_v18 = vpack.c.bf16 %v1428_v14, %v1427_v48  ;;  %v6013_v51 = vpop.f32.mrb[36].mxu0 }
 0x439   :  { %v1401_v19 = vmul.f32 2.0, %v6013_v51  ;;  %v1348_v56 = vpop.f32.mrb[37].mxu0 }
 0x43a   :  { %v1399_v59 = vmul.f32 2.0, %v1348_v56  ;;  %v6014_v60 = vpop.f32.mrb[38].mxu0  ;;  %6039 = vmatprep.mubr.bf16.mxu1 %v7633_v18  ;;  %6055 = vmatprep.subr.bf16.mxu0 %v7633_v18 }
 0x43b   :  { %v1433_v35 = vsub.f32 %v1401_v19, %v1417_v53  ;;  %v1402_v46 = vmul.f32 2.0, %v6014_v60  ;;  %v1351_v62 = vpop.f32.mrb[39].mxu0  ;;  %6040 = vmatmul.mubr.bf16.vlgmr.msra.gmra.mrb[16].mxu1 %v7631_v15  ;;  %6056 = vmatpush3.bf16.msra.mxu0 %v7633_v18  ;;  %v1423_v19 = vunpack.c.l.bf16 %v7533_v7 }
 0x43c   :  { %v1431_v63 = vsub.f32 %v1399_v59, %v1415_v34  ;;  %v1400_v9 = vmul.f32 2.0, %v1351_v62  ;;  %6057 = vmatprep.subr.bf16.mxu0 %v7631_v15  ;;  %6088 = vmatpush3.bf16.msra.mxu1 %v7016_v37  ;;  %v1419_v37 = vunpack.c.l.bf16 %v7519_v5  ;;  %v7021_v5 = vld [vmem:[#allocation7 + $0x168] sm:$0xff]   ;;  %v1426_v59 = vunpack.c.h.bf16 %v7530_v49 }
 0x43d   :  { %v1434_v17 = vsub.f32 %v1402_v46, %v1418_v61  ;;  %6089 = vmatprep.subr.bf16.mxu1 %v7017_v58  ;;  %v1424_v46 = vunpack.c.h.bf16 %v7533_v7  ;;  %v7689_v7 = vld [vmem:[#allocation2 + $0x38] sm:$0xff]  }
 0x43e   :  { %v1432_v21 = vsub.f32 %v1400_v9, %v1416_v12  ;;  %v7022_v9 = vld [vmem:[#allocation7 + $0x170] sm:$0xff]   ;;  %v7023_v12 = vld [vmem:[#allocation7 + $0x178] sm:$0xff]  }
 0x43f   :  { %v7644_v6 = vpack.c.bf16 %v1434_v17, %v1433_v35  ;;  %6058 = vmatpush3.bf16.msra.mxu0 %v7631_v15  ;;  %v7024_v17 = vld [vmem:[#allocation7 + $0x180] sm:$0xff]  }
 0x440   :  { %v7647_v57 = vpack.c.bf16 %v1432_v21, %v1431_v63  ;;  %v6017_v23 = vpop.f32.mrb[40].mxu0  ;;  %6090 = vmatpush3.bf16.msra.mxu1 %v7017_v58 }
 0x441   :  { %v1405_v24 = vmul.f32 2.0, %v6017_v23  ;;  %v1364_v32 = vpop.f32.mrb[41].mxu0  ;;  %6091 = vmatprep.subr.bf16.mxu1 %v7018_v20  ;;  %v1744_v23 = vunpack.c.l.bf16 %v7555_v13 }
 0x442   :  { %v1403_v33 = vmul.f32 2.0, %v1364_v32  ;;  %v6018_v39 = vpop.f32.mrb[42].mxu0  ;;  %6043 = vmatprep.mubr.bf16.mxu1 %v7647_v57  ;;  %6059 = vmatprep.subr.bf16.mxu0 %v7647_v57  ;;  %v1742_v32 = vunpack.c.l.bf16 %v7557_v16 }
 0x443   :  { %v1437_v1 = vsub.f32 %v1405_v24, %v1421_v28  ;;  %v1406_v41 = vmul.f32 2.0, %v6018_v39  ;;  %v1367_v0 = vpop.f32.mrb[43].mxu0  ;;  %6044 = vmatmul.mubr.bf16.gmra.mrb[20].mxu1 %v7644_v6  ;;  %6060 = vmatpush3.bf16.msra.mxu0 %v7647_v57  ;;  %v1745_v39 = vunpack.c.h.bf16 %v7555_v13  ;;  %v1746_v13 = vunpack.c.l.bf16 %v7571_v36 }
 0x444   :  { %v1435_v43 = vsub.f32 %v1403_v33, %v1419_v37  ;;  %v1404_v38 = vmul.f32 2.0, %v1367_v0  ;;  %6061 = vmatprep.subr.bf16.mxu0 %v7644_v6  ;;  %6092 = vmatpush3.bf16.msra.mxu1 %v7018_v20  ;;  %v1743_v0 = vunpack.c.h.bf16 %v7557_v16 }
 0x445   :  { %v1438_v8 = vsub.f32 %v1406_v41, %v1422_v42  ;;  %6093 = vmatprep.subr.bf16.mxu1 %v7019_v2 }
 0x446   :  { %v1436_v47 = vsub.f32 %v1404_v38, %v1420_v22 }
 0x447   :  { %v7658_v48 = vpack.c.bf16 %v1438_v8, %v1437_v1  ;;  %6062 = vmatpush3.bf16.msra.mxu0 %v7644_v6 }
 0x448   :  { %v7661_v26 = vpack.c.bf16 %v1436_v47, %v1435_v43  ;;  %v6021_v4 = vpop.f32.mrb[44].mxu0  ;;  %6094 = vmatpush3.bf16.msra.mxu1 %v7019_v2 }
 0x449   :  { %v1409_v10 = vmul.f32 2.0, %v6021_v4  ;;  %v1380_v14 = vpop.f32.mrb[45].mxu0  ;;  %6095 = vmatprep.subr.bf16.mxu1 %v7020_v45  ;;  %v1748_v4 = vunpack.c.l.bf16 %v7568_v40 }
 0x44a   :  { %v1407_v51 = vmul.f32 2.0, %v1380_v14  ;;  %v6022_v53 = vpop.f32.mrb[46].mxu0  ;;  %6047 = vmatprep.mubr.bf16.mxu1 %v7661_v26  ;;  %6063 = vmatprep.subr.bf16.mxu0 %v7661_v26 }
 0x44b   :  { %v1441_v56 = vsub.f32 %v1409_v10, %v1425_v11  ;;  %v1410_v58 = vmul.f32 2.0, %v6022_v53  ;;  %v1383_v34 = vpop.f32.mrb[47].mxu0  ;;  %6048 = vmatmul.mubr.bf16.gmra.mrb[24].mxu1 %v7658_v48  ;;  %6064 = vmatpush3.bf16.msra.mxu0 %v7661_v26  ;;  %v7025_v11 = vld [vmem:[#allocation7 + $0x188] sm:$0xff]  }
 0x44c   :  { %v1439_v60 = vsub.f32 %v1407_v51, %v1423_v19  ;;  %v1408_v35 = vmul.f32 2.0, %v1383_v34  ;;  %6065 = vmatprep.subr.bf16.mxu0 %v7658_v48  ;;  %6096 = vmatpush3.bf16.msra.mxu1 %v7020_v45  ;;  %v1749_v19 = vunpack.c.h.bf16 %v7568_v40 }
 0x44d   :  { %v1442_v61 = vsub.f32 %v1410_v58, %v1426_v59  ;;  %6097 = vmatprep.subr.bf16.mxu1 %v7021_v5  ;;  %v1747_v59 = vunpack.c.h.bf16 %v7571_v36  ;;  %v7027_v36 = vld [vmem:[#allocation7 + $0x198] sm:$0xff]  }
 0x44e   :  { %v1440_v62 = vsub.f32 %v1408_v35, %v1424_v46 }
 0x44f   :  { %v7672_v63 = vpack.c.bf16 %v1442_v61, %v1441_v56  ;;  %6066 = vmatpush3.bf16.msra.mxu0 %v7658_v48 }
 0x450   :  { %v7675_v49 = vpack.c.bf16 %v1440_v62, %v1439_v60  ;;  %6098 = vmatpush3.bf16.msra.mxu1 %v7021_v5  ;;  %v7026_v60 = vld [vmem:[#allocation7 + $0x190] sm:$0xff]  }
 0x451   :  { %6099 = vmatprep.subr.bf16.mxu1 %v7022_v9 }
 0x452   :  { %6051 = vmatprep.mubr.bf16.mxu1 %v7675_v49  ;;  %6067 = vmatprep.subr.bf16.mxu0 %v7675_v49 }
 0x453   :  { %6052 = vmatmul.mubr.bf16.gmra.mrb[28].mxu1 %v7672_v63  ;;  %6068 = vmatpush3.bf16.msra.mxu0 %v7675_v49 }
 0x454   :  { %6069 = vmatprep.subr.bf16.mxu0 %v7672_v63  ;;  %6100 = vmatpush3.bf16.msra.mxu1 %v7022_v9  ;;  %v1752_v9 = vunpack.c.l.bf16 %v7582_v55 }
 0x455   :  { %6101 = vmatprep.subr.bf16.mxu1 %v7023_v12 }
 0x457   :  { %6070 = vmatpush3.bf16.msra.mxu0 %v7672_v63 }
 0x458   :  { %6102 = vmatpush3.bf16.msra.mxu1 %v7023_v12 }
 0x459   :  { %6151 = vmatprep.subr.bf16.mxu1 %v7024_v17 }
 0x45a   :  { %6072 = vmatmul.mubr.bf16.vlgmr.msra.gmra.mrb[48].mxu0 %v7607_v54 }
 0x45b   :  { %6075 = vmatprep.mubr.bf16.mxu0 %v7610_v30 }
 0x462   :  { %6076 = vmatmul.mubr.bf16.gmra.mrb[52].mxu0 %v7613_v25 }
 0x463   :  { %6079 = vmatprep.mubr.bf16.mxu0 %v7616_v27 }
 0x46a   :  { %6080 = vmatmul.mubr.bf16.gmra.mrb[56].mxu0 %v7619_v29 }
 0x46b   :  { %6083 = vmatprep.mubr.bf16.mxu0 %v7622_v31 }
 0x472   :  { %6084 = vmatmul.mubr.bf16.gmra.mrb[60].mxu0 %v7689_v7 }
 0x473   :  { %6135 = vmatprep.mubr.bf16.mxu0 %v7548_v50 }
 0x52d   :  { %v6073_v20 = vpop.f32.mrb[48].mxu0 }
 0x52e   :  { %v1728_v21 = vmul.f32 2.0, %v6073_v20  ;;  %v1663_v24 = vpop.f32.mrb[49].mxu0 }
 0x52f   :  { %v1726_v28 = vmul.f32 2.0, %v1663_v24  ;;  %v6074_v2 = vpop.f32.mrb[50].mxu0 }
 0x530   :  { %v1760_v33 = vsub.f32 %v1728_v21, %v1744_v23  ;;  %v1729_v37 = vmul.f32 2.0, %v6074_v2  ;;  %v1666_v1 = vpop.f32.mrb[51].mxu0 }
 0x531   :  { %v1758_v41 = vsub.f32 %v1726_v28, %v1742_v32  ;;  %v1727_v42 = vmul.f32 2.0, %v1666_v1  ;;  %v1753_v28 = vunpack.c.h.bf16 %v7582_v55  ;;  %v7028_v1 = vld [vmem:[#allocation7 + $0x1a0] sm:$0xff]  }
 0x532   :  { %v1761_v43 = vsub.f32 %v1729_v37, %v1745_v39  ;;  %v1751_v37 = vunpack.c.h.bf16 %v7585_v44 }
 0x533   :  { %v1759_v38 = vsub.f32 %v1727_v42, %v1743_v0 }
 0x534   :  { %v7697_v22 = vpack.c.bf16 %v1761_v43, %v1760_v33 }
 0x535   :  { %v7699_v8 = vpack.c.bf16 %v1759_v38, %v1758_v41  ;;  %v6077_v45 = vpop.f32.mrb[52].mxu0  ;;  %v1756_v38 = vunpack.c.l.bf16 %v7596_v3 }
 0x536   :  { %v1732_v47 = vmul.f32 2.0, %v6077_v45  ;;  %v1679_v10 = vpop.f32.mrb[53].mxu0 }
 0x537   :  { %v1730_v14 = vmul.f32 2.0, %v1679_v10  ;;  %v6078_v5 = vpop.f32.mrb[54].mxu0  ;;  %6103 = vmatprep.mubr.bf16.mxu1 %v7699_v8  ;;  %6119 = vmatprep.subr.bf16.mxu0 %v7699_v8 }
 0x538   :  { %v1764_v16 = vsub.f32 %v1732_v47, %v1748_v4  ;;  %v1733_v51 = vmul.f32 2.0, %v6078_v5  ;;  %v1682_v53 = vpop.f32.mrb[55].mxu0  ;;  %6104 = vmatmul.mubr.bf16.vlgmr.msra.gmra.mrb[16].mxu1 %v7697_v22  ;;  %6120 = vmatpush3.bf16.msra.mxu0 %v7699_v8  ;;  %v1754_v4 = vunpack.c.l.bf16 %v7599_v52 }
 0x539   :  { %v1762_v56 = vsub.f32 %v1730_v14, %v1746_v13  ;;  %v1731_v58 = vmul.f32 2.0, %v1682_v53  ;;  %6121 = vmatprep.subr.bf16.mxu0 %v7697_v22  ;;  %6152 = vmatpush3.bf16.msra.mxu1 %v7024_v17  ;;  %v1750_v17 = vunpack.c.l.bf16 %v7585_v44  ;;  %v7029_v44 = vld [vmem:[#allocation7 + $0x1a8] sm:$0xff]   ;;  %v1757_v13 = vunpack.c.h.bf16 %v7596_v3 }
 0x53a   :  { %v1765_v34 = vsub.f32 %v1733_v51, %v1749_v19  ;;  %6153 = vmatprep.subr.bf16.mxu1 %v7025_v11  ;;  %v1755_v19 = vunpack.c.h.bf16 %v7599_v52  ;;  %v7030_v52 = vld [vmem:[#allocation7 + $0x1b0] sm:$0xff]  }
 0x53b   :  { %v1763_v35 = vsub.f32 %v1731_v58, %v1747_v59  ;;  %v7031_v59 = vld [vmem:[#allocation7 + $0x1b8] sm:$0xff]  }
 0x53c   :  { %v7710_v46 = vpack.c.bf16 %v1765_v34, %v1764_v16  ;;  %6122 = vmatpush3.bf16.msra.mxu0 %v7697_v22  ;;  %v7032_v34 = vld [vmem:[#allocation7 + $0x1c0] sm:$0xff]  }
 0x53d   :  { %v7713_v40 = vpack.c.bf16 %v1763_v35, %v1762_v56  ;;  %v6081_v61 = vpop.f32.mrb[56].mxu0  ;;  %6154 = vmatpush3.bf16.msra.mxu1 %v7025_v11 }
 0x53e   :  { %v1736_v62 = vmul.f32 2.0, %v6081_v61  ;;  %v1695_v12 = vpop.f32.mrb[57].mxu0  ;;  %6155 = vmatprep.subr.bf16.mxu1 %v7026_v60  ;;  %v2075_v61 = vunpack.c.l.bf16 %v7631_v15 }
 0x53f   :  { %v1734_v20 = vmul.f32 2.0, %v1695_v12  ;;  %v6082_v21 = vpop.f32.mrb[58].mxu0  ;;  %6107 = vmatprep.mubr.bf16.mxu1 %v7713_v40  ;;  %6123 = vmatprep.subr.bf16.mxu0 %v7713_v40  ;;  %v2073_v12 = vunpack.c.l.bf16 %v7633_v18 }
 0x540   :  { %v1768_v23 = vsub.f32 %v1736_v62, %v1752_v9  ;;  %v1737_v24 = vmul.f32 2.0, %v6082_v21  ;;  %v1698_v32 = vpop.f32.mrb[59].mxu0  ;;  %6108 = vmatmul.mubr.bf16.gmra.mrb[20].mxu1 %v7710_v46  ;;  %6124 = vmatpush3.bf16.msra.mxu0 %v7713_v40 }
 0x541   :  { %v1766_v2 = vsub.f32 %v1734_v20, %v1750_v17  ;;  %v1735_v33 = vmul.f32 2.0, %v1698_v32  ;;  %6125 = vmatprep.subr.bf16.mxu0 %v7710_v46  ;;  %6156 = vmatpush3.bf16.msra.mxu1 %v7026_v60 }
 0x542   :  { %v1769_v39 = vsub.f32 %v1737_v24, %v1753_v28  ;;  %6157 = vmatprep.subr.bf16.mxu1 %v7027_v36  ;;  %v2074_v28 = vunpack.c.h.bf16 %v7633_v18  ;;  %v2080_v18 = vunpack.c.h.bf16 %v7644_v6 }
 0x543   :  { %v1767_v41 = vsub.f32 %v1735_v33, %v1751_v37 }
 0x544   :  { %v7724_v42 = vpack.c.bf16 %v1769_v39, %v1768_v23  ;;  %6126 = vmatpush3.bf16.msra.mxu0 %v7710_v46 }
 0x545   :  { %v7727_v55 = vpack.c.bf16 %v1767_v41, %v1766_v2  ;;  %v6085_v0 = vpop.f32.mrb[60].mxu0  ;;  %6158 = vmatpush3.bf16.msra.mxu1 %v7027_v36  ;;  %v2079_v41 = vunpack.c.l.bf16 %v7644_v6  ;;  %v2083_v6 = vunpack.c.l.bf16 %v7658_v48 }
 0x546   :  { %v1740_v43 = vmul.f32 2.0, %v6085_v0  ;;  %v1711_v45 = vpop.f32.mrb[61].mxu0  ;;  %6159 = vmatprep.subr.bf16.mxu1 %v7028_v1 }
 0x547   :  { %v1738_v47 = vmul.f32 2.0, %v1711_v45  ;;  %v6086_v10 = vpop.f32.mrb[62].mxu0  ;;  %6111 = vmatprep.mubr.bf16.mxu1 %v7727_v55  ;;  %6127 = vmatprep.subr.bf16.mxu0 %v7727_v55  ;;  %v2077_v45 = vunpack.c.l.bf16 %v7647_v57 }
 0x548   :  { %v1772_v11 = vsub.f32 %v1740_v43, %v1756_v38  ;;  %v1741_v14 = vmul.f32 2.0, %v6086_v10  ;;  %v1714_v5 = vpop.f32.mrb[63].mxu0  ;;  %6112 = vmatmul.mubr.bf16.gmra.mrb[24].mxu1 %v7724_v42  ;;  %6128 = vmatpush3.bf16.msra.mxu0 %v7727_v55  ;;  %v7033_v43 = vld [vmem:[#allocation7 + $0x1c8] sm:$0xff]  }
 0x549   :  { %v1770_v16 = vsub.f32 %v1738_v47, %v1754_v4  ;;  %v1739_v51 = vmul.f32 2.0, %v1714_v5  ;;  %6129 = vmatprep.subr.bf16.mxu0 %v7724_v42  ;;  %6160 = vmatpush3.bf16.msra.mxu1 %v7028_v1  ;;  %v7034_v5 = vld [vmem:[#allocation7 + $0x1d0] sm:$0xff]  }
 0x54a   :  { %v1773_v53 = vsub.f32 %v1741_v14, %v1757_v13  ;;  %6161 = vmatprep.subr.bf16.mxu1 %v7029_v44  ;;  %v2078_v14 = vunpack.c.h.bf16 %v7647_v57  ;;  %v2081_v57 = vunpack.c.l.bf16 %v7661_v26 }
 0x54b   :  { %v1771_v56 = vsub.f32 %v1739_v51, %v1755_v19 }
 0x54c   :  { %v7738_v58 = vpack.c.bf16 %v1773_v53, %v1772_v11  ;;  %6130 = vmatpush3.bf16.msra.mxu0 %v7724_v42 }
 0x54d   :  { %v7741_v3 = vpack.c.bf16 %v1771_v56, %v1770_v16  ;;  %6162 = vmatpush3.bf16.msra.mxu1 %v7029_v44 }
 0x54e   :  { %6163 = vmatprep.subr.bf16.mxu1 %v7030_v52 }
 0x54f   :  { %6115 = vmatprep.mubr.bf16.mxu1 %v7741_v3  ;;  %6131 = vmatprep.subr.bf16.mxu0 %v7741_v3 }
 0x550   :  { %6116 = vmatmul.mubr.bf16.gmra.mrb[28].mxu1 %v7738_v58  ;;  %6132 = vmatpush3.bf16.msra.mxu0 %v7741_v3 }
 0x551   :  { %6133 = vmatprep.subr.bf16.mxu0 %v7738_v58  ;;  %6164 = vmatpush3.bf16.msra.mxu1 %v7030_v52 }
 0x552   :  { %6165 = vmatprep.subr.bf16.mxu1 %v7031_v59 }
 0x554   :  { %6134 = vmatpush3.bf16.msra.mxu0 %v7738_v58 }
 0x555   :  { %6166 = vmatpush3.bf16.msra.mxu1 %v7031_v59  ;;  %v7035_v59 = vld [vmem:[#allocation7 + $0x1d8] sm:$0xff]  }
 0x556   :  { %6215 = vmatprep.subr.bf16.mxu1 %v7032_v34 }
 0x557   :  { %6136 = vmatmul.mubr.bf16.vlgmr.msra.gmra.mrb[64].mxu0 %v7607_v54 }
 0x558   :  { %6139 = vmatprep.mubr.bf16.mxu0 %v7610_v30 }
 0x55f   :  { %6140 = vmatmul.mubr.bf16.gmra.mrb[68].mxu0 %v7613_v25 }
 0x560   :  { %6143 = vmatprep.mubr.bf16.mxu0 %v7616_v27 }
 0x567   :  { %6144 = vmatmul.mubr.bf16.gmra.mrb[72].mxu0 %v7619_v29 }
 0x568   :  { %6147 = vmatprep.mubr.bf16.mxu0 %v7622_v31 }
 0x56f   :  { %6148 = vmatmul.mubr.bf16.gmra.mrb[76].mxu0 %v7689_v7 }
 0x570   :  { %6199 = vmatprep.mubr.bf16.mxu0 %v7548_v50  ;;  %v2076_v50 = vunpack.c.h.bf16 %v7631_v15 }
 0x62a   :  { %v6137_v60 = vpop.f32.mrb[64].mxu0 }
 0x62b   :  { %v2059_v35 = vmul.f32 2.0, %v6137_v60  ;;  %v1994_v62 = vpop.f32.mrb[65].mxu0 }
 0x62c   :  { %v2057_v9 = vmul.f32 2.0, %v1994_v62  ;;  %v6138_v36 = vpop.f32.mrb[66].mxu0  ;;  %v2084_v62 = vunpack.c.h.bf16 %v7658_v48  ;;  %v2087_v48 = vunpack.c.l.bf16 %v7672_v63 }
 0x62d   :  { %v2091_v20 = vsub.f32 %v2059_v35, %v2075_v61  ;;  %v2060_v17 = vmul.f32 2.0, %v6138_v36  ;;  %v1997_v21 = vpop.f32.mrb[67].mxu0 }
 0x62e   :  { %v2089_v23 = vsub.f32 %v2057_v9, %v2073_v12  ;;  %v2058_v24 = vmul.f32 2.0, %v1997_v21 }
 0x62f   :  { %v2092_v32 = vsub.f32 %v2060_v17, %v2076_v50  ;;  %v7036_v50 = vld [vmem:[#allocation7 + $0x1e0] sm:$0xff]  }
 0x630   :  { %v2090_v2 = vsub.f32 %v2058_v24, %v2074_v28 }
 0x631   :  { %v2106_v33 = vpack.c.bf16 %v2092_v32, %v2091_v20  ;;  %v2082_v20 = vunpack.c.h.bf16 %v7661_v26  ;;  %v2085_v26 = vunpack.c.l.bf16 %v7675_v49 }
 0x632   :  { %v6141_v37 = vpop.f32.mrb[68].mxu0  ;;  %v2105_v39 = vpack.c.bf16 %v2090_v2, %v2089_v23 }
 0x633   :  { %v2063_v1 = vmul.f32 2.0, %v6141_v37  ;;  %v2010_v0 = vpop.f32.mrb[69].mxu0 }
 0x634   :  { %v2061_v38 = vmul.f32 2.0, %v2010_v0  ;;  %v6142_v44 = vpop.f32.mrb[70].mxu0  ;;  %6167 = vmatprep.mubr.bf16.mxu1 %v2105_v39  ;;  %6183 = vmatprep.subr.bf16.mxu0 %v2105_v39  ;;  %v2088_v0 = vunpack.c.h.bf16 %v7672_v63  ;;  %v7780_v63 = vld [vmem:[#allocation2] sm:$0xff]  }
 0x635   :  { %v2095_v15 = vsub.f32 %v2063_v1, %v2079_v41  ;;  %v2064_v47 = vmul.f32 2.0, %v6142_v44  ;;  %v2013_v4 = vpop.f32.mrb[71].mxu0  ;;  %6168 = vmatmul.mubr.bf16.vlgmr.msra.gmra.mrb[16].mxu1 %v2106_v33  ;;  %6184 = vmatpush3.bf16.msra.mxu0 %v2105_v39  ;;  %v2086_v44 = vunpack.c.h.bf16 %v7675_v49  ;;  %v7038_v49 = vld [vmem:[#allocation7 + $0x1f0] sm:$0xff]  }
 0x636   :  { %v2093_v10 = vsub.f32 %v2061_v38, %v2077_v45  ;;  %v2062_v11 = vmul.f32 2.0, %v2013_v4  ;;  %6185 = vmatprep.subr.bf16.mxu0 %v2106_v33  ;;  %6216 = vmatpush3.bf16.msra.mxu1 %v7032_v34 }
 0x637   :  { %v2096_v13 = vsub.f32 %v2064_v47, %v2080_v18  ;;  %6217 = vmatprep.subr.bf16.mxu1 %v7033_v43 }
 0x638   :  { %v2094_v16 = vsub.f32 %v2062_v11, %v2078_v14 }
 0x639   :  { %6186 = vmatpush3.bf16.msra.mxu0 %v2106_v33  ;;  %v2108_v51 = vpack.c.bf16 %v2096_v13, %v2095_v15  ;;  %v7037_v33 = vld [vmem:[#allocation7 + $0x1e8] sm:$0xff]  }
 0x63a   :  { %v6145_v19 = vpop.f32.mrb[72].mxu0  ;;  %v2107_v53 = vpack.c.bf16 %v2094_v16, %v2093_v10  ;;  %6218 = vmatpush3.bf16.msra.mxu1 %v7033_v43 }
 0x63b   :  { %v2067_v56 = vmul.f32 2.0, %v6145_v19  ;;  %v2026_v52 = vpop.f32.mrb[73].mxu0  ;;  %6219 = vmatprep.subr.bf16.mxu1 %v7034_v5 }
 0x63c   :  { %v2065_v60 = vmul.f32 2.0, %v2026_v52  ;;  %v6146_v35 = vpop.f32.mrb[74].mxu0  ;;  %6171 = vmatprep.mubr.bf16.mxu1 %v2107_v53  ;;  %6187 = vmatprep.subr.bf16.mxu0 %v2107_v53 }
 0x63d   :  { %v2099_v34 = vsub.f32 %v2067_v56, %v2083_v6  ;;  %v2068_v61 = vmul.f32 2.0, %v6146_v35  ;;  %v2029_v9 = vpop.f32.mrb[75].mxu0  ;;  %6172 = vmatmul.mubr.bf16.gmra.mrb[20].mxu1 %v2108_v51  ;;  %6188 = vmatpush3.bf16.msra.mxu0 %v2107_v53  ;;  %v2405_v53 = vunpack.c.h.bf16 %v7699_v8  ;;  %v2410_v35 = vunpack.c.l.bf16 %v7710_v46 }
 0x63e   :  { %v2097_v12 = vsub.f32 %v2065_v60, %v2081_v57  ;;  %v2066_v36 = vmul.f32 2.0, %v2029_v9  ;;  %6189 = vmatprep.subr.bf16.mxu0 %v2108_v51  ;;  %6220 = vmatpush3.bf16.msra.mxu1 %v7034_v5  ;;  %v2407_v5 = vunpack.c.h.bf16 %v7697_v22 }
 0x63f   :  { %v2100_v17 = vsub.f32 %v2068_v61, %v2084_v62  ;;  %6221 = vmatprep.subr.bf16.mxu1 %v7035_v59  ;;  %v2408_v62 = vunpack.c.l.bf16 %v7713_v40 }
 0x640   :  { %v2098_v21 = vsub.f32 %v2066_v36, %v2082_v20  ;;  %v2411_v36 = vunpack.c.h.bf16 %v7710_v46 }
 0x641   :  { %6190 = vmatpush3.bf16.msra.mxu0 %v2108_v51  ;;  %v2110_v23 = vpack.c.bf16 %v2100_v17, %v2099_v34 }
 0x642   :  { %v6149_v24 = vpop.f32.mrb[76].mxu0  ;;  %v2109_v28 = vpack.c.bf16 %v2098_v21, %v2097_v12  ;;  %6222 = vmatpush3.bf16.msra.mxu1 %v7035_v59 }
 0x643   :  { %v2071_v32 = vmul.f32 2.0, %v6149_v24  ;;  %v2042_v2 = vpop.f32.mrb[77].mxu0  ;;  %6223 = vmatprep.subr.bf16.mxu1 %v7036_v50 }
 0x644   :  { %v2069_v37 = vmul.f32 2.0, %v2042_v2  ;;  %v6150_v39 = vpop.f32.mrb[78].mxu0  ;;  %6175 = vmatprep.mubr.bf16.mxu1 %v2109_v28  ;;  %6191 = vmatprep.subr.bf16.mxu0 %v2109_v28  ;;  %v2414_v2 = vunpack.c.l.bf16 %v7724_v42 }
 0x645   :  { %v2103_v1 = vsub.f32 %v2071_v32, %v2087_v48  ;;  %v2072_v41 = vmul.f32 2.0, %v6150_v39  ;;  %v2045_v43 = vpop.f32.mrb[79].mxu0  ;;  %6176 = vmatmul.mubr.bf16.gmra.mrb[24].mxu1 %v2110_v23  ;;  %6192 = vmatpush3.bf16.msra.mxu0 %v2109_v28 }
 0x646   :  { %v2101_v38 = vsub.f32 %v2069_v37, %v2085_v26  ;;  %v2070_v45 = vmul.f32 2.0, %v2045_v43  ;;  %6193 = vmatprep.subr.bf16.mxu0 %v2110_v23  ;;  %6224 = vmatpush3.bf16.msra.mxu1 %v7036_v50  ;;  %v2409_v50 = vunpack.c.h.bf16 %v7713_v40  ;;  %v2412_v26 = vunpack.c.l.bf16 %v7727_v55 }
 0x647   :  { %v2104_v15 = vsub.f32 %v2072_v41, %v2088_v0  ;;  %6225 = vmatprep.subr.bf16.mxu1 %v7037_v33  ;;  %v2415_v41 = vunpack.c.h.bf16 %v7724_v42 }
 0x648   :  { %v2102_v47 = vsub.f32 %v2070_v45, %v2086_v44 }
 0x649   :  { %6194 = vmatpush3.bf16.msra.mxu0 %v2110_v23  ;;  %v2112_v18 = vpack.c.bf16 %v2104_v15, %v2103_v1 }
 0x64a   :  { %v2111_v4 = vpack.c.bf16 %v2102_v47, %v2101_v38  ;;  %6226 = vmatpush3.bf16.msra.mxu1 %v7037_v33  ;;  %v2413_v38 = vunpack.c.h.bf16 %v7727_v55 }
 0x64b   :  { %6227 = vmatprep.subr.bf16.mxu1 %v7038_v49 }
 0x64c   :  { %6179 = vmatprep.mubr.bf16.mxu1 %v2111_v4  ;;  %6195 = vmatprep.subr.bf16.mxu0 %v2111_v4 }
 0x64d   :  { %6180 = vmatmul.mubr.bf16.gmra.mrb[28].mxu1 %v2112_v18  ;;  %6196 = vmatpush3.bf16.msra.mxu0 %v2111_v4 }
 0x64e   :  { %6197 = vmatprep.subr.bf16.mxu0 %v2112_v18  ;;  %6228 = vmatpush3.bf16.msra.mxu1 %v7038_v49  ;;  %v2418_v49 = vunpack.c.l.bf16 %v7738_v58 }
 0x651   :  { %6198 = vmatpush3.bf16.msra.mxu0 %v2112_v18 }
 0x654   :  { %6200 = vmatmul.mubr.bf16.vlgmr.msra.gmra.mrb[80].mxu0 %v7607_v54  ;;  %v7039_v54 = vld [vmem:[#allocation7 + $0x1f8] sm:$0xff]  }
 0x655   :  { %6203 = vmatprep.mubr.bf16.mxu0 %v7610_v30  ;;  %6229 = vmatprep.subr.bf16.mxu1 %v7039_v54 }
 0x656   :  { %6230 = vmatpush3.bf16.msra.mxu1 %v7039_v54 }
 0x65c   :  { %6204 = vmatmul.mubr.bf16.gmra.mrb[84].mxu0 %v7613_v25 }
 0x65d   :  { %6207 = vmatprep.mubr.bf16.mxu0 %v7616_v27  ;;  %v2406_v27 = vunpack.c.l.bf16 %v7697_v22 }
 0x664   :  { %6208 = vmatmul.mubr.bf16.gmra.mrb[88].mxu0 %v7619_v29 }
 0x665   :  { %6211 = vmatprep.mubr.bf16.mxu0 %v7622_v31  ;;  %v2404_v31 = vunpack.c.l.bf16 %v7699_v8 }
 0x66c   :  { %6212 = vmatmul.mubr.bf16.gmra.mrb[92].mxu0 %v7689_v7 }
 0x66d   :  { %6263 = vmatprep.mubr.bf16.mxu0 %v7780_v63 }
 0x727   :  { %v6201_v30 = vpop.f32.mrb[80].mxu0 }
 0x728   :  { %v2390_v25 = vmul.f32 2.0, %v6201_v30  ;;  %v2325_v10 = vpop.f32.mrb[81].mxu0 }
 0x729   :  { %v2388_v29 = vmul.f32 2.0, %v2325_v10  ;;  %v6202_v11 = vpop.f32.mrb[82].mxu0 }
 0x72a   :  { %v2422_v14 = vsub.f32 %v2390_v25, %v2406_v27  ;;  %v2391_v13 = vmul.f32 2.0, %v6202_v11  ;;  %v2328_v16 = vpop.f32.mrb[83].mxu0  ;;  %v2416_v25 = vunpack.c.l.bf16 %v7741_v3 }
 0x72b   :  { %v2420_v51 = vsub.f32 %v2388_v29, %v2404_v31  ;;  %v2389_v19 = vmul.f32 2.0, %v2328_v16  ;;  %v2419_v29 = vunpack.c.h.bf16 %v7738_v58 }
 0x72c   :  { %v2423_v56 = vsub.f32 %v2391_v13, %v2407_v5 }
 0x72d   :  { %v2421_v6 = vsub.f32 %v2389_v19, %v2405_v53  ;;  %v5221_v19 = vld [vmem:[%s8241_s3] ss:$0 sm:$0xff] }
 0x72e   :  { %v2437_v52 = vpack.c.bf16 %v2423_v56, %v2422_v14  ;;  %v2417_v14 = vunpack.c.h.bf16 %v7741_v3 }
 0x72f   :  { %v6205_v59 = vpop.f32.mrb[84].mxu0  ;;  %v2436_v60 = vpack.c.bf16 %v2421_v6, %v2420_v51 }
 0x730   :  { %v2394_v57 = vmul.f32 2.0, %v6205_v59  ;;  %v2341_v34 = vpop.f32.mrb[85].mxu0 }
 0x731   :  { %v2392_v61 = vmul.f32 2.0, %v2341_v34  ;;  %v6206_v9 = vpop.f32.mrb[86].mxu0  ;;  %6231 = vmatprep.mubr.bf16.mxu1 %v2436_v60 }
 0x732   :  { %v2426_v22 = vsub.f32 %v2394_v57, %v2410_v35  ;;  %v2395_v12 = vmul.f32 2.0, %v6206_v9  ;;  %v2344_v20 = vpop.f32.mrb[87].mxu0  ;;  %6232 = vmatmul.mubr.bf16.vlgmr.msra.gmra.mrb[16].mxu1 %v2437_v52 }
 0x733   :  { %v2424_v8 = vsub.f32 %v2392_v61, %v2408_v62  ;;  %v2393_v17 = vmul.f32 2.0, %v2344_v20 }
 0x734   :  { %v2427_v21 = vsub.f32 %v2395_v12, %v2411_v36 }
 0x735   :  { %v2425_v23 = vsub.f32 %v2393_v17, %v2409_v50 }
 0x736   :  { %v2439_v24 = vpack.c.bf16 %v2427_v21, %v2426_v22 }
 0x737   :  { %v6209_v28 = vpop.f32.mrb[88].mxu0  ;;  %v2438_v32 = vpack.c.bf16 %v2425_v23, %v2424_v8 }
 0x738   :  { %v2398_v48 = vmul.f32 2.0, %v6209_v28  ;;  %v2357_v33 = vpop.f32.mrb[89].mxu0 }
 0x739   :  { %v2396_v37 = vmul.f32 2.0, %v2357_v33  ;;  %v6210_v39 = vpop.f32.mrb[90].mxu0  ;;  %6235 = vmatprep.mubr.bf16.mxu1 %v2438_v32 }
 0x73a   :  { %v2430_v46 = vsub.f32 %v2398_v48, %v2414_v2  ;;  %v2399_v1 = vmul.f32 2.0, %v6210_v39  ;;  %v2360_v0 = vpop.f32.mrb[91].mxu0  ;;  %6236 = vmatmul.mubr.bf16.gmra.mrb[20].mxu1 %v2439_v24 }
 0x73b   :  { %v2428_v40 = vsub.f32 %v2396_v37, %v2412_v26  ;;  %v2397_v43 = vmul.f32 2.0, %v2360_v0 }
 0x73c   :  { %v2431_v45 = vsub.f32 %v2399_v1, %v2415_v41 }
 0x73d   :  { %v2429_v44 = vsub.f32 %v2397_v43, %v2413_v38 }
 0x73e   :  { %v2441_v15 = vpack.c.bf16 %v2431_v45, %v2430_v46 }
 0x73f   :  { %v6213_v47 = vpop.f32.mrb[92].mxu0  ;;  %v2440_v18 = vpack.c.bf16 %v2429_v44, %v2428_v40 }
 0x740   :  { %v2402_v4 = vmul.f32 2.0, %v6213_v47  ;;  %v2373_v54 = vpop.f32.mrb[93].mxu0 }
 0x741   :  { %v2400_v30 = vmul.f32 2.0, %v2373_v54  ;;  %v6214_v27 = vpop.f32.mrb[94].mxu0  ;;  %6239 = vmatprep.mubr.bf16.mxu1 %v2440_v18 }
 0x742   :  { %v2434_v42 = vsub.f32 %v2402_v4, %v2418_v49  ;;  %v2403_v10 = vmul.f32 2.0, %v6214_v27  ;;  %v2376_v31 = vpop.f32.mrb[95].mxu0  ;;  %6240 = vmatmul.mubr.bf16.gmra.mrb[24].mxu1 %v2441_v15 }
 0x743   :  { %v2432_v55 = vsub.f32 %v2400_v30, %v2416_v25  ;;  %v2401_v11 = vmul.f32 2.0, %v2376_v31 }
 0x744   :  { %v2435_v13 = vsub.f32 %v2403_v10, %v2419_v29 }
 0x745   :  { %v2433_v5 = vsub.f32 %v2401_v11, %v2417_v14  ;;  %v7040_v14 = vld [vmem:[#allocation8 + $0x40] sm:$0xff]  }
 0x746   :  { %v2443_v16 = vpack.c.bf16 %v2435_v13, %v2434_v42  ;;  %v7041_v13 = vld [vmem:[#allocation8 + $0x48] sm:$0xff]  }
 0x747   :  { %v2442_v51 = vpack.c.bf16 %v2433_v5, %v2432_v55  ;;  %v7835_v5 = vld [vmem:[#allocation2 + $0x8] sm:$0xff]  }
 0x749   :  { %6243 = vmatprep.mubr.bf16.mxu1 %v2442_v51  ;;  %v7042_v51 = vld [vmem:[#allocation8 + $0x50] sm:$0xff]  }
 0x74a   :  { %6244 = vmatmul.mubr.bf16.gmra.mrb[28].mxu1 %v2443_v16  ;;  %v7838_v16 = vld [vmem:[#allocation2 + $0x10] sm:$0xff]  }
 0x74b   :  { %6359 = vmatprep.mubr.bf16.mxu1 %v7780_v63 }
 0x805   :  { %v6233_v53 = vpop.f32.mrb[16].mxu1 }
 0x806   :  { %v2631_v58 = vadd.f32 %v6233_v53, %v5221_v19  ;;  %v2543_v56 = vpop.f32.mrb[17].mxu1  ;;  %v7841_v53 = vld [vmem:[#allocation2 + $0x18] sm:$0xff]  }
 0x807   :  { %v2629_v6 = vadd.f32 %v5221_v19, %v2543_v56  ;;  %v6234_v52 = vpop.f32.mrb[18].mxu1  ;;  %v7044_v56 = vld [vmem:[#allocation8 + $0x60] sm:$0xff]  }
 0x808   :  { %v2632_v59 = vadd.f32 %v6234_v52, %v5221_v19  ;;  %v2546_v60 = vpop.f32.mrb[19].mxu1  ;;  %v2647_v57 = vmax.f32 %v2631_v58, 0.0  ;;  %v7844_v58 = vld [vmem:[#allocation2 + $0x20] sm:$0xff]   ;;  %v7847_v52 = vld [vmem:[#allocation2 + $0x28] sm:$0xff]  }
 0x809   :  { %v2630_v3 = vadd.f32 %v5221_v19, %v2546_v60  ;;  %v2645_v34 = vmax.f32 %v2629_v6, 0.0  ;;  %v7045_v6 = vld [vmem:[#allocation8 + $0x68] sm:$0xff]   ;;  %v7046_v60 = vld [vmem:[#allocation8 + $0x70] sm:$0xff]  }
 0x80a   :  { %v2648_v35 = vmax.f32 %v2632_v59, 0.0  ;;  %v7850_v59 = vld [vmem:[#allocation2 + $0x30] sm:$0xff]  }
 0x80b   :  { %v2646_v61 = vmax.f32 %v2630_v3, 0.0  ;;  %v7047_v3 = vld [vmem:[#allocation8 + $0x78] sm:$0xff]  }
 0x80c   :  { %v7803_v62 = vpack.c.bf16 %v2648_v35, %v2647_v57  ;;  %v7048_v57 = vld [vmem:[#allocation8] sm:$0xff]  }
 0x80d   :  { %v7805_v9 = vpack.c.bf16 %v2646_v61, %v2645_v34  ;;  %v6237_v22 = vpop.f32.mrb[20].mxu1 }
 0x80e   :  { %v2635_v12 = vadd.f32 %v6237_v22, %v5221_v19  ;;  %v2559_v36 = vpop.f32.mrb[21].mxu1 }
 0x80f   :  { %v2633_v20 = vadd.f32 %v5221_v19, %v2559_v36  ;;  %v6238_v8 = vpop.f32.mrb[22].mxu1  ;;  %6247 = vmatprep.subr.bf16.mxu0 %v7805_v9 }
 0x810   :  { %v2636_v17 = vadd.f32 %v6238_v8, %v5221_v19  ;;  %v2562_v50 = vpop.f32.mrb[23].mxu1  ;;  %6248 = vmatpush3.bf16.msra.mxu0 %v7805_v9  ;;  %v2651_v23 = vmax.f32 %v2635_v12, 0.0 }
 0x811   :  { %v2634_v21 = vadd.f32 %v5221_v19, %v2562_v50  ;;  %6249 = vmatprep.subr.bf16.mxu0 %v7803_v62  ;;  %v2649_v28 = vmax.f32 %v2633_v20, 0.0  ;;  %v7049_v20 = vld [vmem:[#allocation8 + $0x8] sm:$0xff]  }
 0x812   :  { %v2652_v24 = vmax.f32 %v2636_v17, 0.0  ;;  %v7050_v17 = vld [vmem:[#allocation8 + $0x10] sm:$0xff]  }
 0x813   :  { %v2650_v32 = vmax.f32 %v2634_v21, 0.0 }
 0x814   :  { %v7810_v48 = vpack.c.bf16 %v2652_v24, %v2651_v23  ;;  %6250 = vmatpush3.bf16.msra.mxu0 %v7803_v62 }
 0x815   :  { %v7813_v2 = vpack.c.bf16 %v2650_v32, %v2649_v28  ;;  %v6241_v33 = vpop.f32.mrb[24].mxu1  ;;  %v7051_v28 = vld [vmem:[#allocation8 + $0x18] sm:$0xff]  }
 0x816   :  { %v2639_v37 = vadd.f32 %v6241_v33, %v5221_v19  ;;  %v2575_v26 = vpop.f32.mrb[25].mxu1 }
 0x817   :  { %v2637_v39 = vadd.f32 %v5221_v19, %v2575_v26  ;;  %v6242_v46 = vpop.f32.mrb[26].mxu1  ;;  %6251 = vmatprep.subr.bf16.mxu0 %v7813_v2 }
 0x818   :  { %v2640_v1 = vadd.f32 %v6242_v46, %v5221_v19  ;;  %v2578_v41 = vpop.f32.mrb[27].mxu1  ;;  %6252 = vmatpush3.bf16.msra.mxu0 %v7813_v2  ;;  %v2655_v40 = vmax.f32 %v2639_v37, 0.0  ;;  %v7052_v37 = vld [vmem:[#allocation8 + $0x20] sm:$0xff]  }
 0x819   :  { %v2638_v0 = vadd.f32 %v5221_v19, %v2578_v41  ;;  %6253 = vmatprep.subr.bf16.mxu0 %v7810_v48  ;;  %v2653_v38 = vmax.f32 %v2637_v39, 0.0  ;;  %v7053_v41 = vld [vmem:[#allocation8 + $0x28] sm:$0xff]  }
 0x81a   :  { %v2656_v43 = vmax.f32 %v2640_v1, 0.0 }
 0x81b   :  { %v2654_v45 = vmax.f32 %v2638_v0, 0.0 }
 0x81c   :  { %v7818_v44 = vpack.c.bf16 %v2656_v43, %v2655_v40  ;;  %6254 = vmatpush3.bf16.msra.mxu0 %v7810_v48  ;;  %v7054_v43 = vld [vmem:[#allocation8 + $0x30] sm:$0xff]  }
 0x81d   :  { %v7821_v15 = vpack.c.bf16 %v2654_v45, %v2653_v38  ;;  %v6245_v47 = vpop.f32.mrb[28].mxu1 }
 0x81e   :  { %v2643_v18 = vadd.f32 %v6245_v47, %v5221_v19  ;;  %v2591_v4 = vpop.f32.mrb[29].mxu1 }
 0x81f   :  { %v2641_v49 = vadd.f32 %v5221_v19, %v2591_v4  ;;  %v6246_v54 = vpop.f32.mrb[30].mxu1  ;;  %6255 = vmatprep.subr.bf16.mxu0 %v7821_v15  ;;  %v7055_v4 = vld [vmem:[#allocation8 + $0x38] sm:$0xff]  }
 0x820   :  { %v2644_v30 = vadd.f32 %v6246_v54, %v5221_v19  ;;  %v2594_v25 = vpop.f32.mrb[31].mxu1  ;;  %6256 = vmatpush3.bf16.msra.mxu0 %v7821_v15  ;;  %v2659_v42 = vmax.f32 %v2643_v18, 0.0  ;;  %v7057_v54 = vld [vmem:[#allocation8 + $0x88] sm:$0xff]  }
 0x821   :  { %v2642_v27 = vadd.f32 %v5221_v19, %v2594_v25  ;;  %6257 = vmatprep.subr.bf16.mxu0 %v7818_v44  ;;  %v2657_v29 = vmax.f32 %v2641_v49, 0.0  ;;  %v7043_v19 = vld [vmem:[#allocation8 + $0x58] sm:$0xff]   ;;  %v7056_v49 = vld [vmem:[#allocation8 + $0x80] sm:$0xff]  }
 0x822   :  { %v2660_v10 = vmax.f32 %v2644_v30, 0.0  ;;  %v7058_v30 = vld [vmem:[#allocation8 + $0x90] sm:$0xff]   ;;  %v7059_v25 = vld [vmem:[#allocation8 + $0x98] sm:$0xff]  }
 0x823   :  { %v2658_v31 = vmax.f32 %v2642_v27, 0.0  ;;  %v7060_v27 = vld [vmem:[#allocation8 + $0xa0] sm:$0xff]  }
 0x824   :  { %v7826_v55 = vpack.c.bf16 %v2660_v10, %v2659_v42  ;;  %6258 = vmatpush3.bf16.msra.mxu0 %v7818_v44  ;;  %v7061_v42 = vld [vmem:[#allocation8 + $0xa8] sm:$0xff]   ;;  %v7907_v10 = vld [vmem:[#allocation2 + $0x38] sm:$0xff]  }
 0x825   :  { %v7829_v11 = vpack.c.bf16 %v2658_v31, %v2657_v29  ;;  %v7062_v29 = vld [vmem:[#allocation8 + $0xb0] sm:$0xff]   ;;  %v7063_v31 = vld [vmem:[#allocation8 + $0xb8] sm:$0xff]  }
 0x827   :  { %6259 = vmatprep.subr.bf16.mxu0 %v7829_v11 }
 0x828   :  { %6260 = vmatpush3.bf16.msra.mxu0 %v7829_v11 }
 0x829   :  { %6261 = vmatprep.subr.bf16.mxu0 %v7826_v55 }
 0x82c   :  { %6262 = vmatpush3.bf16.msra.mxu0 %v7826_v55 }
 0x82d   :  { %6279 = vmatprep.subr.bf16.mxu0 %v7040_v14 }
 0x82f   :  { %6264 = vmatmul.mubr.bf16.vlgmr.msra.gmra.mrb[96].mxu0 %v7835_v5 }
 0x830   :  { %6267 = vmatprep.mubr.bf16.mxu0 %v7838_v16  ;;  %6280 = vmatpush3.bf16.msra.mxu0 %v7040_v14  ;;  %v7064_v14 = vld [vmem:[#allocation8 + $0xc0] sm:$0xff]  }
 0x831   :  { %6281 = vmatprep.subr.bf16.mxu0 %v7041_v13 }
 0x834   :  { %6282 = vmatpush3.bf16.msra.mxu0 %v7041_v13 }
 0x835   :  { %6283 = vmatprep.subr.bf16.mxu0 %v7042_v51 }
 0x837   :  { %6268 = vmatmul.mubr.bf16.gmra.mrb[100].mxu0 %v7841_v53 }
 0x838   :  { %6271 = vmatprep.mubr.bf16.mxu0 %v7844_v58  ;;  %6284 = vmatpush3.bf16.msra.mxu0 %v7042_v51 }
 0x839   :  { %6285 = vmatprep.subr.bf16.mxu0 %v7043_v19 }
 0x83c   :  { %6286 = vmatpush3.bf16.msra.mxu0 %v7043_v19 }
 0x83d   :  { %6287 = vmatprep.subr.bf16.mxu0 %v7044_v56 }
 0x83f   :  { %6272 = vmatmul.mubr.bf16.gmra.mrb[104].mxu0 %v7847_v52 }
 0x840   :  { %6275 = vmatprep.mubr.bf16.mxu0 %v7850_v59  ;;  %6288 = vmatpush3.bf16.msra.mxu0 %v7044_v56 }
 0x841   :  { %6289 = vmatprep.subr.bf16.mxu0 %v7045_v6 }
 0x844   :  { %6290 = vmatpush3.bf16.msra.mxu0 %v7045_v6 }
 0x845   :  { %6291 = vmatprep.subr.bf16.mxu0 %v7046_v60 }
 0x847   :  { %6276 = vmatmul.mubr.bf16.gmra.mrb[108].mxu0 %v7689_v7 }
 0x848   :  { %6292 = vmatpush3.bf16.msra.mxu0 %v7046_v60  ;;  %v3212_v60 = vunpack.c.l.bf16 %v7803_v62 }
 0x849   :  { %6293 = vmatprep.subr.bf16.mxu0 %v7047_v3 }
 0x84c   :  { %6294 = vmatpush3.bf16.msra.mxu0 %v7047_v3 }
 0x84d   :  { %6311 = vmatprep.subr.bf16.mxu0 %v7048_v57 }
 0x902   :  { %v6265_v35 = vpop.f32.mrb[96].mxu0 }
 0x903   :  { %v2719_v34 = vpop.f32.mrb[97].mxu0 }
 0x904   :  { %v6266_v61 = vpop.f32.mrb[98].mxu0 }
 0x905   :  { %v7854_v22 = vpack.c.bf16 %v6266_v61, %v6265_v35  ;;  %v2722_v12 = vpop.f32.mrb[99].mxu0 }
 0x906   :  { %v7856_v36 = vpack.c.bf16 %v2722_v12, %v2719_v34  ;;  %v3210_v34 = vunpack.c.l.bf16 %v7805_v9  ;;  %v3211_v12 = vunpack.c.h.bf16 %v7805_v9 }
 0x908   :  { %6295 = vmatprep.mubr.bf16.mxu0 %v7856_v36  ;;  %6343 = vmatprep.subr.bf16.mxu1 %v7856_v36 }
 0x909   :  { %6296 = vmatmul.mubr.bf16.vlgmr.msra.gmra.mrb[112].mxu0 %v7854_v22  ;;  %6344 = vmatpush3.bf16.msra.mxu1 %v7856_v36 }
 0x90a   :  { %v6269_v7 = vpop.f32.mrb[100].mxu0  ;;  %6312 = vmatpush3.bf16.msra.mxu0 %v7048_v57  ;;  %6345 = vmatprep.subr.bf16.mxu1 %v7854_v22  ;;  %v3213_v57 = vunpack.c.h.bf16 %v7803_v62 }
 0x90b   :  { %v2735_v8 = vpop.f32.mrb[101].mxu0  ;;  %6313 = vmatprep.subr.bf16.mxu0 %v7049_v20 }
 0x90c   :  { %v6270_v50 = vpop.f32.mrb[102].mxu0 }
 0x90d   :  { %v7863_v21 = vpack.c.bf16 %v6270_v50, %v6269_v7  ;;  %v2738_v23 = vpop.f32.mrb[103].mxu0  ;;  %6346 = vmatpush3.bf16.msra.mxu1 %v7854_v22 }
 0x90e   :  { %v7866_v24 = vpack.c.bf16 %v2738_v23, %v2735_v8  ;;  %6314 = vmatpush3.bf16.msra.mxu0 %v7049_v20 }
 0x90f   :  { %6315 = vmatprep.subr.bf16.mxu0 %v7050_v17 }
 0x910   :  { %6299 = vmatprep.mubr.bf16.mxu0 %v7866_v24  ;;  %6347 = vmatprep.subr.bf16.mxu1 %v7866_v24 }
 0x911   :  { %6300 = vmatmul.mubr.bf16.gmra.mrb[116].mxu0 %v7863_v21  ;;  %6348 = vmatpush3.bf16.msra.mxu1 %v7866_v24 }
 0x912   :  { %v6273_v32 = vpop.f32.mrb[104].mxu0  ;;  %6316 = vmatpush3.bf16.msra.mxu0 %v7050_v17  ;;  %6349 = vmatprep.subr.bf16.mxu1 %v7863_v21 }
 0x913   :  { %v2751_v33 = vpop.f32.mrb[105].mxu0  ;;  %6317 = vmatprep.subr.bf16.mxu0 %v7051_v28 }
 0x914   :  { %v6274_v26 = vpop.f32.mrb[106].mxu0 }
 0x915   :  { %v7873_v39 = vpack.c.bf16 %v6274_v26, %v6273_v32  ;;  %v2754_v46 = vpop.f32.mrb[107].mxu0  ;;  %6350 = vmatpush3.bf16.msra.mxu1 %v7863_v21 }
 0x916   :  { %v7876_v1 = vpack.c.bf16 %v2754_v46, %v2751_v33  ;;  %6318 = vmatpush3.bf16.msra.mxu0 %v7051_v28 }
 0x917   :  { %6319 = vmatprep.subr.bf16.mxu0 %v7052_v37 }
 0x918   :  { %6303 = vmatprep.mubr.bf16.mxu0 %v7876_v1  ;;  %6351 = vmatprep.subr.bf16.mxu1 %v7876_v1 }
 0x919   :  { %6304 = vmatmul.mubr.bf16.gmra.mrb[120].mxu0 %v7873_v39  ;;  %6352 = vmatpush3.bf16.msra.mxu1 %v7876_v1 }
 0x91a   :  { %v6277_v0 = vpop.f32.mrb[108].mxu0  ;;  %6320 = vmatpush3.bf16.msra.mxu0 %v7052_v37  ;;  %6353 = vmatprep.subr.bf16.mxu1 %v7873_v39  ;;  %v7065_v37 = vld [vmem:[#allocation8 + $0xc8] sm:$0xff]  }
 0x91b   :  { %v2767_v40 = vpop.f32.mrb[109].mxu0  ;;  %6321 = vmatprep.subr.bf16.mxu0 %v7053_v41 }
 0x91c   :  { %v6278_v38 = vpop.f32.mrb[110].mxu0 }
 0x91d   :  { %v7883_v45 = vpack.c.bf16 %v6278_v38, %v6277_v0  ;;  %v2770_v47 = vpop.f32.mrb[111].mxu0  ;;  %6354 = vmatpush3.bf16.msra.mxu1 %v7873_v39  ;;  %v3215_v38 = vunpack.c.h.bf16 %v7813_v2 }
 0x91e   :  { %v7886_v18 = vpack.c.bf16 %v2770_v47, %v2767_v40  ;;  %6322 = vmatpush3.bf16.msra.mxu0 %v7053_v41  ;;  %v3217_v41 = vunpack.c.h.bf16 %v7810_v48  ;;  %v3214_v40 = vunpack.c.l.bf16 %v7813_v2 }
 0x91f   :  { %6323 = vmatprep.subr.bf16.mxu0 %v7054_v43 }
 0x920   :  { %6307 = vmatprep.mubr.bf16.mxu0 %v7886_v18  ;;  %6355 = vmatprep.subr.bf16.mxu1 %v7886_v18 }
 0x921   :  { %6308 = vmatmul.mubr.bf16.gmra.mrb[124].mxu0 %v7883_v45  ;;  %6356 = vmatpush3.bf16.msra.mxu1 %v7886_v18 }
 0x922   :  { %6324 = vmatpush3.bf16.msra.mxu0 %v7054_v43  ;;  %6327 = vmatprep.mubr.bf16.mxu0 %v7805_v9  ;;  %v3216_v9 = vunpack.c.l.bf16 %v7810_v48 }
 0x923   :  { %6357 = vmatprep.subr.bf16.mxu1 %v7883_v45  ;;  %6325 = vmatprep.subr.bf16.mxu0 %v7055_v4 }
 0x925   :  { %6358 = vmatpush3.bf16.msra.mxu1 %v7883_v45 }
 0x926   :  { %6326 = vmatpush3.bf16.msra.mxu0 %v7055_v4 }
 0x927   :  { %6375 = vmatprep.subr.bf16.mxu0 %v7056_v49 }
 0x928   :  { %6360 = vmatmul.mubr.bf16.vlgmr.msra.gmra.mrb[32].mxu1 %v7835_v5 }
 0x929   :  { %6328 = vmatmul.mubr.bf16.vlgmr.msra.gmra.mrb[112].mxu0 %v7803_v62  ;;  %6363 = vmatprep.mubr.bf16.mxu1 %v7838_v16 }
 0x92a   :  { %6331 = vmatprep.mubr.bf16.mxu0 %v7813_v2  ;;  %6376 = vmatpush3.bf16.msra.mxu0 %v7056_v49  ;;  %v7066_v49 = vld [vmem:[#allocation8 + $0xd0] sm:$0xff]   ;;  %v7067_v2 = vld [vmem:[#allocation8 + $0xd8] sm:$0xff]  }
 0x92b   :  { %6377 = vmatprep.subr.bf16.mxu0 %v7057_v54 }
 0x92e   :  { %6378 = vmatpush3.bf16.msra.mxu0 %v7057_v54 }
 0x92f   :  { %6379 = vmatprep.subr.bf16.mxu0 %v7058_v30 }
 0x930   :  { %6364 = vmatmul.mubr.bf16.gmra.mrb[36].mxu1 %v7841_v53 }
 0x931   :  { %6332 = vmatmul.mubr.bf16.gmra.mrb[116].mxu0 %v7810_v48  ;;  %6367 = vmatprep.mubr.bf16.mxu1 %v7844_v58 }
 0x932   :  { %6335 = vmatprep.mubr.bf16.mxu0 %v7821_v15  ;;  %6380 = vmatpush3.bf16.msra.mxu0 %v7058_v30 }
 0x933   :  { %6381 = vmatprep.subr.bf16.mxu0 %v7059_v25 }
 0x936   :  { %6382 = vmatpush3.bf16.msra.mxu0 %v7059_v25 }
 0x937   :  { %6383 = vmatprep.subr.bf16.mxu0 %v7060_v27 }
 0x938   :  { %6368 = vmatmul.mubr.bf16.gmra.mrb[40].mxu1 %v7847_v52 }
 0x939   :  { %6336 = vmatmul.mubr.bf16.gmra.mrb[120].mxu0 %v7818_v44  ;;  %6371 = vmatprep.mubr.bf16.mxu1 %v7850_v59 }
 0x93a   :  { %6339 = vmatprep.mubr.bf16.mxu0 %v7829_v11  ;;  %6384 = vmatpush3.bf16.msra.mxu0 %v7060_v27 }
 0x93b   :  { %6385 = vmatprep.subr.bf16.mxu0 %v7061_v42 }
 0x93e   :  { %6386 = vmatpush3.bf16.msra.mxu0 %v7061_v42 }
 0x93f   :  { %6387 = vmatprep.subr.bf16.mxu0 %v7062_v29 }
 0x940   :  { %6372 = vmatmul.mubr.bf16.gmra.mrb[44].mxu1 %v7907_v10 }
 0x941   :  { %6340 = vmatmul.mubr.bf16.gmra.mrb[124].mxu0 %v7826_v55  ;;  %6423 = vmatprep.mubr.bf16.mxu1 %v7780_v63 }
 0x942   :  { %6388 = vmatpush3.bf16.msra.mxu0 %v7062_v29 }
 0x943   :  { %6389 = vmatprep.subr.bf16.mxu0 %v7063_v31 }
 0x946   :  { %6390 = vmatpush3.bf16.msra.mxu0 %v7063_v31 }
 0x947   :  { %6439 = vmatprep.subr.bf16.mxu0 %v7064_v14 }
 0x9fb   :  { %v6361_v13 = vpop.f32.mrb[32].mxu1 }
 0x9fc   :  { %v3196_v51 = vmul.f32 2.0, %v6361_v13  ;;  %v3131_v19 = vpop.f32.mrb[33].mxu1  ;;  %v3220_v13 = vunpack.c.l.bf16 %v7818_v44 }
 0x9fd   :  { %v3194_v56 = vmul.f32 2.0, %v3131_v19  ;;  %v6362_v6 = vpop.f32.mrb[34].mxu1  ;;  %v3221_v19 = vunpack.c.h.bf16 %v7818_v44 }
 0x9fe   :  { %v3197_v3 = vmul.f32 2.0, %v6362_v6  ;;  %v3134_v35 = vpop.f32.mrb[35].mxu1  ;;  %v3228_v20 = vsub.f32 %v3196_v51, %v3212_v60  ;;  %v3218_v6 = vunpack.c.l.bf16 %v7821_v15 }
 0x9ff   :  { %v3195_v61 = vmul.f32 2.0, %v3134_v35  ;;  %v3226_v8 = vsub.f32 %v3194_v56, %v3210_v34  ;;  %v7068_v34 = vld [vmem:[#allocation8 + $0xe0] sm:$0xff]  }
 0xa00   :  { %v3229_v7 = vsub.f32 %v3197_v3, %v3213_v57  ;;  %v3219_v3 = vunpack.c.h.bf16 %v7821_v15  ;;  %v7069_v15 = vld [vmem:[#allocation8 + $0xe8] sm:$0xff]  }
 0xa01   :  { %v3227_v17 = vsub.f32 %v3195_v61, %v3211_v12 }
 0xa02   :  { %v7916_v50 = vpack.c.bf16 %v3229_v7, %v3228_v20 }
 0xa03   :  { %v7918_v23 = vpack.c.bf16 %v3227_v17, %v3226_v8  ;;  %v6365_v28 = vpop.f32.mrb[36].mxu1 }
 0xa04   :  { %v3200_v32 = vmul.f32 2.0, %v6365_v28  ;;  %v3147_v33 = vpop.f32.mrb[37].mxu1 }
 0xa05   :  { %v3198_v26 = vmul.f32 2.0, %v3147_v33  ;;  %v6366_v62 = vpop.f32.mrb[38].mxu1  ;;  %6391 = vmatprep.mubr.bf16.mxu0 %v7918_v23  ;;  %6407 = vmatprep.subr.bf16.mxu1 %v7918_v23  ;;  %v3224_v33 = vunpack.c.l.bf16 %v7826_v55 }
 0xa06   :  { %v3201_v46 = vmul.f32 2.0, %v6366_v62  ;;  %v3150_v0 = vpop.f32.mrb[39].mxu1  ;;  %6392 = vmatmul.mubr.bf16.vlgmr.msra.gmra.mrb[112].mxu0 %v7916_v50  ;;  %6408 = vmatpush3.bf16.msra.mxu1 %v7918_v23  ;;  %v3232_v47 = vsub.f32 %v3200_v32, %v3216_v9  ;;  %v3222_v9 = vunpack.c.l.bf16 %v7829_v11 }
 0xa07   :  { %v3199_v43 = vmul.f32 2.0, %v3150_v0  ;;  %6409 = vmatprep.subr.bf16.mxu1 %v7916_v50  ;;  %6440 = vmatpush3.bf16.msra.mxu0 %v7064_v14  ;;  %v3230_v54 = vsub.f32 %v3198_v26, %v3214_v40  ;;  %v3225_v26 = vunpack.c.h.bf16 %v7826_v55 }
 0xa08   :  { %v3233_v4 = vsub.f32 %v3201_v46, %v3217_v41  ;;  %6441 = vmatprep.subr.bf16.mxu0 %v7065_v37  ;;  %v3223_v41 = vunpack.c.h.bf16 %v7829_v11  ;;  %v7070_v11 = vld [vmem:[#allocation8 + $0xf0] sm:$0xff]  }
 0xa09   :  { %v3231_v30 = vsub.f32 %v3199_v43, %v3215_v38 }
 0xa0a   :  { %v7929_v48 = vpack.c.bf16 %v3233_v4, %v3232_v47  ;;  %6410 = vmatpush3.bf16.msra.mxu1 %v7916_v50  ;;  %v7071_v4 = vld [vmem:[#allocation8 + $0xf8] sm:$0xff]  }
 0xa0b   :  { %v7932_v25 = vpack.c.bf16 %v3231_v30, %v3230_v54  ;;  %v6369_v27 = vpop.f32.mrb[40].mxu1  ;;  %6442 = vmatpush3.bf16.msra.mxu0 %v7065_v37 }
 0xa0c   :  { %v3204_v42 = vmul.f32 2.0, %v6369_v27  ;;  %v3163_v29 = vpop.f32.mrb[41].mxu1  ;;  %6443 = vmatprep.subr.bf16.mxu0 %v7066_v49  ;;  %v3543_v27 = vunpack.c.l.bf16 %v7854_v22 }
 0xa0d   :  { %v3202_v31 = vmul.f32 2.0, %v3163_v29  ;;  %v6370_v14 = vpop.f32.mrb[42].mxu1  ;;  %6395 = vmatprep.mubr.bf16.mxu0 %v7932_v25  ;;  %6411 = vmatprep.subr.bf16.mxu1 %v7932_v25 }
 0xa0e   :  { %v3205_v51 = vmul.f32 2.0, %v6370_v14  ;;  %v3166_v56 = vpop.f32.mrb[43].mxu1  ;;  %6396 = vmatmul.mubr.bf16.gmra.mrb[116].mxu0 %v7929_v48  ;;  %6412 = vmatpush3.bf16.msra.mxu1 %v7932_v25  ;;  %v3236_v57 = vsub.f32 %v3204_v42, %v3220_v13 }
 0xa0f   :  { %v3203_v60 = vmul.f32 2.0, %v3166_v56  ;;  %6413 = vmatprep.subr.bf16.mxu1 %v7929_v48  ;;  %6444 = vmatpush3.bf16.msra.mxu0 %v7066_v49  ;;  %v3234_v61 = vsub.f32 %v3202_v31, %v3218_v6  ;;  %v7072_v49 = vld [vmem:[#allocation8 + $0x100] sm:$0xff]   ;;  %v3542_v6 = vunpack.c.h.bf16 %v7856_v36 }
 0xa10   :  { %v3237_v35 = vsub.f32 %v3205_v51, %v3221_v19  ;;  %6445 = vmatprep.subr.bf16.mxu0 %v7067_v2 }
 0xa11   :  { %v3235_v12 = vsub.f32 %v3203_v60, %v3219_v3 }
 0xa12   :  { %v7943_v44 = vpack.c.bf16 %v3237_v35, %v3236_v57  ;;  %6414 = vmatpush3.bf16.msra.mxu1 %v7929_v48 }
 0xa13   :  { %v7946_v20 = vpack.c.bf16 %v3235_v12, %v3234_v61  ;;  %v6373_v7 = vpop.f32.mrb[44].mxu1  ;;  %6446 = vmatpush3.bf16.msra.mxu0 %v7067_v2  ;;  %v3541_v2 = vunpack.c.l.bf16 %v7856_v36  ;;  %v3547_v12 = vunpack.c.l.bf16 %v7863_v21 }
 0xa14   :  { %v3208_v8 = vmul.f32 2.0, %v6373_v7  ;;  %v3179_v17 = vpop.f32.mrb[45].mxu1  ;;  %6447 = vmatprep.subr.bf16.mxu0 %v7068_v34 }
 0xa15   :  { %v3206_v28 = vmul.f32 2.0, %v3179_v17  ;;  %v6374_v32 = vpop.f32.mrb[46].mxu1  ;;  %6399 = vmatprep.mubr.bf16.mxu0 %v7946_v20  ;;  %6415 = vmatprep.subr.bf16.mxu1 %v7946_v20 }
 0xa16   :  { %v3209_v37 = vmul.f32 2.0, %v6374_v32  ;;  %v3182_v62 = vpop.f32.mrb[47].mxu1  ;;  %6400 = vmatmul.mubr.bf16.gmra.mrb[120].mxu0 %v7943_v44  ;;  %6416 = vmatpush3.bf16.msra.mxu1 %v7946_v20  ;;  %v3240_v0 = vsub.f32 %v3208_v8, %v3224_v33  ;;  %v7073_v8 = vld [vmem:[#allocation8 + $0x108] sm:$0xff]   ;;  %v3548_v32 = vunpack.c.h.bf16 %v7863_v21 }
 0xa17   :  { %v3207_v46 = vmul.f32 2.0, %v3182_v62  ;;  %6417 = vmatprep.subr.bf16.mxu1 %v7943_v44  ;;  %6448 = vmatpush3.bf16.msra.mxu0 %v7068_v34  ;;  %v3238_v43 = vsub.f32 %v3206_v28, %v3222_v9  ;;  %v3546_v62 = vunpack.c.h.bf16 %v7866_v24 }
 0xa18   :  { %v3241_v40 = vsub.f32 %v3209_v37, %v3225_v26  ;;  %6449 = vmatprep.subr.bf16.mxu0 %v7069_v15 }
 0xa19   :  { %v3239_v38 = vsub.f32 %v3207_v46, %v3223_v41  ;;  %v7074_v46 = vld [vmem:[#allocation8 + $0x110] sm:$0xff]  }
 0xa1a   :  { %v7957_v47 = vpack.c.bf16 %v3241_v40, %v3240_v0  ;;  %6418 = vmatpush3.bf16.msra.mxu1 %v7943_v44 }
 0xa1b   :  { %v7960_v55 = vpack.c.bf16 %v3239_v38, %v3238_v43  ;;  %6450 = vmatpush3.bf16.msra.mxu0 %v7069_v15  ;;  %v3551_v38 = vunpack.c.l.bf16 %v7873_v39 }
 0xa1c   :  { %6451 = vmatprep.subr.bf16.mxu0 %v7070_v11 }
 0xa1d   :  { %6403 = vmatprep.mubr.bf16.mxu0 %v7960_v55  ;;  %6419 = vmatprep.subr.bf16.mxu1 %v7960_v55 }
 0xa1e   :  { %6404 = vmatmul.mubr.bf16.gmra.mrb[124].mxu0 %v7957_v47  ;;  %6420 = vmatpush3.bf16.msra.mxu1 %v7960_v55 }
 0xa1f   :  { %6421 = vmatprep.subr.bf16.mxu1 %v7957_v47  ;;  %6452 = vmatpush3.bf16.msra.mxu0 %v7070_v11 }
 0xa20   :  { %6453 = vmatprep.subr.bf16.mxu0 %v7071_v4 }
 0xa22   :  { %6422 = vmatpush3.bf16.msra.mxu1 %v7957_v47 }
 0xa23   :  { %6454 = vmatpush3.bf16.msra.mxu0 %v7071_v4 }
 0xa24   :  { %6503 = vmatprep.subr.bf16.mxu0 %v7072_v49 }
 0xa25   :  { %6424 = vmatmul.mubr.bf16.vlgmr.msra.gmra.mrb[48].mxu1 %v7835_v5 }
 0xa26   :  { %6427 = vmatprep.mubr.bf16.mxu1 %v7838_v16 }
 0xa2d   :  { %6428 = vmatmul.mubr.bf16.gmra.mrb[52].mxu1 %v7841_v53 }
 0xa2e   :  { %6431 = vmatprep.mubr.bf16.mxu1 %v7844_v58 }
 0xa35   :  { %6432 = vmatmul.mubr.bf16.gmra.mrb[56].mxu1 %v7847_v52 }
 0xa36   :  { %6435 = vmatprep.mubr.bf16.mxu1 %v7850_v59 }
 0xa3d   :  { %6436 = vmatmul.mubr.bf16.gmra.mrb[60].mxu1 %v7907_v10 }
 0xa3e   :  { %6487 = vmatprep.mubr.bf16.mxu1 %v7780_v63  ;;  %v3544_v63 = vunpack.c.h.bf16 %v7854_v22  ;;  %v3545_v22 = vunpack.c.l.bf16 %v7866_v24  ;;  %v7075_v24 = vld [vmem:[#allocation8 + $0x118] sm:$0xff]  }
 0xaf8   :  { %v6425_v54 = vpop.f32.mrb[48].mxu1 }
 0xaf9   :  { %v3527_v30 = vmul.f32 2.0, %v6425_v54  ;;  %v3462_v42 = vpop.f32.mrb[49].mxu1 }
 0xafa   :  { %v3525_v29 = vmul.f32 2.0, %v3462_v42  ;;  %v6426_v31 = vpop.f32.mrb[50].mxu1  ;;  %v3552_v42 = vunpack.c.h.bf16 %v7873_v39 }
 0xafb   :  { %v3559_v14 = vsub.f32 %v3527_v30, %v3543_v27  ;;  %v3528_v13 = vmul.f32 2.0, %v6426_v31  ;;  %v3465_v51 = vpop.f32.mrb[51].mxu1 }
 0xafc   :  { %v3557_v19 = vsub.f32 %v3525_v29, %v3541_v2  ;;  %v3526_v56 = vmul.f32 2.0, %v3465_v51 }
 0xafd   :  { %v3560_v60 = vsub.f32 %v3528_v13, %v3544_v63  ;;  %v7076_v63 = vld [vmem:[#allocation8 + $0x120] sm:$0xff]  }
 0xafe   :  { %v3558_v3 = vsub.f32 %v3526_v56, %v3542_v6 }
 0xaff   :  { %v7980_v57 = vpack.c.bf16 %v3560_v60, %v3559_v14  ;;  %v3550_v14 = vunpack.c.h.bf16 %v7876_v1  ;;  %v3555_v60 = vunpack.c.l.bf16 %v7883_v45 }
 0xb00   :  { %v7982_v35 = vpack.c.bf16 %v3558_v3, %v3557_v19  ;;  %v6429_v34 = vpop.f32.mrb[52].mxu1 }
 0xb01   :  { %v3531_v61 = vmul.f32 2.0, %v6429_v34  ;;  %v3478_v7 = vpop.f32.mrb[53].mxu1 }
 0xb02   :  { %v3529_v17 = vmul.f32 2.0, %v3478_v7  ;;  %v6430_v15 = vpop.f32.mrb[54].mxu1  ;;  %6455 = vmatprep.mubr.bf16.mxu0 %v7982_v35  ;;  %6471 = vmatprep.subr.bf16.mxu1 %v7982_v35 }
 0xb03   :  { %v3563_v36 = vsub.f32 %v3531_v61, %v3547_v12  ;;  %v3532_v28 = vmul.f32 2.0, %v6430_v15  ;;  %v3481_v33 = vpop.f32.mrb[55].mxu1  ;;  %6456 = vmatmul.mubr.bf16.vlgmr.msra.gmra.mrb[112].mxu0 %v7980_v57  ;;  %6472 = vmatpush3.bf16.msra.mxu1 %v7982_v35  ;;  %v3553_v61 = vunpack.c.l.bf16 %v7886_v18 }
 0xb04   :  { %v3561_v37 = vsub.f32 %v3529_v17, %v3545_v22  ;;  %v3530_v26 = vmul.f32 2.0, %v3481_v33  ;;  %6473 = vmatprep.subr.bf16.mxu1 %v7980_v57  ;;  %6504 = vmatpush3.bf16.msra.mxu0 %v7072_v49  ;;  %v3549_v49 = vunpack.c.l.bf16 %v7876_v1  ;;  %v7077_v1 = vld [vmem:[#allocation8 + $0x128] sm:$0xff]   ;;  %v3556_v17 = vunpack.c.h.bf16 %v7883_v45 }
 0xb05   :  { %v3564_v9 = vsub.f32 %v3532_v28, %v3548_v32  ;;  %6505 = vmatprep.subr.bf16.mxu0 %v7073_v8  ;;  %v3554_v28 = vunpack.c.h.bf16 %v7886_v18  ;;  %v8039_v18 = vld [vmem:[#allocation2] sm:$0xff]  }
 0xb06   :  { %v3562_v41 = vsub.f32 %v3530_v26, %v3546_v62  ;;  %v7078_v26 = vld [vmem:[#allocation8 + $0x130] sm:$0xff]   ;;  %v7079_v62 = vld [vmem:[#allocation8 + $0x138] sm:$0xff]  }
 0xb07   :  { %v7993_v0 = vpack.c.bf16 %v3564_v9, %v3563_v36  ;;  %6474 = vmatpush3.bf16.msra.mxu1 %v7980_v57  ;;  %v7080_v9 = vld [vmem:[#allocation8 + $0x140] sm:$0xff]  }
 0xb08   :  { %v7996_v21 = vpack.c.bf16 %v3562_v41, %v3561_v37  ;;  %v6433_v40 = vpop.f32.mrb[56].mxu1  ;;  %6506 = vmatpush3.bf16.msra.mxu0 %v7073_v8 }
 0xb09   :  { %v3535_v43 = vmul.f32 2.0, %v6433_v40  ;;  %v3494_v11 = vpop.f32.mrb[57].mxu1  ;;  %6507 = vmatprep.subr.bf16.mxu0 %v7074_v46  ;;  %v3874_v40 = vunpack.c.l.bf16 %v7916_v50 }
 0xb0a   :  { %v3533_v4 = vmul.f32 2.0, %v3494_v11  ;;  %v6434_v54 = vpop.f32.mrb[58].mxu1  ;;  %6459 = vmatprep.mubr.bf16.mxu0 %v7996_v21  ;;  %6475 = vmatprep.subr.bf16.mxu1 %v7996_v21  ;;  %v3872_v11 = vunpack.c.l.bf16 %v7918_v23 }
 0xb0b   :  { %v3567_v30 = vsub.f32 %v3535_v43, %v3551_v38  ;;  %v3536_v27 = vmul.f32 2.0, %v6434_v54  ;;  %v3497_v29 = vpop.f32.mrb[59].mxu1  ;;  %6460 = vmatmul.mubr.bf16.gmra.mrb[116].mxu0 %v7993_v0  ;;  %6476 = vmatpush3.bf16.msra.mxu1 %v7996_v21  ;;  %v3875_v54 = vunpack.c.h.bf16 %v7916_v50  ;;  %v3876_v50 = vunpack.c.l.bf16 %v7932_v25 }
 0xb0c   :  { %v3565_v2 = vsub.f32 %v3533_v4, %v3549_v49  ;;  %v3534_v31 = vmul.f32 2.0, %v3497_v29  ;;  %6477 = vmatprep.subr.bf16.mxu1 %v7993_v0  ;;  %6508 = vmatpush3.bf16.msra.mxu0 %v7074_v46  ;;  %v3873_v29 = vunpack.c.h.bf16 %v7918_v23 }
 0xb0d   :  { %v3568_v13 = vsub.f32 %v3536_v27, %v3552_v42  ;;  %6509 = vmatprep.subr.bf16.mxu0 %v7075_v24 }
 0xb0e   :  { %v3566_v51 = vsub.f32 %v3534_v31, %v3550_v14 }
 0xb0f   :  { %v8007_v19 = vpack.c.bf16 %v3568_v13, %v3567_v30  ;;  %6478 = vmatpush3.bf16.msra.mxu1 %v7993_v0 }
 0xb10   :  { %v8010_v39 = vpack.c.bf16 %v3566_v51, %v3565_v2  ;;  %v6437_v56 = vpop.f32.mrb[60].mxu1  ;;  %6510 = vmatpush3.bf16.msra.mxu0 %v7075_v24 }
 0xb11   :  { %v3539_v6 = vmul.f32 2.0, %v6437_v56  ;;  %v3510_v3 = vpop.f32.mrb[61].mxu1  ;;  %6511 = vmatprep.subr.bf16.mxu0 %v7076_v63  ;;  %v3878_v56 = vunpack.c.l.bf16 %v7929_v48 }
 0xb12   :  { %v3537_v34 = vmul.f32 2.0, %v3510_v3  ;;  %v6438_v12 = vpop.f32.mrb[62].mxu1  ;;  %6463 = vmatprep.mubr.bf16.mxu0 %v8010_v39  ;;  %6479 = vmatprep.subr.bf16.mxu1 %v8010_v39 }
 0xb13   :  { %v3571_v7 = vsub.f32 %v3539_v6, %v3555_v60  ;;  %v3540_v8 = vmul.f32 2.0, %v6438_v12  ;;  %v3513_v22 = vpop.f32.mrb[63].mxu1  ;;  %6464 = vmatmul.mubr.bf16.gmra.mrb[120].mxu0 %v8007_v19  ;;  %6480 = vmatpush3.bf16.msra.mxu1 %v8010_v39  ;;  %v7081_v60 = vld [vmem:[#allocation8 + $0x148] sm:$0xff]  }
 0xb14   :  { %v3569_v15 = vsub.f32 %v3537_v34, %v3553_v61  ;;  %v3538_v36 = vmul.f32 2.0, %v3513_v22  ;;  %6481 = vmatprep.subr.bf16.mxu1 %v8007_v19  ;;  %6512 = vmatpush3.bf16.msra.mxu0 %v7076_v63  ;;  %v3879_v61 = vunpack.c.h.bf16 %v7929_v48 }
 0xb15   :  { %v3572_v32 = vsub.f32 %v3540_v8, %v3556_v17  ;;  %6513 = vmatprep.subr.bf16.mxu0 %v7077_v1  ;;  %v3877_v17 = vunpack.c.h.bf16 %v7932_v25  ;;  %v7083_v25 = vld [vmem:[#allocation8 + $0x158] sm:$0xff]  }
 0xb16   :  { %v3570_v33 = vsub.f32 %v3538_v36, %v3554_v28 }
 0xb17   :  { %v8021_v37 = vpack.c.bf16 %v3572_v32, %v3571_v7  ;;  %6482 = vmatpush3.bf16.msra.mxu1 %v8007_v19 }
 0xb18   :  { %v8024_v45 = vpack.c.bf16 %v3570_v33, %v3569_v15  ;;  %6514 = vmatpush3.bf16.msra.mxu0 %v7077_v1  ;;  %v7082_v15 = vld [vmem:[#allocation8 + $0x150] sm:$0xff]  }
 0xb19   :  { %6515 = vmatprep.subr.bf16.mxu0 %v7078_v26 }
 0xb1a   :  { %6467 = vmatprep.mubr.bf16.mxu0 %v8024_v45  ;;  %6483 = vmatprep.subr.bf16.mxu1 %v8024_v45 }
 0xb1b   :  { %6468 = vmatmul.mubr.bf16.gmra.mrb[124].mxu0 %v8021_v37  ;;  %6484 = vmatpush3.bf16.msra.mxu1 %v8024_v45 }
 0xb1c   :  { %6485 = vmatprep.subr.bf16.mxu1 %v8021_v37  ;;  %6516 = vmatpush3.bf16.msra.mxu0 %v7078_v26  ;;  %v3882_v26 = vunpack.c.l.bf16 %v7943_v44 }
 0xb1d   :  { %6517 = vmatprep.subr.bf16.mxu0 %v7079_v62 }
 0xb1f   :  { %6486 = vmatpush3.bf16.msra.mxu1 %v8021_v37 }
 0xb20   :  { %6518 = vmatpush3.bf16.msra.mxu0 %v7079_v62 }
 0xb21   :  { %6567 = vmatprep.subr.bf16.mxu0 %v7080_v9 }
 0xb22   :  { %6488 = vmatmul.mubr.bf16.vlgmr.msra.gmra.mrb[64].mxu1 %v7835_v5 }
 0xb23   :  { %6491 = vmatprep.mubr.bf16.mxu1 %v7838_v16 }
 0xb2a   :  { %6492 = vmatmul.mubr.bf16.gmra.mrb[68].mxu1 %v7841_v53 }
 0xb2b   :  { %6495 = vmatprep.mubr.bf16.mxu1 %v7844_v58 }
 0xb32   :  { %6496 = vmatmul.mubr.bf16.gmra.mrb[72].mxu1 %v7847_v52 }
 0xb33   :  { %6499 = vmatprep.mubr.bf16.mxu1 %v7850_v59 }
 0xb3a   :  { %6500 = vmatmul.mubr.bf16.gmra.mrb[76].mxu1 %v7907_v10 }
 0xb3b   :  { %6551 = vmatprep.mubr.bf16.mxu1 %v8039_v18 }
 0xbf5   :  { %v6489_v46 = vpop.f32.mrb[64].mxu1 }
 0xbf6   :  { %v3858_v41 = vmul.f32 2.0, %v6489_v46  ;;  %v3793_v43 = vpop.f32.mrb[65].mxu1 }
 0xbf7   :  { %v3856_v38 = vmul.f32 2.0, %v3793_v43  ;;  %v6490_v24 = vpop.f32.mrb[66].mxu1 }
 0xbf8   :  { %v3890_v4 = vsub.f32 %v3858_v41, %v3874_v40  ;;  %v3859_v49 = vmul.f32 2.0, %v6490_v24  ;;  %v3796_v30 = vpop.f32.mrb[67].mxu1 }
 0xbf9   :  { %v3888_v27 = vsub.f32 %v3856_v38, %v3872_v11  ;;  %v3857_v42 = vmul.f32 2.0, %v3796_v30  ;;  %v3883_v38 = vunpack.c.h.bf16 %v7943_v44  ;;  %v7084_v30 = vld [vmem:[#allocation8 + $0x160] sm:$0xff]  }
 0xbfa   :  { %v3891_v2 = vsub.f32 %v3859_v49, %v3875_v54  ;;  %v3881_v49 = vunpack.c.h.bf16 %v7946_v20 }
 0xbfb   :  { %v3889_v31 = vsub.f32 %v3857_v42, %v3873_v29 }
 0xbfc   :  { %v8046_v14 = vpack.c.bf16 %v3891_v2, %v3890_v4 }
 0xbfd   :  { %v8048_v13 = vpack.c.bf16 %v3889_v31, %v3888_v27  ;;  %v6493_v63 = vpop.f32.mrb[68].mxu1  ;;  %v3886_v31 = vunpack.c.l.bf16 %v7957_v47 }
 0xbfe   :  { %v3862_v51 = vmul.f32 2.0, %v6493_v63  ;;  %v3809_v6 = vpop.f32.mrb[69].mxu1 }
 0xbff   :  { %v3860_v3 = vmul.f32 2.0, %v3809_v6  ;;  %v6494_v1 = vpop.f32.mrb[70].mxu1  ;;  %6519 = vmatprep.mubr.bf16.mxu0 %v8048_v13  ;;  %6535 = vmatprep.subr.bf16.mxu1 %v8048_v13 }
 0xc00   :  { %v3894_v23 = vsub.f32 %v3862_v51, %v3878_v56  ;;  %v3863_v34 = vmul.f32 2.0, %v6494_v1  ;;  %v3812_v12 = vpop.f32.mrb[71].mxu1  ;;  %6520 = vmatmul.mubr.bf16.vlgmr.msra.gmra.mrb[112].mxu0 %v8046_v14  ;;  %6536 = vmatpush3.bf16.msra.mxu1 %v8048_v13  ;;  %v3884_v56 = vunpack.c.l.bf16 %v7960_v55 }
 0xc01   :  { %v3892_v7 = vsub.f32 %v3860_v3, %v3876_v50  ;;  %v3861_v8 = vmul.f32 2.0, %v3812_v12  ;;  %6537 = vmatprep.subr.bf16.mxu1 %v8046_v14  ;;  %6568 = vmatpush3.bf16.msra.mxu0 %v7080_v9  ;;  %v3880_v9 = vunpack.c.l.bf16 %v7946_v20  ;;  %v7085_v20 = vld [vmem:[#allocation8 + $0x168] sm:$0xff]   ;;  %v3887_v50 = vunpack.c.h.bf16 %v7957_v47 }
 0xc02   :  { %v3895_v22 = vsub.f32 %v3863_v34, %v3879_v61  ;;  %6569 = vmatprep.subr.bf16.mxu0 %v7081_v60  ;;  %v3885_v61 = vunpack.c.h.bf16 %v7960_v55  ;;  %v7086_v55 = vld [vmem:[#allocation8 + $0x170] sm:$0xff]  }
 0xc03   :  { %v3893_v36 = vsub.f32 %v3861_v8, %v3877_v17  ;;  %v7087_v17 = vld [vmem:[#allocation8 + $0x178] sm:$0xff]  }
 0xc04   :  { %v8059_v28 = vpack.c.bf16 %v3895_v22, %v3894_v23  ;;  %6538 = vmatpush3.bf16.msra.mxu1 %v8046_v14 }
 0xc05   :  { %v8062_v48 = vpack.c.bf16 %v3893_v36, %v3892_v7  ;;  %v6497_v32 = vpop.f32.mrb[72].mxu1  ;;  %6570 = vmatpush3.bf16.msra.mxu0 %v7081_v60 }
 0xc06   :  { %v3866_v33 = vmul.f32 2.0, %v6497_v32  ;;  %v3825_v62 = vpop.f32.mrb[73].mxu1  ;;  %6571 = vmatprep.subr.bf16.mxu0 %v7082_v15  ;;  %v4206_v32 = vunpack.c.h.bf16 %v7980_v57 }
 0xc07   :  { %v3864_v46 = vmul.f32 2.0, %v3825_v62  ;;  %v6498_v41 = vpop.f32.mrb[74].mxu1  ;;  %6523 = vmatprep.mubr.bf16.mxu0 %v8062_v48  ;;  %6539 = vmatprep.subr.bf16.mxu1 %v8062_v48 }
 0xc08   :  { %v3898_v40 = vsub.f32 %v3866_v33, %v3882_v26  ;;  %v3867_v43 = vmul.f32 2.0, %v6498_v41  ;;  %v3828_v11 = vpop.f32.mrb[75].mxu1  ;;  %6524 = vmatmul.mubr.bf16.gmra.mrb[116].mxu0 %v8059_v28  ;;  %6540 = vmatpush3.bf16.msra.mxu1 %v8062_v48 }
 0xc09   :  { %v3896_v24 = vsub.f32 %v3864_v46, %v3880_v9  ;;  %v3865_v4 = vmul.f32 2.0, %v3828_v11  ;;  %6541 = vmatprep.subr.bf16.mxu1 %v8059_v28  ;;  %6572 = vmatpush3.bf16.msra.mxu0 %v7082_v15  ;;  %v4209_v11 = vunpack.c.l.bf16 %v7993_v0 }
 0xc0a   :  { %v3899_v54 = vsub.f32 %v3867_v43, %v3883_v38  ;;  %6573 = vmatprep.subr.bf16.mxu0 %v7083_v25 }
 0xc0b   :  { %v3897_v27 = vsub.f32 %v3865_v4, %v3881_v49  ;;  %v7089_v4 = vld [vmem:[#allocation8 + $0x188] sm:$0xff]  }
 0xc0c   :  { %v8073_v42 = vpack.c.bf16 %v3899_v54, %v3898_v40  ;;  %6542 = vmatpush3.bf16.msra.mxu1 %v8059_v28 }
 0xc0d   :  { %v8076_v44 = vpack.c.bf16 %v3897_v27, %v3896_v24  ;;  %v6501_v29 = vpop.f32.mrb[76].mxu1  ;;  %6574 = vmatpush3.bf16.msra.mxu0 %v7083_v25  ;;  %v4204_v25 = vunpack.c.h.bf16 %v7982_v35  ;;  %v4210_v27 = vunpack.c.h.bf16 %v7993_v0 }
 0xc0e   :  { %v3870_v2 = vmul.f32 2.0, %v6501_v29  ;;  %v3841_v63 = vpop.f32.mrb[77].mxu1  ;;  %6575 = vmatprep.subr.bf16.mxu0 %v7084_v30 }
 0xc0f   :  { %v3868_v51 = vmul.f32 2.0, %v3841_v63  ;;  %v6502_v6 = vpop.f32.mrb[78].mxu1  ;;  %6527 = vmatprep.mubr.bf16.mxu0 %v8076_v44  ;;  %6543 = vmatprep.subr.bf16.mxu1 %v8076_v44  ;;  %v4208_v63 = vunpack.c.h.bf16 %v7996_v21 }
 0xc10   :  { %v3902_v60 = vsub.f32 %v3870_v2, %v3886_v31  ;;  %v3871_v3 = vmul.f32 2.0, %v6502_v6  ;;  %v3844_v1 = vpop.f32.mrb[79].mxu1  ;;  %6528 = vmatmul.mubr.bf16.gmra.mrb[120].mxu0 %v8073_v42  ;;  %6544 = vmatpush3.bf16.msra.mxu1 %v8076_v44 }
 0xc11   :  { %v3900_v23 = vsub.f32 %v3868_v51, %v3884_v56  ;;  %v3869_v34 = vmul.f32 2.0, %v3844_v1  ;;  %6545 = vmatprep.subr.bf16.mxu1 %v8073_v42  ;;  %6576 = vmatpush3.bf16.msra.mxu0 %v7084_v30  ;;  %v7090_v51 = vld [vmem:[#allocation8 + $0x190] sm:$0xff]  }
 0xc12   :  { %v3903_v12 = vsub.f32 %v3871_v3, %v3887_v50  ;;  %6577 = vmatprep.subr.bf16.mxu0 %v7085_v20  ;;  %v4213_v50 = vunpack.c.l.bf16 %v8007_v19 }
 0xc13   :  { %v3901_v7 = vsub.f32 %v3869_v34, %v3885_v61  ;;  %v4211_v34 = vunpack.c.l.bf16 %v8010_v39 }
 0xc14   :  { %v8087_v8 = vpack.c.bf16 %v3903_v12, %v3902_v60  ;;  %6546 = vmatpush3.bf16.msra.mxu1 %v8073_v42 }
 0xc15   :  { %v8090_v47 = vpack.c.bf16 %v3901_v7, %v3900_v23  ;;  %6578 = vmatpush3.bf16.msra.mxu0 %v7085_v20 }
 0xc16   :  { %6579 = vmatprep.subr.bf16.mxu0 %v7086_v55 }
 0xc17   :  { %6531 = vmatprep.mubr.bf16.mxu0 %v8090_v47  ;;  %6547 = vmatprep.subr.bf16.mxu1 %v8090_v47 }
 0xc18   :  { %6532 = vmatmul.mubr.bf16.gmra.mrb[124].mxu0 %v8087_v8  ;;  %6548 = vmatpush3.bf16.msra.mxu1 %v8090_v47 }
 0xc19   :  { %6549 = vmatprep.subr.bf16.mxu1 %v8087_v8  ;;  %6580 = vmatpush3.bf16.msra.mxu0 %v7086_v55  ;;  %v4214_v55 = vunpack.c.h.bf16 %v8007_v19 }
 0xc1a   :  { %6581 = vmatprep.subr.bf16.mxu0 %v7087_v17 }
 0xc1c   :  { %6550 = vmatpush3.bf16.msra.mxu1 %v8087_v8 }
 0xc1d   :  { %6582 = vmatpush3.bf16.msra.mxu0 %v7087_v17 }
 0xc1f   :  { %6552 = vmatmul.mubr.bf16.vlgmr.msra.gmra.mrb[80].mxu1 %v7835_v5  ;;  %v7088_v5 = vld [vmem:[#allocation8 + $0x180] sm:$0xff]  }
 0xc20   :  { %6555 = vmatprep.mubr.bf16.mxu1 %v7838_v16  ;;  %6631 = vmatprep.subr.bf16.mxu0 %v7088_v5 }
 0xc27   :  { %6556 = vmatmul.mubr.bf16.gmra.mrb[84].mxu1 %v7841_v53 }
 0xc28   :  { %6559 = vmatprep.mubr.bf16.mxu1 %v7844_v58  ;;  %v4205_v58 = vunpack.c.l.bf16 %v7980_v57  ;;  %v4207_v57 = vunpack.c.l.bf16 %v7996_v21  ;;  %v7091_v21 = vld [vmem:[#allocation8 + $0x198] sm:$0xff]  }
 0xc2f   :  { %6560 = vmatmul.mubr.bf16.gmra.mrb[88].mxu1 %v7847_v52 }
 0xc30   :  { %6563 = vmatprep.mubr.bf16.mxu1 %v7850_v59  ;;  %v4203_v59 = vunpack.c.l.bf16 %v7982_v35 }
 0xc37   :  { %6564 = vmatmul.mubr.bf16.gmra.mrb[92].mxu1 %v7907_v10 }
 0xc38   :  { %6615 = vmatprep.mubr.bf16.mxu1 %v8039_v18 }
 0xcf2   :  { %v6553_v16 = vpop.f32.mrb[80].mxu1 }
 0xcf3   :  { %v4189_v53 = vmul.f32 2.0, %v6553_v16  ;;  %v4124_v22 = vpop.f32.mrb[81].mxu1 }
 0xcf4   :  { %v4187_v52 = vmul.f32 2.0, %v4124_v22  ;;  %v6554_v15 = vpop.f32.mrb[82].mxu1  ;;  %v7092_v22 = vld [vmem:[#allocation8 + $0x1a0] sm:$0xff]  }
 0xcf5   :  { %v4221_v10 = vsub.f32 %v4189_v53, %v4205_v58  ;;  %v4190_v36 = vmul.f32 2.0, %v6554_v15  ;;  %v4127_v33 = vpop.f32.mrb[83].mxu1  ;;  %v4212_v53 = vunpack.c.h.bf16 %v8010_v39  ;;  %v7093_v39 = vld [vmem:[#allocation8 + $0x1a8] sm:$0xff]  }
 0xcf6   :  { %v4219_v26 = vsub.f32 %v4187_v52, %v4203_v59  ;;  %v4188_v62 = vmul.f32 2.0, %v4127_v33 }
 0xcf7   :  { %v4222_v46 = vsub.f32 %v4190_v36, %v4206_v32  ;;  %v4217_v36 = vunpack.c.l.bf16 %v8021_v37 }
 0xcf8   :  { %v4220_v9 = vsub.f32 %v4188_v62, %v4204_v25 }
 0xcf9   :  { %v8110_v41 = vpack.c.bf16 %v4222_v46, %v4221_v10 }
 0xcfa   :  { %v8112_v40 = vpack.c.bf16 %v4220_v9, %v4219_v26  ;;  %v6557_v43 = vpop.f32.mrb[84].mxu1  ;;  %v4215_v26 = vunpack.c.l.bf16 %v8024_v45  ;;  %v4218_v9 = vunpack.c.h.bf16 %v8021_v37 }
 0xcfb   :  { %v4193_v38 = vmul.f32 2.0, %v6557_v43  ;;  %v4140_v24 = vpop.f32.mrb[85].mxu1 }
 0xcfc   :  { %v4191_v49 = vmul.f32 2.0, %v4140_v24  ;;  %v6558_v54 = vpop.f32.mrb[86].mxu1  ;;  %6583 = vmatprep.mubr.bf16.mxu0 %v8112_v40  ;;  %6599 = vmatprep.subr.bf16.mxu1 %v8112_v40  ;;  %v4216_v24 = vunpack.c.h.bf16 %v8024_v45  ;;  %v8162_v45 = vld [vmem:[#allocation2 + $0x8] sm:$0xff]  }
 0xcfd   :  { %v4225_v35 = vsub.f32 %v4193_v38, %v4209_v11  ;;  %v4194_v30 = vmul.f32 2.0, %v6558_v54  ;;  %v4143_v29 = vpop.f32.mrb[87].mxu1  ;;  %6584 = vmatmul.mubr.bf16.vlgmr.msra.gmra.mrb[112].mxu0 %v8110_v41  ;;  %6600 = vmatpush3.bf16.msra.mxu1 %v8112_v40  ;;  %v8165_v54 = vld [vmem:[#allocation2 + $0x10] sm:$0xff]  }
 0xcfe   :  { %v4223_v2 = vsub.f32 %v4191_v49, %v4207_v57  ;;  %v4192_v31 = vmul.f32 2.0, %v4143_v29  ;;  %6601 = vmatprep.subr.bf16.mxu1 %v8110_v41  ;;  %6632 = vmatpush3.bf16.msra.mxu0 %v7088_v5  ;;  %v8177_v29 = vld [vmem:[#allocation2 + $0x30] sm:$0xff]  }
 0xcff   :  { %v4226_v20 = vsub.f32 %v4194_v30, %v4210_v27  ;;  %6633 = vmatprep.subr.bf16.mxu0 %v7089_v4  ;;  %v8171_v30 = vld [vmem:[#allocation2 + $0x20] sm:$0xff]   ;;  %v8174_v27 = vld [vmem:[#allocation2 + $0x28] sm:$0xff]  }
 0xd00   :  { %v4224_v56 = vsub.f32 %v4192_v31, %v4208_v63  ;;  %v7094_v31 = vld [vmem:[#allocation8 + $0x1b0] sm:$0xff]   ;;  %v7095_v63 = vld [vmem:[#allocation8 + $0x1b8] sm:$0xff]  }
 0xd01   :  { %v8123_v6 = vpack.c.bf16 %v4226_v20, %v4225_v35  ;;  %6602 = vmatpush3.bf16.msra.mxu1 %v8110_v41  ;;  %v8168_v35 = vld [vmem:[#allocation2 + $0x18] sm:$0xff]   ;;  %v7096_v20 = vld [vmem:[#allocation8 + $0x1c0] sm:$0xff]  }
 0xd02   :  { %v8126_v0 = vpack.c.bf16 %v4224_v56, %v4223_v2  ;;  %v6561_v60 = vpop.f32.mrb[88].mxu1  ;;  %6634 = vmatpush3.bf16.msra.mxu0 %v7089_v4  ;;  %v8180_v2 = vld [vmem:[#allocation2 + $0x38] sm:$0xff]  }
 0xd03   :  { %v4197_v3 = vmul.f32 2.0, %v6561_v60  ;;  %v4156_v1 = vpop.f32.mrb[89].mxu1  ;;  %6635 = vmatprep.subr.bf16.mxu0 %v7090_v51  ;;  %v4536_v60 = vunpack.c.l.bf16 %v8046_v14 }
 0xd04   :  { %v4195_v23 = vmul.f32 2.0, %v4156_v1  ;;  %v6562_v61 = vpop.f32.mrb[90].mxu1  ;;  %6587 = vmatprep.mubr.bf16.mxu0 %v8126_v0  ;;  %6603 = vmatprep.subr.bf16.mxu1 %v8126_v0  ;;  %v4534_v1 = vunpack.c.l.bf16 %v8048_v13 }
 0xd05   :  { %v4229_v12 = vsub.f32 %v4197_v3, %v4213_v50  ;;  %v4198_v7 = vmul.f32 2.0, %v6562_v61  ;;  %v4159_v17 = vpop.f32.mrb[91].mxu1  ;;  %6588 = vmatmul.mubr.bf16.gmra.mrb[116].mxu0 %v8123_v6  ;;  %6604 = vmatpush3.bf16.msra.mxu1 %v8126_v0 }
 0xd06   :  { %v4227_v5 = vsub.f32 %v4195_v23, %v4211_v34  ;;  %v4196_v16 = vmul.f32 2.0, %v4159_v17  ;;  %6605 = vmatprep.subr.bf16.mxu1 %v8123_v6  ;;  %6636 = vmatpush3.bf16.msra.mxu0 %v7090_v51 }
 0xd07   :  { %v4230_v58 = vsub.f32 %v4198_v7, %v4214_v55  ;;  %6637 = vmatprep.subr.bf16.mxu0 %v7091_v21  ;;  %v4535_v55 = vunpack.c.h.bf16 %v8048_v13  ;;  %v4541_v13 = vunpack.c.h.bf16 %v8059_v28 }
 0xd08   :  { %v4228_v52 = vsub.f32 %v4196_v16, %v4212_v53 }
 0xd09   :  { %v8137_v59 = vpack.c.bf16 %v4230_v58, %v4229_v12  ;;  %6606 = vmatpush3.bf16.msra.mxu1 %v8123_v6 }
 0xd0a   :  { %v8140_v19 = vpack.c.bf16 %v4228_v52, %v4227_v5  ;;  %v6565_v15 = vpop.f32.mrb[92].mxu1  ;;  %6638 = vmatpush3.bf16.msra.mxu0 %v7091_v21  ;;  %v4540_v52 = vunpack.c.l.bf16 %v8059_v28  ;;  %v4544_v28 = vunpack.c.l.bf16 %v8073_v42 }
 0xd0b   :  { %v4201_v10 = vmul.f32 2.0, %v6565_v15  ;;  %v4172_v32 = vpop.f32.mrb[93].mxu1  ;;  %6639 = vmatprep.subr.bf16.mxu0 %v7092_v22 }
 0xd0c   :  { %v4199_v33 = vmul.f32 2.0, %v4172_v32  ;;  %v6566_v62 = vpop.f32.mrb[94].mxu1  ;;  %6591 = vmatprep.mubr.bf16.mxu0 %v8140_v19  ;;  %6607 = vmatprep.subr.bf16.mxu1 %v8140_v19  ;;  %v4538_v32 = vunpack.c.l.bf16 %v8062_v48 }
 0xd0d   :  { %v4233_v25 = vsub.f32 %v4201_v10, %v4217_v36  ;;  %v4202_v46 = vmul.f32 2.0, %v6566_v62  ;;  %v4175_v43 = vpop.f32.mrb[95].mxu1  ;;  %6592 = vmatmul.mubr.bf16.gmra.mrb[120].mxu0 %v8137_v59  ;;  %6608 = vmatpush3.bf16.msra.mxu1 %v8140_v19  ;;  %v7097_v10 = vld [vmem:[#allocation8 + $0x1c8] sm:$0xff]  }
 0xd0e   :  { %v4231_v38 = vsub.f32 %v4199_v33, %v4215_v26  ;;  %v4200_v11 = vmul.f32 2.0, %v4175_v43  ;;  %6609 = vmatprep.subr.bf16.mxu1 %v8137_v59  ;;  %6640 = vmatpush3.bf16.msra.mxu0 %v7092_v22  ;;  %v7098_v43 = vld [vmem:[#allocation8 + $0x1d0] sm:$0xff]  }
 0xd0f   :  { %v4234_v4 = vsub.f32 %v4202_v46, %v4218_v9  ;;  %6641 = vmatprep.subr.bf16.mxu0 %v7093_v39  ;;  %v4539_v46 = vunpack.c.h.bf16 %v8062_v48  ;;  %v4542_v48 = vunpack.c.l.bf16 %v8076_v44 }
 0xd10   :  { %v4232_v49 = vsub.f32 %v4200_v11, %v4216_v24 }
 0xd11   :  { %v8151_v57 = vpack.c.bf16 %v4234_v4, %v4233_v25  ;;  %6610 = vmatpush3.bf16.msra.mxu1 %v8137_v59 }
 0xd12   :  { %v8154_v37 = vpack.c.bf16 %v4232_v49, %v4231_v38  ;;  %6642 = vmatpush3.bf16.msra.mxu0 %v7093_v39 }
 0xd13   :  { %6643 = vmatprep.subr.bf16.mxu0 %v7094_v31 }
 0xd14   :  { %6595 = vmatprep.mubr.bf16.mxu0 %v8154_v37  ;;  %6611 = vmatprep.subr.bf16.mxu1 %v8154_v37 }
 0xd15   :  { %6596 = vmatmul.mubr.bf16.gmra.mrb[124].mxu0 %v8151_v57  ;;  %6612 = vmatpush3.bf16.msra.mxu1 %v8154_v37 }
 0xd16   :  { %6613 = vmatprep.subr.bf16.mxu1 %v8151_v57  ;;  %6644 = vmatpush3.bf16.msra.mxu0 %v7094_v31 }
 0xd17   :  { %6645 = vmatprep.subr.bf16.mxu0 %v7095_v63 }
 0xd19   :  { %6614 = vmatpush3.bf16.msra.mxu1 %v8151_v57 }
 0xd1a   :  { %6646 = vmatpush3.bf16.msra.mxu0 %v7095_v63  ;;  %v7099_v63 = vld [vmem:[#allocation8 + $0x1d8] sm:$0xff]  }
 0xd1b   :  { %6695 = vmatprep.subr.bf16.mxu0 %v7096_v20 }
 0xd1c   :  { %6616 = vmatmul.mubr.bf16.vlgmr.msra.gmra.mrb[96].mxu1 %v8162_v45 }
 0xd1d   :  { %6619 = vmatprep.mubr.bf16.mxu1 %v8165_v54 }
 0xd24   :  { %6620 = vmatmul.mubr.bf16.gmra.mrb[100].mxu1 %v8168_v35 }
 0xd25   :  { %6623 = vmatprep.mubr.bf16.mxu1 %v8171_v30 }
 0xd2c   :  { %6624 = vmatmul.mubr.bf16.gmra.mrb[104].mxu1 %v8174_v27 }
 0xd2d   :  { %6627 = vmatprep.mubr.bf16.mxu1 %v8177_v29 }
 0xd34   :  { %6628 = vmatmul.mubr.bf16.gmra.mrb[108].mxu1 %v8180_v2 }
 0xd35   :  { %6679 = vmatprep.mubr.bf16.mxu1 %v8039_v18  ;;  %v4537_v18 = vunpack.c.h.bf16 %v8046_v14 }
 0xdef   :  { %v6617_v51 = vpop.f32.mrb[96].mxu1 }
 0xdf0   :  { %v4520_v56 = vmul.f32 2.0, %v6617_v51  ;;  %v4455_v3 = vpop.f32.mrb[97].mxu1 }
 0xdf1   :  { %v4518_v50 = vmul.f32 2.0, %v4455_v3  ;;  %v6618_v21 = vpop.f32.mrb[98].mxu1  ;;  %v4545_v3 = vunpack.c.h.bf16 %v8073_v42  ;;  %v4548_v42 = vunpack.c.l.bf16 %v8087_v8 }
 0xdf2   :  { %v4552_v23 = vsub.f32 %v4520_v56, %v4536_v60  ;;  %v4521_v34 = vmul.f32 2.0, %v6618_v21  ;;  %v4458_v61 = vpop.f32.mrb[99].mxu1 }
 0xdf3   :  { %v4550_v12 = vsub.f32 %v4518_v50, %v4534_v1  ;;  %v4519_v7 = vmul.f32 2.0, %v4458_v61 }
 0xdf4   :  { %v4553_v17 = vsub.f32 %v4521_v34, %v4537_v18  ;;  %v7100_v18 = vld [vmem:[#allocation8 + $0x1e0] sm:$0xff]  }
 0xdf5   :  { %v4551_v5 = vsub.f32 %v4519_v7, %v4535_v55 }
 0xdf6   :  { %v4567_v16 = vpack.c.bf16 %v4553_v17, %v4552_v23  ;;  %v4543_v23 = vunpack.c.h.bf16 %v8076_v44  ;;  %v4546_v44 = vunpack.c.l.bf16 %v8090_v47 }
 0xdf7   :  { %v6621_v53 = vpop.f32.mrb[100].mxu1  ;;  %v4566_v58 = vpack.c.bf16 %v4551_v5, %v4550_v12 }
 0xdf8   :  { %v4524_v22 = vmul.f32 2.0, %v6621_v53  ;;  %v4471_v15 = vpop.f32.mrb[101].mxu1 }
 0xdf9   :  { %v4522_v36 = vmul.f32 2.0, %v4471_v15  ;;  %v6622_v39 = vpop.f32.mrb[102].mxu1  ;;  %6647 = vmatprep.mubr.bf16.mxu0 %v4566_v58  ;;  %6663 = vmatprep.subr.bf16.mxu1 %v4566_v58  ;;  %v4549_v15 = vunpack.c.h.bf16 %v8087_v8  ;;  %v7102_v8 = vld [vmem:[#allocation8 + $0x1f0] sm:$0xff]  }
 0xdfa   :  { %v4556_v14 = vsub.f32 %v4524_v22, %v4540_v52  ;;  %v4525_v33 = vmul.f32 2.0, %v6622_v39  ;;  %v4474_v26 = vpop.f32.mrb[103].mxu1  ;;  %6648 = vmatmul.mubr.bf16.vlgmr.msra.gmra.mrb[112].mxu0 %v4567_v16  ;;  %6664 = vmatpush3.bf16.msra.mxu1 %v4566_v58  ;;  %v4547_v39 = vunpack.c.h.bf16 %v8090_v47  ;;  %v7103_v47 = vld [vmem:[#allocation8 + $0x1f8] sm:$0xff]  }
 0xdfb   :  { %v4554_v62 = vsub.f32 %v4522_v36, %v4538_v32  ;;  %v4523_v25 = vmul.f32 2.0, %v4474_v26  ;;  %6665 = vmatprep.subr.bf16.mxu1 %v4567_v16  ;;  %6696 = vmatpush3.bf16.msra.mxu0 %v7096_v20 }
 0xdfc   :  { %v4557_v9 = vsub.f32 %v4525_v33, %v4541_v13  ;;  %6697 = vmatprep.subr.bf16.mxu0 %v7097_v10 }
 0xdfd   :  { %v4555_v38 = vsub.f32 %v4523_v25, %v4539_v46 }
 0xdfe   :  { %6666 = vmatpush3.bf16.msra.mxu1 %v4567_v16  ;;  %v4569_v11 = vpack.c.bf16 %v4557_v9, %v4556_v14  ;;  %v7101_v16 = vld [vmem:[#allocation8 + $0x1e8] sm:$0xff]  }
 0xdff   :  { %v6625_v24 = vpop.f32.mrb[104].mxu1  ;;  %v4568_v4 = vpack.c.bf16 %v4555_v38, %v4554_v62  ;;  %6698 = vmatpush3.bf16.msra.mxu0 %v7097_v10 }
 0xe00   :  { %v4528_v49 = vmul.f32 2.0, %v6625_v24  ;;  %v4487_v31 = vpop.f32.mrb[105].mxu1  ;;  %6699 = vmatprep.subr.bf16.mxu0 %v7098_v43 }
 0xe01   :  { %v4526_v51 = vmul.f32 2.0, %v4487_v31  ;;  %v6626_v56 = vpop.f32.mrb[106].mxu1  ;;  %6651 = vmatprep.mubr.bf16.mxu0 %v4568_v4  ;;  %6667 = vmatprep.subr.bf16.mxu1 %v4568_v4 }
 0xe02   :  { %v4560_v20 = vsub.f32 %v4528_v49, %v4544_v28  ;;  %v4529_v60 = vmul.f32 2.0, %v6626_v56  ;;  %v4490_v50 = vpop.f32.mrb[107].mxu1  ;;  %6652 = vmatmul.mubr.bf16.gmra.mrb[116].mxu0 %v4569_v11  ;;  %6668 = vmatpush3.bf16.msra.mxu1 %v4568_v4 }
 0xe03   :  { %v4558_v1 = vsub.f32 %v4526_v51, %v4542_v48  ;;  %v4527_v21 = vmul.f32 2.0, %v4490_v50  ;;  %6669 = vmatprep.subr.bf16.mxu1 %v4569_v11  ;;  %6700 = vmatpush3.bf16.msra.mxu0 %v7098_v43  ;;  %v4871_v51 = vunpack.c.l.bf16 %v8123_v6  ;;  %v4872_v50 = vunpack.c.h.bf16 %v8123_v6 }
 0xe04   :  { %v4561_v34 = vsub.f32 %v4529_v60, %v4545_v3  ;;  %6701 = vmatprep.subr.bf16.mxu0 %v7099_v63 }
 0xe05   :  { %v4559_v61 = vsub.f32 %v4527_v21, %v4543_v23  ;;  %v4870_v23 = vunpack.c.h.bf16 %v8126_v0 }
 0xe06   :  { %6670 = vmatpush3.bf16.msra.mxu1 %v4569_v11  ;;  %v4571_v12 = vpack.c.bf16 %v4561_v34, %v4560_v20  ;;  %v4866_v11 = vunpack.c.h.bf16 %v8112_v40  ;;  %v4869_v20 = vunpack.c.l.bf16 %v8126_v0 }
 0xe07   :  { %v6629_v7 = vpop.f32.mrb[108].mxu1  ;;  %v4570_v55 = vpack.c.bf16 %v4559_v61, %v4558_v1  ;;  %6702 = vmatpush3.bf16.msra.mxu0 %v7099_v63 }
 0xe08   :  { %v4532_v17 = vmul.f32 2.0, %v6629_v7  ;;  %v4503_v5 = vpop.f32.mrb[109].mxu1  ;;  %6703 = vmatprep.subr.bf16.mxu0 %v7100_v18 }
 0xe09   :  { %v4530_v53 = vmul.f32 2.0, %v4503_v5  ;;  %v6630_v58 = vpop.f32.mrb[110].mxu1  ;;  %6655 = vmatprep.mubr.bf16.mxu0 %v4570_v55  ;;  %6671 = vmatprep.subr.bf16.mxu1 %v4570_v55 }
 0xe0a   :  { %v4564_v22 = vsub.f32 %v4532_v17, %v4548_v42  ;;  %v4533_v52 = vmul.f32 2.0, %v6630_v58  ;;  %v4506_v10 = vpop.f32.mrb[111].mxu1  ;;  %6656 = vmatmul.mubr.bf16.gmra.mrb[120].mxu0 %v4571_v12  ;;  %6672 = vmatpush3.bf16.msra.mxu1 %v4570_v55  ;;  %v4875_v17 = vunpack.c.l.bf16 %v8137_v59  ;;  %v4876_v58 = vunpack.c.h.bf16 %v8137_v59 }
 0xe0b   :  { %v4562_v36 = vsub.f32 %v4530_v53, %v4546_v44  ;;  %v4531_v32 = vmul.f32 2.0, %v4506_v10  ;;  %6673 = vmatprep.subr.bf16.mxu1 %v4571_v12  ;;  %6704 = vmatpush3.bf16.msra.mxu0 %v7100_v18 }
 0xe0c   :  { %v4565_v14 = vsub.f32 %v4533_v52, %v4549_v15  ;;  %6705 = vmatprep.subr.bf16.mxu0 %v7101_v16  ;;  %v4874_v15 = vunpack.c.h.bf16 %v8140_v19 }
 0xe0d   :  { %v4563_v33 = vsub.f32 %v4531_v32, %v4547_v39 }
 0xe0e   :  { %6674 = vmatpush3.bf16.msra.mxu1 %v4571_v12  ;;  %v4573_v13 = vpack.c.bf16 %v4565_v14, %v4564_v22 }
 0xe0f   :  { %v4572_v26 = vpack.c.bf16 %v4563_v33, %v4562_v36  ;;  %6706 = vmatpush3.bf16.msra.mxu0 %v7101_v16  ;;  %v4873_v16 = vunpack.c.l.bf16 %v8140_v19 }
 0xe10   :  { %6707 = vmatprep.subr.bf16.mxu0 %v7102_v8 }
 0xe11   :  { %6659 = vmatprep.mubr.bf16.mxu0 %v4572_v26  ;;  %6675 = vmatprep.subr.bf16.mxu1 %v4572_v26 }
 0xe12   :  { %6660 = vmatmul.mubr.bf16.gmra.mrb[124].mxu0 %v4573_v13  ;;  %6676 = vmatpush3.bf16.msra.mxu1 %v4572_v26 }
 0xe13   :  { %6677 = vmatprep.subr.bf16.mxu1 %v4573_v13  ;;  %6708 = vmatpush3.bf16.msra.mxu0 %v7102_v8 }
 0xe14   :  { %6709 = vmatprep.subr.bf16.mxu0 %v7103_v47 }
 0xe16   :  { %6678 = vmatpush3.bf16.msra.mxu1 %v4573_v13  ;;  %v4879_v13 = vunpack.c.l.bf16 %v8151_v57 }
 0xe17   :  { %6710 = vmatpush3.bf16.msra.mxu0 %v7103_v47  ;;  %v4877_v47 = vunpack.c.l.bf16 %v8154_v37 }
 0xe19   :  { %6680 = vmatmul.mubr.bf16.vlgmr.msra.gmra.mrb[112].mxu1 %v8162_v45 }
 0xe1a   :  { %6683 = vmatprep.mubr.bf16.mxu1 %v8165_v54  ;;  %v4867_v54 = vunpack.c.l.bf16 %v8110_v41 }
 0xe21   :  { %6684 = vmatmul.mubr.bf16.gmra.mrb[116].mxu1 %v8168_v35 }
 0xe22   :  { %6687 = vmatprep.mubr.bf16.mxu1 %v8171_v30  ;;  %v4865_v30 = vunpack.c.l.bf16 %v8112_v40 }
 0xe29   :  { %6688 = vmatmul.mubr.bf16.gmra.mrb[120].mxu1 %v8174_v27 }
 0xe2a   :  { %6691 = vmatprep.mubr.bf16.mxu1 %v8177_v29  ;;  %v4868_v29 = vunpack.c.h.bf16 %v8110_v41 }
 0xe31   :  { %6692 = vmatmul.mubr.bf16.gmra.mrb[124].mxu1 %v8180_v2 }
 0xeec   :  { %v6681_v62 = vpop.f32.mrb[112].mxu1 }
 0xeed   :  { %v4851_v45 = vmul.f32 2.0, %v6681_v62  ;;  %v4786_v25 = vpop.f32.mrb[113].mxu1 }
 0xeee   :  { %v4849_v35 = vmul.f32 2.0, %v4786_v25  ;;  %v6682_v46 = vpop.f32.mrb[114].mxu1 }
 0xeef   :  { %v4883_v27 = vsub.f32 %v4851_v45, %v4867_v54  ;;  %v4852_v9 = vmul.f32 2.0, %v6682_v46  ;;  %v4789_v2 = vpop.f32.mrb[115].mxu1  ;;  %v4880_v54 = vunpack.c.h.bf16 %v8151_v57 }
 0xef0   :  { %v4881_v43 = vsub.f32 %v4849_v35, %v4865_v30  ;;  %v4850_v38 = vmul.f32 2.0, %v4789_v2  ;;  %v4878_v30 = vunpack.c.h.bf16 %v8154_v37  ;;  %v5286_v2 = vld [vmem:[%s8243_s5] ss:$0 sm:$0xff]  ;;  %s7260_s5 = smov [#allocation10]  }
 0xef1   :  { %v4884_v24 = vsub.f32 %v4852_v9, %v4868_v29  ;;  %s5127_s21 = sshll.u32 %s7260_s5, 4  ;;  %s5128_s21 = int_to_ptr.vmem [resolvable:$true] %s5127_s21 }
 0xef2   :  { %v4882_v4 = vsub.f32 %v4850_v38, %v4866_v11  ;;  %s7224_s22 = scalar_lea.vmem %s5128_s21, 2048  ;;  %p7229_p5 = scmp.lt.s32.totalorder %s5128_s21, %s5128_s21 }
 0xef3   :  { %v4898_v49 = vpack.c.bf16 %v4884_v24, %v4883_v27  ;;  %p7225_p4 = scmp.ne.s32.totalorder %s5128_s21, %s7224_s22  ;;  %p7230_p6 = scmp.lt.s32.totalorder %s7224_s22, %s7224_s22 }
 0xef4   :  { %v6685_v28 = vpop.f32.mrb[116].mxu1  ;;  %v4897_v31 = vpack.c.bf16 %v4882_v4, %v4881_v43 }
 0xef5   :  { %v4855_v63 = vmul.f32 2.0, %v6685_v28  ;;  %v4802_v48 = vpop.f32.mrb[117].mxu1  ;;  %p7231_p7 = por %p7230_p6, %p7229_p5 }
 0xef6   :  { %v4853_v56 = vmul.f32 2.0, %v4802_v48  ;;  %v6686_v60 = vpop.f32.mrb[118].mxu1  ;;  %6711 = vmatprep.mubr.bf16.mxu0 %v4897_v31 }
 0xef7   :  { %v4887_v41 = vsub.f32 %v4855_v63, %v4871_v51  ;;  %v4856_v3 = vmul.f32 2.0, %v6686_v60  ;;  %v4805_v1 = vpop.f32.mrb[119].mxu1  ;;  %6712 = vmatmul.mubr.bf16.vlgmr.msra.gmra.mrb[112].mxu0 %v4898_v49  ;;  %p7232_p8 = pnand %p7231_p7, %p7225_p4 }
 0xef8   :  { %v4885_v40 = vsub.f32 %v4853_v56, %v4869_v20  ;;  %v4854_v21 = vmul.f32 2.0, %v4805_v1 }
 0xef9   :  { %v4888_v34 = vsub.f32 %v4856_v3, %v4872_v50 }
 0xefa   :  { %v4886_v18 = vsub.f32 %v4854_v21, %v4870_v23 }
 0xefb   :  { %v4900_v61 = vpack.c.bf16 %v4888_v34, %v4887_v41 }
 0xefc   :  { %v6689_v12 = vpop.f32.mrb[120].mxu1  ;;  %v4899_v7 = vpack.c.bf16 %v4886_v18, %v4885_v40 }
 0xefd   :  { %v4859_v55 = vmul.f32 2.0, %v6689_v12  ;;  %v4818_v42 = vpop.f32.mrb[121].mxu1 }
 0xefe   :  { %v4857_v5 = vmul.f32 2.0, %v4818_v42  ;;  %v6690_v53 = vpop.f32.mrb[122].mxu1  ;;  %6715 = vmatprep.mubr.bf16.mxu0 %v4899_v7 }
 0xeff   :  { %v4891_v6 = vsub.f32 %v4859_v55, %v4875_v17  ;;  %v4860_v44 = vmul.f32 2.0, %v6690_v53  ;;  %v4821_v22 = vpop.f32.mrb[123].mxu1  ;;  %6716 = vmatmul.mubr.bf16.gmra.mrb[116].mxu0 %v4900_v61 }
 0xf00   :  { %v4889_v0 = vsub.f32 %v4857_v5, %v4873_v16  ;;  %v4858_v52 = vmul.f32 2.0, %v4821_v22 }
 0xf01   :  { %v4892_v10 = vsub.f32 %v4860_v44, %v4876_v58 }
 0xf02   :  { %v4890_v36 = vsub.f32 %v4858_v52, %v4874_v15 }
 0xf03   :  { %v4902_v32 = vpack.c.bf16 %v4892_v10, %v4891_v6 }
 0xf04   :  { %v6693_v39 = vpop.f32.mrb[124].mxu1  ;;  %v4901_v14 = vpack.c.bf16 %v4890_v36, %v4889_v0 }
 0xf05   :  { %v4863_v33 = vmul.f32 2.0, %v6693_v39  ;;  %v4834_v26 = vpop.f32.mrb[125].mxu1 }
 0xf06   :  { %v4861_v8 = vmul.f32 2.0, %v4834_v26  ;;  %v6694_v62 = vpop.f32.mrb[126].mxu1  ;;  %6719 = vmatprep.mubr.bf16.mxu0 %v4901_v14 }
 0xf07   :  { %v4895_v59 = vsub.f32 %v4863_v33, %v4879_v13  ;;  %v4864_v45 = vmul.f32 2.0, %v6694_v62  ;;  %v4837_v25 = vpop.f32.mrb[127].mxu1  ;;  %6720 = vmatmul.mubr.bf16.gmra.mrb[120].mxu0 %v4902_v32 }
 0xf08   :  { %v4893_v19 = vsub.f32 %v4861_v8, %v4877_v47  ;;  %v4862_v35 = vmul.f32 2.0, %v4837_v25 }
 0xf09   :  { %v4896_v46 = vsub.f32 %v4864_v45, %v4880_v54 }
 0xf0a   :  { %v4894_v27 = vsub.f32 %v4862_v35, %v4878_v30 }
 0xf0b   :  { %v4904_v9 = vpack.c.bf16 %v4896_v46, %v4895_v59 }
 0xf0c   :  { %v4903_v29 = vpack.c.bf16 %v4894_v27, %v4893_v19 }
 0xf0e   :  { %6723 = vmatprep.mubr.bf16.mxu0 %v4903_v29 }
 0xf0f   :  { %6724 = vmatmul.mubr.bf16.gmra.mrb[124].mxu0 %v4904_v9 }
 0xfca   :  { %v6713_v43 = vpop.f32.mrb[112].mxu0 }
 0xfcb   :  { %v5092_v38 = vadd.f32 %v6713_v43, %v5286_v2  ;;  %v5004_v11 = vpop.f32.mrb[113].mxu0 }
 0xfcc   :  { %v5090_v57 = vadd.f32 %v5286_v2, %v5004_v11  ;;  %v6714_v24 = vpop.f32.mrb[114].mxu0 }
 0xfcd   :  { %5108 = vst [vmem:[#allocation10 + $0x10] sm:$0xff] %v5092_v38  ;;  %v5093_v4 = vadd.f32 %v6714_v24, %v5286_v2  ;;  %v5007_v49 = vpop.f32.mrb[115].mxu0 }
 0xfce   :  { %5106 = vst [vmem:[#allocation10] sm:$0xff] %v5090_v57  ;;  %v5091_v37 = vadd.f32 %v5286_v2, %v5007_v49 }
 0xfcf   :  { %5109 = vst [vmem:[#allocation10 + $0x18] sm:$0xff] %v5093_v4 }
 0xfd0   :  { %5107 = vst [vmem:[#allocation10 + $0x8] sm:$0xff] %v5091_v37 }
 0xfd2   :  { %v6717_v28 = vpop.f32.mrb[116].mxu0 }
 0xfd3   :  { %v5096_v31 = vadd.f32 %v6717_v28, %v5286_v2  ;;  %v5020_v63 = vpop.f32.mrb[117].mxu0 }
 0xfd4   :  { %v5094_v51 = vadd.f32 %v5286_v2, %v5020_v63  ;;  %v6718_v48 = vpop.f32.mrb[118].mxu0 }
 0xfd5   :  { %5112 = vst [vmem:[#allocation10 + $0x30] sm:$0xff] %v5096_v31  ;;  %v5097_v56 = vadd.f32 %v6718_v48, %v5286_v2  ;;  %v5023_v20 = vpop.f32.mrb[119].mxu0 }
 0xfd6   :  { %5110 = vst [vmem:[#allocation10 + $0x20] sm:$0xff] %v5094_v51  ;;  %v5095_v60 = vadd.f32 %v5286_v2, %v5023_v20 }
 0xfd7   :  { %5113 = vst [vmem:[#allocation10 + $0x38] sm:$0xff] %v5097_v56 }
 0xfd8   :  { %5111 = vst [vmem:[#allocation10 + $0x28] sm:$0xff] %v5095_v60 }
 0xfda   :  { %v6721_v41 = vpop.f32.mrb[120].mxu0 }
 0xfdb   :  { %v5100_v3 = vadd.f32 %v6721_v41, %v5286_v2  ;;  %v5036_v50 = vpop.f32.mrb[121].mxu0 }
 0xfdc   :  { %v5098_v1 = vadd.f32 %v5286_v2, %v5036_v50  ;;  %v6722_v40 = vpop.f32.mrb[122].mxu0 }
 0xfdd   :  { %5116 = vst [vmem:[#allocation10 + $0x50] sm:$0xff] %v5100_v3  ;;  %v5101_v21 = vadd.f32 %v6722_v40, %v5286_v2  ;;  %v5039_v23 = vpop.f32.mrb[123].mxu0 }
 0xfde   :  { %5114 = vst [vmem:[#allocation10 + $0x40] sm:$0xff] %v5098_v1  ;;  %v5099_v34 = vadd.f32 %v5286_v2, %v5039_v23 }
 0xfdf   :  { %5117 = vst [vmem:[#allocation10 + $0x58] sm:$0xff] %v5101_v21 }
 0xfe0   :  { %5115 = vst [vmem:[#allocation10 + $0x48] sm:$0xff] %v5099_v34 }
 0xfe2   :  { %v6725_v18 = vpop.f32.mrb[124].mxu0 }
 0xfe3   :  { %v5104_v61 = vadd.f32 %v6725_v18, %v5286_v2  ;;  %v5052_v12 = vpop.f32.mrb[125].mxu0 }
 0xfe4   :  { %v5102_v7 = vadd.f32 %v5286_v2, %v5052_v12  ;;  %v6726_v55 = vpop.f32.mrb[126].mxu0 }
 0xfe5   :  { %5120 = vst [vmem:[#allocation10 + $0x70] sm:$0xff] %v5104_v61  ;;  %v5105_v17 = vadd.f32 %v6726_v55, %v5286_v2  ;;  %v5055_v42 = vpop.f32.mrb[127].mxu0 }
 0xfe6   :  { %5118 = vst [vmem:[#allocation10 + $0x60] sm:$0xff] %v5102_v7  ;;  %v5103_v5 = vadd.f32 %v5286_v2, %v5055_v42 }
 0xfe7   :  { %5121 = vst [vmem:[#allocation10 + $0x78] sm:$0xff] %v5105_v17 }
 0xfe8   :  { %5119 = vst [vmem:[#allocation10 + $0x68] sm:$0xff] %v5103_v5 }
 0xfe9   :  { %7235 = shalt.err (!%p7232_p8)
}
 0xfea   :  { %s7236_s26 = scalar_lea.hbm %s8244_s6, 2048 }
 0xfeb   :  { %p7237_p9 = scmp.ne.s32.totalorder %s8244_s6, %s7236_s26  ;;  %p7240_p10 = scmp.lt.u32.totalorder %s7236_s26, %s8244_s6 }
 0xfed   :  { %p7242_p11 = pnand %p7240_p10, %p7237_p9 }
 0xfef   :  { %7245 = shalt.err (!%p7242_p11)
}
 0xff0   :  { %s7261_s7 = smov 128   ;;  %s7262_s8 = smov 8  }
 0xff1   :  { %5133 = dma.vmem_to_hbm [thread:$0]  %s5128_s21, 2048, %s8244_s6, [#allocation4], %s7261_s7, %s7261_s7, %s7262_s8  }
 0xff2   :  { %7252 = dma.done.wait [#allocation4], 2048  }
 0xff3   :  { %7253 = vsyncadd [#allocation4], 4294965248 }
 0xff4   :  { %5137 = vsyncpa [#allocation3], 1 }
 0xff5   :  { %5138 = vsyncpa [#allocation6], 1 }
 0xff6   :  { %5139 = vsyncpa [#allocation9], 1 }
 0xff7   :  { %5140 = vsyncpa [#allocation4], 1 }

</bundles_post_ra>
